<compile_context>
chip_gen: v7x
topology: tpu7x:2x2x1
jax: 0.10.0
libtpu: 0.0.40
codegen_flags: <defaults>
</compile_context>

<pallas_src>
import functools

import jax
import jax.numpy as jnp
from jax.experimental import pallas as pl
from jax.experimental.pallas import tpu as pltpu

LANES = 128


def _chip_defaults():
    """(vmem_limit_bytes, row_block_target) tuned per TPU generation."""
    kind = ""
    try:
        kind = jax.devices()[0].device_kind.lower()
    except Exception:
        pass
    if "v5" in kind or "v6" in kind:          # 128 MiB physical VMEM
        return 96 * 1024 * 1024, 2048
    return 48 * 1024 * 1024, 1024             # v7x (64 MiB) / unknown: conservative


VMEM_LIMIT, ROW_BLOCK_TARGET = _chip_defaults()


# ----------------------------------------------------------------------------
# helpers
# ----------------------------------------------------------------------------
def _round_up(x, m):
    return ((x + m - 1) // m) * m


def _pick_rows(m, target=ROW_BLOCK_TARGET):
    """Padded row count + row-block size: full-array block if small, `target` if big."""
    if m <= target:
        mp = _round_up(m, LANES)
        return mp, mp
    mp = _round_up(m, target)
    return mp, target


def _pad2(x, rows, cols):
    r, c = x.shape
    return jnp.pad(x, ((0, rows - r), (0, cols - c)))


def _pad_row(v, cols):
    return jnp.pad(v, (0, cols - v.shape[0])).reshape(1, cols).astype(jnp.float32)


def _elu(x):
    return jnp.where(x > 0, x, jnp.exp(jnp.minimum(x, 0.0)) - 1.0)


# ----------------------------------------------------------------------------
# Kernel A: row-blocked linear  y = act(x @ W + b)    (bf16 operands, f32 MXU acc)
# Used for the per-type feature projection (act='elu') and for the hoisted,
# metapath-concatenated GCN projection hW_all = h @ [W_1 | ... | W_nmp] + b  (act='none').
# ----------------------------------------------------------------------------
def _linear_kernel(x_ref, w_ref, b_ref, o_ref, *, act):
    y = jnp.dot(x_ref[...], w_ref[...], preferred_element_type=jnp.float32) + b_ref[...]
    if act == "elu":
        y = _elu(y)
    o_ref[...] = y.astype(o_ref.dtype)


def linear_act(x, w, b, bm, act="none", out_dtype=jnp.bfloat16):
    M, K = x.shape
    _, N = w.shape
    return pl.pallas_call(
        functools.partial(_linear_kernel, act=act),
        out_shape=jax.ShapeDtypeStruct((M, N), out_dtype),
        grid=(M // bm,),
        in_specs=[
            pl.BlockSpec((bm, K), lambda i: (i, 0)),
            pl.BlockSpec((K, N), lambda i: (0, 0)),      # weight stays VMEM-resident
            pl.BlockSpec((1, N), lambda i: (0, 0)),
        ],
        out_specs=pl.BlockSpec((bm, N), lambda i: (i, 0)),
        compiler_params=pltpu.CompilerParams(
            dimension_semantics=("parallel",), vmem_limit_bytes=VMEM_LIMIT),
    )(x, w, b)


# ----------------------------------------------------------------------------
# Kernel B: metapath-batched GCN aggregation + semantic-attention-score epilogue
#   grid = (metapath, row_block, k_block)   semantics = (parallel, parallel, arbitrary)
#   acc += A[m, i, k] @ hW[k, m]                       (pure MXU, f32 VMEM accumulator)
#   at k==last:  z[m, i] = elu(acc)   (bf16)
#                sc[m, i] = sum_{valid rows} tanh(z @ W_att + b_att) * att_vec
# ----------------------------------------------------------------------------
def _gcn_sem_kernel(a_ref, hw_ref, wa_ref, ba_ref, av_ref, z_ref, sc_ref, acc_ref,
                    *, bm, last_k, n_valid):
    # program_id only at top level (interpret-safe); captured by the pl.when closures.
    i = pl.program_id(1)
    k = pl.program_id(2)
    row_start = i * bm

    @pl.when(k == 0)
    def _():
        acc_ref[...] = jnp.zeros_like(acc_ref)

    acc_ref[...] += jnp.dot(a_ref[...], hw_ref[...], preferred_element_type=jnp.float32)

    @pl.when(k == last_k)
    def _():
        acc = acc_ref[...]
        z = _elu(acc)
        z_ref[...] = z.astype(z_ref.dtype)
        # fused semantic-attention score: masked per-block partial row-sum;
        # the lane-sum, /n_valid and softmax over metapaths finish in (tiny) JAX.
        proj = jnp.tanh(
            jnp.dot(z.astype(wa_ref.dtype), wa_ref[...],
                    preferred_element_type=jnp.float32) + ba_ref[...])
        rows = row_start + jax.lax.broadcasted_iota(jnp.int32, (bm, 1), 0)
        mask = (rows < n_valid).astype(jnp.float32)
        sc_ref[...] = jnp.sum(proj * av_ref[...] * mask, axis=0, keepdims=True)


def run_mp(h, adjs, mpp, n_valid, npad, bm, HP):
    """Returns (z_stack (n_mp, npad, HP) bf16, beta (n_mp,) f32)."""
    n_mp = len(adjs)
    gm = npad // bm

    # Hoisted, metapath-batched GCN projection: one wide-N matmul instead of gm*n_mp.
    W_cat = jnp.concatenate([_pad2(W, HP, HP) for W in mpp["gcn_w"]],
                            axis=1).astype(jnp.bfloat16)          # (HP, n_mp*HP)
    b_cat = jnp.concatenate([_pad_row(b, HP) for b in mpp["gcn_b"]], axis=1)
    hW = linear_act(h, W_cat, b_cat, bm, act="none")              # (npad, n_mp*HP) bf16

    A_stack = jnp.stack([_pad2(A, npad, npad) for A in adjs]).astype(jnp.bfloat16)
    w_att = _pad2(mpp["w_att"], HP, HP).astype(jnp.bfloat16)
    b_att = _pad_row(mpp["b_att"], HP)
    a_vec = _pad_row(mpp["att_vec"], HP)

    z_stack, sc = pl.pallas_call(
        functools.partial(_gcn_sem_kernel, bm=bm, last_k=gm - 1, n_valid=n_valid),
        out_shape=(jax.ShapeDtypeStruct((n_mp, npad, HP), jnp.bfloat16),
                   jax.ShapeDtypeStruct((n_mp, gm, HP), jnp.float32)),
        grid=(n_mp, gm, gm),                                      # reduction axis last
        in_specs=[
            pl.BlockSpec((None, bm, bm), lambda m, i, k: (m, i, k)),   # A tile
            pl.BlockSpec((bm, HP), lambda m, i, k: (k, m)),            # hW k-slab, mp cols
            pl.BlockSpec((HP, HP), lambda m, i, k: (0, 0)),            # W_att (resident)
            pl.BlockSpec((1, HP), lambda m, i, k: (0, 0)),             # b_att
            pl.BlockSpec((1, HP), lambda m, i, k: (0, 0)),             # att_vec
        ],
        out_specs=(pl.BlockSpec((None, bm, HP), lambda m, i, k: (m, i, 0)),
                   pl.BlockSpec((None, 1, HP), lambda m, i, k: (m, i, 0))),
        scratch_shapes=[pltpu.VMEM((bm, HP), jnp.float32)],
        compiler_params=pltpu.CompilerParams(
            dimension_semantics=("parallel", "parallel", "arbitrary"),
            vmem_limit_bytes=VMEM_LIMIT),
    )(A_stack, hW, w_att, b_att, a_vec)

    scores = jnp.sum(sc.reshape(n_mp, -1), axis=1) / n_valid
    beta = jax.nn.softmax(scores)
    return z_stack, beta


# ----------------------------------------------------------------------------
# Kernel C: SC attention over K sampled neighbors, fused with
#   * the beta-weighted metapath combine  z_mp = sum_m beta[m] * z[m]   (prologue)
#   * the final add  z_HIN = z_mp + elu(agg)                            (epilogue)
# Neighbor block stays bf16; each K-slice is promoted to f32 per-op only.
# ----------------------------------------------------------------------------
def _sc_kernel(hs_ref, nei_ref, as_ref, an_ref, z_ref, beta_ref, o_ref, *, n_mp, K, HP):
    # fused metapath combine for this row block (beta pre-broadcast to (1, HP) rows)
    zmp = jnp.zeros(hs_ref.shape, jnp.float32)
    for m in range(n_mp):
        zmp = zmp + z_ref[m].astype(jnp.float32) * beta_ref[m]

    hs = hs_ref[...].astype(jnp.float32)
    a_s = as_ref[...]
    a_n = an_ref[...]
    e_self = jnp.sum(hs * a_s, axis=-1, keepdims=True)                    # (bn, 1)

    e_ks = []
    for k in range(K):                                                    # static unroll
        nei_k = nei_ref[:, k * HP:(k + 1) * HP].astype(jnp.float32)
        e = e_self + jnp.sum(nei_k * a_n, axis=-1, keepdims=True)
        e_ks.append(jnp.where(e > 0, e, 0.2 * e))                         # LeakyReLU(0.2)

    m_e = e_ks[0]
    for e in e_ks[1:]:
        m_e = jnp.maximum(m_e, e)
    p_ks = [jnp.exp(e - m_e) for e in e_ks]
    denom = p_ks[0]
    for p in p_ks[1:]:
        denom = denom + p
    inv = 1.0 / denom                                                     # exact divide

    agg = jnp.zeros_like(zmp)
    for k in range(K):
        nei_k = nei_ref[:, k * HP:(k + 1) * HP].astype(jnp.float32)
        agg = agg + (p_ks[k] * inv) * nei_k

    o_ref[...] = (zmp + _elu(agg)).astype(o_ref.dtype)


def run_sc(h_self, h_nei, nei_index, scp, z_stack, beta, npad, bm, HP):
    K = nei_index.shape[1]
    n_mp = z_stack.shape[0]
    idx = jnp.pad(nei_index, ((0, npad - nei_index.shape[0]), (0, 0)))
    # TODO(synk): move this neighbor gather in-kernel (scalar-prefetch indices + per-row
    # DMA gather) to avoid materializing the K-duplicated (N, K*HP) tensor in HBM.
    nei = jnp.take(h_nei, idx.reshape(-1), axis=0).reshape(npad, K * HP)  # bf16
    a_s = _pad_row(scp["a_self"], HP)
    a_n = _pad_row(scp["a_nei"], HP)
    beta_b = jnp.broadcast_to(beta.astype(jnp.float32)[:, None, None], (n_mp, 1, HP))

    return pl.pallas_call(
        functools.partial(_sc_kernel, n_mp=n_mp, K=K, HP=HP),
        out_shape=jax.ShapeDtypeStruct((npad, HP), jnp.float32),
        grid=(npad // bm,),
        in_specs=[
            pl.BlockSpec((bm, HP), lambda i: (i, 0)),            # h_self
            pl.BlockSpec((bm, K * HP), lambda i: (i, 0)),        # gathered neighbors (bf16)
            pl.BlockSpec((1, HP), lambda i: (0, 0)),             # a_self
            pl.BlockSpec((1, HP), lambda i: (0, 0)),             # a_nei
            pl.BlockSpec((n_mp, bm, HP), lambda i: (0, i, 0)),   # per-metapath z (bf16)
            pl.BlockSpec((n_mp, 1, HP), lambda i: (0, 0, 0)),    # beta (lane-broadcast)
        ],
        out_specs=pl.BlockSpec((bm, HP), lambda i: (i, 0)),
        compiler_params=pltpu.CompilerParams(
            dimension_semantics=("parallel",), vmem_limit_bytes=VMEM_LIMIT),
    )(h_self, nei, a_s, a_n, z_stack, beta_b)


# ----------------------------------------------------------------------------
# parameters
# ----------------------------------------------------------------------------
def xavier_normal(key, shape, gain=1.414):
    fan_in, fan_out = shape
    std = gain * (2.0 / (fan_in + fan_out)) ** 0.5
    return std * jax.random.normal(key, shape, jnp.float32)


def init_params(key, feats_dim_list, hidden_dim, n_mp_d, n_mp_p):
    keys = iter(jax.random.split(key, 64))
    p = {"fc_w": [], "fc_b": []}
    for fd in feats_dim_list:
        p["fc_w"].append(xavier_normal(next(keys), (fd, hidden_dim)))
        p["fc_b"].append(jnp.zeros((hidden_dim,), jnp.float32))

    def mp_params(n_mp):
        return {
            "gcn_w": [xavier_normal(next(keys), (hidden_dim, hidden_dim)) for _ in range(n_mp)],
            "gcn_b": [jnp.zeros((hidden_dim,), jnp.float32) for _ in range(n_mp)],
            "w_att": xavier_normal(next(keys), (hidden_dim, hidden_dim)),
            "b_att": jnp.zeros((hidden_dim,), jnp.float32),
            "att_vec": xavier_normal(next(keys), (hidden_dim, 1))[:, 0],
        }

    p["mp_d"] = mp_params(n_mp_d)
    p["mp_p"] = mp_params(n_mp_p)
    p["sc_d"] = {"a_self": xavier_normal(next(keys), (hidden_dim, 1))[:, 0],
                 "a_nei": xavier_normal(next(keys), (hidden_dim, 1))[:, 0]}
    p["sc_p"] = {"a_self": xavier_normal(next(keys), (hidden_dim, 1))[:, 0],
                 "a_nei": xavier_normal(next(keys), (hidden_dim, 1))[:, 0]}
    return p


# ----------------------------------------------------------------------------
# forward
# ----------------------------------------------------------------------------
def from_hin_forward(params, feats, P_d, P_p, Nei_d_index, Nei_p_index, hidden_dim):
    H = hidden_dim
    # NOTE: for production H (e.g. 32/64) padding to 128 lanes wastes up to 4x throughput;
    # accept H>=128 in the model config or pack multiple hidden blocks per lane group.
    HP = _round_up(H, LANES)

    # per-type projection h_i = elu(feats_i @ W_i + b_i); feat_drop==0 -> identity
    h_all, n_valid, n_pad, row_blk = [], [], [], []
    for i, x in enumerate(feats):
        M, F = x.shape
        Mp, bm = _pick_rows(M)
        Fp = _round_up(F, LANES)
        xp = _pad2(x, Mp, Fp).astype(jnp.bfloat16)
        w = _pad2(params["fc_w"][i], Fp, HP).astype(jnp.bfloat16)
        b = _pad_row(params["fc_b"][i], HP)
        h_all.append(linear_act(xp, w, b, bm, act="elu"))
        n_valid.append(M); n_pad.append(Mp); row_blk.append(bm)

    # MP encoder: metapath-batched GCN + fused semantic-attention score
    z_d_stack, beta_d = run_mp(h_all[0], P_d, params["mp_d"],
                               n_valid[0], n_pad[0], row_blk[0], HP)
    z_p_stack, beta_p = run_mp(h_all[1], P_p, params["mp_p"],
                               n_valid[1], n_pad[1], row_blk[1], HP)

    # SC encoder with fused metapath combine + final add
    z_HIN_d = run_sc(h_all[0], h_all[1], Nei_d_index, params["sc_d"],
                     z_d_stack, beta_d, n_pad[0], row_blk[0], HP)
    z_HIN_p = run_sc(h_all[1], h_all[0], Nei_p_index, params["sc_p"],
                     z_p_stack, beta_p, n_pad[1], row_blk[1], HP)

    return z_HIN_d[:n_valid[0], :H], z_HIN_p[:n_valid[1], :H]


# ----------------------------------------------------------------------------
# pure-JAX f32 reference (correctness check)
# ----------------------------------------------------------------------------
def reference_forward(params, feats, P_d, P_p, Nei_d_index, Nei_p_index):
    h = [_elu(feats[i] @ params["fc_w"][i] + params["fc_b"][i]) for i in range(len(feats))]

    def mp(hx, adjs, p):
        zs, sc = [], []
        for A, W, b in zip(adjs, p["gcn_w"], p["gcn_b"]):
            z = _elu(A @ (hx @ W + b))
            zs.append(z)
            sc.append(jnp.mean(jnp.tanh(z @ p["w_att"] + p["b_att"]) @ p["att_vec"]))
        beta = jax.nn.softmax(jnp.stack(sc))
        return sum(beta[i] * zs[i] for i in range(len(zs)))

    def sc(h_s, h_n, idx, p):
        nei = h_n[idx]
        e = (jnp.sum(h_s * p["a_self"], -1, keepdims=True)
             + jnp.sum(nei * p["a_nei"], -1))
        e = jnp.where(e > 0, e, 0.2 * e)
        alpha = jax.nn.softmax(e, axis=-1)
        return _elu(jnp.sum(alpha[..., None] * nei, axis=1))

    z_mp_d = mp(h[0], P_d, params["mp_d"]); z_mp_p = mp(h[1], P_p, params["mp_p"])
    z_sc_d = sc(h[0], h[1], Nei_d_index, params["sc_d"])
    z_sc_p = sc(h[1], h[0], Nei_p_index, params["sc_p"])
    return z_mp_d + z_sc_d, z_mp_p + z_sc_p


# ----------------------------------------------------------------------------
if __name__ == "__main__":
    key = jax.random.PRNGKey(0)
    k_feat_d, k_feat_p, k_pd, k_pp, k_nd, k_np, k_params = jax.random.split(key, 7)

    N_d, N_p = 16, 24                   # drug / protein node counts
    feats_dim_list = [40, 48]
    hidden_dim = 32
    n_mp_d, n_mp_p = 2, 2               # metapaths per node type
    K_d, K_p = 4, 4                     # sampled neighbors per node

    feats = [
        jax.random.normal(k_feat_d, (N_d, feats_dim_list[0]), jnp.float32),
        jax.random.normal(k_feat_p, (N_p, feats_dim_list[1]), jnp.float32),
    ]

    def make_adjs(k, n, n_mp):
        a = jax.random.uniform(k, (n_mp, n, n), jnp.float32)
        return [a[i] / jnp.sum(a[i], axis=-1, keepdims=True) for i in range(n_mp)]

    P_d = make_adjs(k_pd, N_d, n_mp_d)
    P_p = make_adjs(k_pp, N_p, n_mp_p)
    Nei_d_index = jax.random.randint(k_nd, (N_d, K_d), 0, N_p)
    Nei_p_index = jax.random.randint(k_np, (N_p, K_p), 0, N_d)

    params = init_params(k_params, feats_dim_list, hidden_dim, n_mp_d, n_mp_p)

    fwd = jax.jit(functools.partial(from_hin_forward, hidden_dim=hidden_dim))
    z_HIN_d, z_HIN_p = fwd(params, feats, P_d, P_p, Nei_d_index, Nei_p_index)
    jax.block_until_ready((z_HIN_d, z_HIN_p))

    assert z_HIN_d.shape == (N_d, hidden_dim)
    assert z_HIN_p.shape == (N_p, hidden_dim)
    assert bool(jnp.all(jnp.isfinite(z_HIN_d))) and bool(jnp.all(jnp.isfinite(z_HIN_p)))

    # correctness vs f32 reference (kernels use bf16 matmuls, so tolerance is loose)
    ref_d, ref_p = jax.jit(reference_forward)(params, feats, P_d, P_p,
                                              Nei_d_index, Nei_p_index)
    err = max(float(jnp.max(jnp.abs(z_HIN_d - ref_d))),
              float(jnp.max(jnp.abs(z_HIN_p - ref_p))))
    assert err < 0.3, f"mismatch vs f32 reference: max abs err {err}"

    print("KERNEL_OK")
</pallas_src>

<mosaic_0001>
module attributes {stable_mosaic.version = 11 : i64} {
  func.func @_linear_kernel(%arg0: i32, %arg1: memref<128x128xbf16, #tpu.memory_space<vmem>>, %arg2: memref<128x128xbf16, #tpu.memory_space<vmem>>, %arg3: memref<1x128xf32, #tpu.memory_space<vmem>>, %arg4: memref<128x128xbf16, #tpu.memory_space<vmem>>) attributes {dimension_semantics = [#tpu.dimension_semantics<parallel>], iteration_bounds = array<i64: 1>, scalar_prefetch = 0 : i64, scratch_operands = 0 : i64, tpu.core_type = #tpu.core_type<tc>, window_params = [{transform_indices = @transform_0, window_bounds = array<i64: 128, 128>}, {pipeline_mode = #tpu.pipeline_mode<synchronous>, transform_indices = @transform_1, window_bounds = array<i64: 128, 128>}, {pipeline_mode = #tpu.pipeline_mode<synchronous>, transform_indices = @transform_2, window_bounds = array<i64: 1, 128>}, {transform_indices = @transform_3, window_bounds = array<i64: 128, 128>}]} {
    %c0 = arith.constant 0 : index
    %c0_0 = arith.constant 0 : index
    %0 = vector.load %arg1[%c0, %c0_0] : memref<128x128xbf16, #tpu.memory_space<vmem>>, vector<128x128xbf16>
    %c0_1 = arith.constant 0 : index
    %c0_2 = arith.constant 0 : index
    %1 = vector.load %arg2[%c0_1, %c0_2] : memref<128x128xbf16, #tpu.memory_space<vmem>>, vector<128x128xbf16>
    %cst = arith.constant dense<0.000000e+00> : vector<128x128xf32>
    %2 = tpu.matmul %0, %1, %cst {dimension_numbers = #tpu.dot_dimension_numbers<[1], [0], [0], [1], [0, 0, 1, 1], [], []>} : vector<128x128xbf16>, vector<128x128xbf16>, vector<128x128xf32> -> vector<128x128xf32>
    %c0_3 = arith.constant 0 : index
    %c0_4 = arith.constant 0 : index
    %3 = vector.load %arg3[%c0_3, %c0_4] : memref<1x128xf32, #tpu.memory_space<vmem>>, vector<1x128xf32>
    %4 = vector.broadcast %3 : vector<1x128xf32> to vector<128x128xf32>
    %5 = arith.addf %2, %4 : vector<128x128xf32>
    %cst_5 = arith.constant 0.000000e+00 : f32
    %6 = vector.broadcast %cst_5 : f32 to vector<128x128xf32>
    %7 = arith.cmpf ogt, %5, %6 : vector<128x128xf32>
    %cst_6 = arith.constant 0.000000e+00 : f32
    %8 = vector.broadcast %cst_6 : f32 to vector<128x128xf32>
    %9 = arith.minimumf %5, %8 : vector<128x128xf32>
    %10 = math.exp %9 : vector<128x128xf32>
    %cst_7 = arith.constant 1.000000e+00 : f32
    %11 = vector.broadcast %cst_7 : f32 to vector<128x128xf32>
    %12 = arith.subf %10, %11 : vector<128x128xf32>
    %13 = arith.select %7, %5, %12 : vector<128x128xi1>, vector<128x128xf32>
    %14 = arith.truncf %13 : vector<128x128xf32> to vector<128x128xbf16>
    %c0_8 = arith.constant 0 : index
    %c0_9 = arith.constant 0 : index
    %15 = vector.load %arg4[%c0_8, %c0_9] : memref<128x128xbf16, #tpu.memory_space<vmem>>, vector<128x128xbf16>
    tpu.vector_store %arg4[%c0_8, %c0_9], %14 {strides = array<i32>} : memref<128x128xbf16, #tpu.memory_space<vmem>>, vector<128x128xbf16>,
    return
  }
  func.func @transform_0(%arg0: i32) -> (i32, i32) {
    %c0_i32 = arith.constant 0 : i32
    %c0_i32_0 = arith.constant 0 : i32
    return %arg0, %c0_i32 : i32, i32
  }
  func.func @transform_1(%arg0: i32) -> (i32, i32) {
    %c0_i32 = arith.constant 0 : i32
    %c0_i32_0 = arith.constant 0 : i32
    %c0_i32_1 = arith.constant 0 : i32
    return %c0_i32, %c0_i32_0 : i32, i32
  }
  func.func @transform_2(%arg0: i32) -> (i32, i32) {
    %c0_i32 = arith.constant 0 : i32
    %c0_i32_0 = arith.constant 0 : i32
    %c0_i32_1 = arith.constant 0 : i32
    return %c0_i32, %c0_i32_0 : i32, i32
  }
  func.func @transform_3(%arg0: i32) -> (i32, i32) {
    %c0_i32 = arith.constant 0 : i32
    %c0_i32_0 = arith.constant 0 : i32
    return %arg0, %c0_i32 : i32, i32
  }
}

module attributes {stable_mosaic.version = 11 : i64} {
  func.func @_linear_kernel(%arg0: i32, %arg1: memref<128x128xbf16, #tpu.memory_space<vmem>>, %arg2: memref<128x256xbf16, #tpu.memory_space<vmem>>, %arg3: memref<1x256xf32, #tpu.memory_space<vmem>>, %arg4: memref<128x256xbf16, #tpu.memory_space<vmem>>) attributes {dimension_semantics = [#tpu.dimension_semantics<parallel>], iteration_bounds = array<i64: 1>, scalar_prefetch = 0 : i64, scratch_operands = 0 : i64, tpu.core_type = #tpu.core_type<tc>, window_params = [{transform_indices = @transform_0, window_bounds = array<i64: 128, 128>}, {pipeline_mode = #tpu.pipeline_mode<synchronous>, transform_indices = @transform_1, window_bounds = array<i64: 128, 256>}, {pipeline_mode = #tpu.pipeline_mode<synchronous>, transform_indices = @transform_2, window_bounds = array<i64: 1, 256>}, {transform_indices = @transform_3, window_bounds = array<i64: 128, 256>}]} {
    %c0 = arith.constant 0 : index
    %c0_0 = arith.constant 0 : index
    %0 = vector.load %arg1[%c0, %c0_0] : memref<128x128xbf16, #tpu.memory_space<vmem>>, vector<128x128xbf16>
    %c0_1 = arith.constant 0 : index
    %c0_2 = arith.constant 0 : index
    %1 = vector.load %arg2[%c0_1, %c0_2] : memref<128x256xbf16, #tpu.memory_space<vmem>>, vector<128x256xbf16>
    %cst = arith.constant dense<0.000000e+00> : vector<128x256xf32>
    %2 = tpu.matmul %0, %1, %cst {dimension_numbers = #tpu.dot_dimension_numbers<[1], [0], [0], [1], [0, 0, 1, 1], [], []>} : vector<128x128xbf16>, vector<128x256xbf16>, vector<128x256xf32> -> vector<128x256xf32>
    %c0_3 = arith.constant 0 : index
    %c0_4 = arith.constant 0 : index
    %3 = vector.load %arg3[%c0_3, %c0_4] : memref<1x256xf32, #tpu.memory_space<vmem>>, vector<1x256xf32>
    %4 = vector.broadcast %3 : vector<1x256xf32> to vector<128x256xf32>
    %5 = arith.addf %2, %4 : vector<128x256xf32>
    %6 = arith.truncf %5 : vector<128x256xf32> to vector<128x256xbf16>
    %c0_5 = arith.constant 0 : index
    %c0_6 = arith.constant 0 : index
    %7 = vector.load %arg4[%c0_5, %c0_6] : memref<128x256xbf16, #tpu.memory_space<vmem>>, vector<128x256xbf16>
    tpu.vector_store %arg4[%c0_5, %c0_6], %6 {strides = array<i32>} : memref<128x256xbf16, #tpu.memory_space<vmem>>, vector<128x256xbf16>,
    return
  }
  func.func @transform_0(%arg0: i32) -> (i32, i32) {
    %c0_i32 = arith.constant 0 : i32
    %c0_i32_0 = arith.constant 0 : i32
    return %arg0, %c0_i32 : i32, i32
  }
  func.func @transform_1(%arg0: i32) -> (i32, i32) {
    %c0_i32 = arith.constant 0 : i32
    %c0_i32_0 = arith.constant 0 : i32
    %c0_i32_1 = arith.constant 0 : i32
    return %c0_i32, %c0_i32_0 : i32, i32
  }
  func.func @transform_2(%arg0: i32) -> (i32, i32) {
    %c0_i32 = arith.constant 0 : i32
    %c0_i32_0 = arith.constant 0 : i32
    %c0_i32_1 = arith.constant 0 : i32
    return %c0_i32, %c0_i32_0 : i32, i32
  }
  func.func @transform_3(%arg0: i32) -> (i32, i32) {
    %c0_i32 = arith.constant 0 : i32
    %c0_i32_0 = arith.constant 0 : i32
    return %arg0, %c0_i32 : i32, i32
  }
}

module attributes {stable_mosaic.version = 11 : i64} {
  func.func @_gcn_sem_kernel(%arg0: i32, %arg1: i32, %arg2: i32, %arg3: memref<1x128x128xbf16, #tpu.memory_space<vmem>>, %arg4: memref<128x128xbf16, #tpu.memory_space<vmem>>, %arg5: memref<128x128xbf16, #tpu.memory_space<vmem>>, %arg6: memref<1x128xf32, #tpu.memory_space<vmem>>, %arg7: memref<1x128xf32, #tpu.memory_space<vmem>>, %arg8: memref<1x128x128xbf16, #tpu.memory_space<vmem>>, %arg9: memref<1x1x128xf32, #tpu.memory_space<vmem>>, %arg10: memref<128x128xf32, #tpu.memory_space<vmem>>) attributes {dimension_semantics = [#tpu.dimension_semantics<parallel>, #tpu.dimension_semantics<parallel>, #tpu.dimension_semantics<arbitrary>], iteration_bounds = array<i64: 2, 1, 1>, scalar_prefetch = 0 : i64, scratch_operands = 1 : i64, tpu.core_type = #tpu.core_type<tc>, window_params = [{transform_indices = @transform_0, window_bounds = array<i64: 1, 128, 128>}, {transform_indices = @transform_1, window_bounds = array<i64: 128, 128>}, {pipeline_mode = #tpu.pipeline_mode<synchronous>, transform_indices = @transform_2, window_bounds = array<i64: 128, 128>}, {pipeline_mode = #tpu.pipeline_mode<synchronous>, transform_indices = @transform_3, window_bounds = array<i64: 1, 128>}, {pipeline_mode = #tpu.pipeline_mode<synchronous>, transform_indices = @transform_4, window_bounds = array<i64: 1, 128>}, {transform_indices = @transform_5, window_bounds = array<i64: 1, 128, 128>}, {transform_indices = @transform_6, window_bounds = array<i64: 1, 1, 128>}]} {
    %c128_i32 = arith.constant 128 : i32
    %0 = arith.muli %arg1, %c128_i32 : i32
    %c0_i32 = arith.constant 0 : i32
    %1 = arith.cmpi eq, %arg2, %c0_i32 : i32
    %2 = arith.extui %1 : i1 to i32
    %c0_i32_0 = arith.constant 0 : i32
    %3 = arith.cmpi ne, %2, %c0_i32_0 : i32
    scf.if %3 {
      %cst_11 = arith.constant 0.000000e+00 : f32
      %14 = vector.broadcast %cst_11 : f32 to vector<128x128xf32>
      %c0_12 = arith.constant 0 : index
      %c0_13 = arith.constant 0 : index
      %15 = vector.load %arg10[%c0_12, %c0_13] : memref<128x128xf32, #tpu.memory_space<vmem>>, vector<128x128xf32>
      tpu.vector_store %arg10[%c0_12, %c0_13], %14 {strides = array<i32>} : memref<128x128xf32, #tpu.memory_space<vmem>>, vector<128x128xf32>,
    } else {
    }
    %c0 = arith.constant 0 : index
    %c0_1 = arith.constant 0 : index
    %4 = vector.load %arg10[%c0, %c0_1] : memref<128x128xf32, #tpu.memory_space<vmem>>, vector<128x128xf32>
    %c0_2 = arith.constant 0 : index
    %c0_3 = arith.constant 0 : index
    %c0_4 = arith.constant 0 : index
    %5 = vector.load %arg3[%c0_2, %c0_3, %c0_4] : memref<1x128x128xbf16, #tpu.memory_space<vmem>>, vector<1x128x128xbf16>
    %6 = vector.shape_cast %5 : vector<1x128x128xbf16> to vector<128x128xbf16>
    %c0_5 = arith.constant 0 : index
    %c0_6 = arith.constant 0 : index
    %7 = vector.load %arg4[%c0_5, %c0_6] : memref<128x128xbf16, #tpu.memory_space<vmem>>, vector<128x128xbf16>
    %cst = arith.constant dense<0.000000e+00> : vector<128x128xf32>
    %8 = tpu.matmul %6, %7, %cst {dimension_numbers = #tpu.dot_dimension_numbers<[1], [0], [0], [1], [0, 0, 1, 1], [], []>} : vector<128x128xbf16>, vector<128x128xbf16>, vector<128x128xf32> -> vector<128x128xf32>
    %9 = arith.addf %4, %8 : vector<128x128xf32>
    %c0_7 = arith.constant 0 : index
    %c0_8 = arith.constant 0 : index
    %10 = vector.load %arg10[%c0_7, %c0_8] : memref<128x128xf32, #tpu.memory_space<vmem>>, vector<128x128xf32>
    tpu.vector_store %arg10[%c0_7, %c0_8], %9 {strides = array<i32>} : memref<128x128xf32, #tpu.memory_space<vmem>>, vector<128x128xf32>,
    %c0_i32_9 = arith.constant 0 : i32
    %11 = arith.cmpi eq, %arg2, %c0_i32_9 : i32
    %12 = arith.extui %11 : i1 to i32
    %c0_i32_10 = arith.constant 0 : i32
    %13 = arith.cmpi ne, %12, %c0_i32_10 : i32
    scf.if %13 {
      %c0_11 = arith.constant 0 : index
      %c0_12 = arith.constant 0 : index
      %14 = vector.load %arg10[%c0_11, %c0_12] : memref<128x128xf32, #tpu.memory_space<vmem>>, vector<128x128xf32>
      %cst_13 = arith.constant 0.000000e+00 : f32
      %15 = vector.broadcast %cst_13 : f32 to vector<128x128xf32>
      %16 = arith.cmpf ogt, %14, %15 : vector<128x128xf32>
      %cst_14 = arith.constant 0.000000e+00 : f32
      %17 = vector.broadcast %cst_14 : f32 to vector<128x128xf32>
      %18 = arith.minimumf %14, %17 : vector<128x128xf32>
      %19 = math.exp %18 : vector<128x128xf32>
      %cst_15 = arith.constant 1.000000e+00 : f32
      %20 = vector.broadcast %cst_15 : f32 to vector<128x128xf32>
      %21 = arith.subf %19, %20 : vector<128x128xf32>
      %22 = arith.select %16, %14, %21 : vector<128x128xi1>, vector<128x128xf32>
      %23 = arith.truncf %22 : vector<128x128xf32> to vector<128x128xbf16>
      %c0_16 = arith.constant 0 : index
      %c0_17 = arith.constant 0 : index
      %c0_18 = arith.constant 0 : index
      %24 = vector.load %arg8[%c0_16, %c0_17, %c0_18] : memref<1x128x128xbf16, #tpu.memory_space<vmem>>, vector<1x128x128xbf16>
      %25 = vector.shape_cast %24 : vector<1x128x128xbf16> to vector<128x128xbf16>
      %26 = vector.shape_cast %23 : vector<128x128xbf16> to vector<1x128x128xbf16>
      tpu.vector_store %arg8[%c0_16, %c0_17, %c0_18], %26 {strides = array<i32>} : memref<1x128x128xbf16, #tpu.memory_space<vmem>>, vector<1x128x128xbf16>,
      %27 = arith.truncf %22 : vector<128x128xf32> to vector<128x128xbf16>
      %c0_19 = arith.constant 0 : index
      %c0_20 = arith.constant 0 : index
      %28 = vector.load %arg5[%c0_19, %c0_20] : memref<128x128xbf16, #tpu.memory_space<vmem>>, vector<128x128xbf16>
      %cst_21 = arith.constant dense<0.000000e+00> : vector<128x128xf32>
      %29 = tpu.matmul %27, %28, %cst_21 {dimension_numbers = #tpu.dot_dimension_numbers<[1], [0], [0], [1], [0, 0, 1, 1], [], []>} : vector<128x128xbf16>, vector<128x128xbf16>, vector<128x128xf32> -> vector<128x128xf32>
      %c0_22 = arith.constant 0 : index
      %c0_23 = arith.constant 0 : index
      %30 = vector.load %arg6[%c0_22, %c0_23] : memref<1x128xf32, #tpu.memory_space<vmem>>, vector<1x128xf32>
      %31 = vector.broadcast %30 : vector<1x128xf32> to vector<128x128xf32>
      %32 = arith.addf %29, %31 : vector<128x128xf32>
      %33 = math.tanh %32 : vector<128x128xf32>
      %34 = tpu.iota {dimensions = array<i32: 0>} : vector<128x1xi32>
      %35 = vector.broadcast %0 : i32 to vector<128x1xi32>
      %36 = arith.addi %35, %34 : vector<128x1xi32>
      %c24_i32 = arith.constant 24 : i32
      %37 = vector.broadcast %c24_i32 : i32 to vector<128x1xi32>
      %38 = arith.cmpi slt, %36, %37 : vector<128x1xi32>
      %39 = arith.extui %38 : vector<128x1xi1> to vector<128x1xi32>
      %40 = arith.sitofp %39 : vector<128x1xi32> to vector<128x1xf32>
      %c0_24 = arith.constant 0 : index
      %c0_25 = arith.constant 0 : index
      %41 = vector.load %arg7[%c0_24, %c0_25] : memref<1x128xf32, #tpu.memory_space<vmem>>, vector<1x128xf32>
      %42 = vector.broadcast %41 : vector<1x128xf32> to vector<128x128xf32>
      %43 = arith.mulf %33, %42 : vector<128x128xf32>
      %44 = vector.broadcast %40 : vector<128x1xf32> to vector<128x128xf32>
      %45 = arith.mulf %43, %44 : vector<128x128xf32>
      %cst_26 = arith.constant dense<0.000000e+00> : vector<128xf32>
      %46 = vector.multi_reduction <add>, %45, %cst_26 [0] : vector<128x128xf32> to vector<128xf32>
      %47 = vector.shape_cast %46 : vector<128xf32> to vector<1x128xf32>
      %c0_27 = arith.constant 0 : index
      %c0_28 = arith.constant 0 : index
      %c0_29 = arith.constant 0 : index
      %48 = vector.load %arg9[%c0_27, %c0_28, %c0_29] : memref<1x1x128xf32, #tpu.memory_space<vmem>>, vector<1x1x128xf32>
      %49 = vector.shape_cast %48 : vector<1x1x128xf32> to vector<1x128xf32>
      %50 = vector.shape_cast %47 : vector<1x128xf32> to vector<1x1x128xf32>
      tpu.vector_store %arg9[%c0_27, %c0_28, %c0_29], %50 {strides = array<i32>} : memref<1x1x128xf32, #tpu.memory_space<vmem>>, vector<1x1x128xf32>,
    } else {
    }
    return
  }
  func.func @transform_0(%arg0: i32, %arg1: i32, %arg2: i32) -> (i32, i32, i32) {
    %c0_i32 = arith.constant 0 : i32
    return %arg0, %arg1, %arg2 : i32, i32, i32
  }
  func.func @transform_1(%arg0: i32, %arg1: i32, %arg2: i32) -> (i32, i32) {
    %c0_i32 = arith.constant 0 : i32
    return %arg2, %arg0 : i32, i32
  }
  func.func @transform_2(%arg0: i32, %arg1: i32, %arg2: i32) -> (i32, i32) {
    %c0_i32 = arith.constant 0 : i32
    %c0_i32_0 = arith.constant 0 : i32
    %c0_i32_1 = arith.constant 0 : i32
    return %c0_i32, %c0_i32_0 : i32, i32
  }
  func.func @transform_3(%arg0: i32, %arg1: i32, %arg2: i32) -> (i32, i32) {
    %c0_i32 = arith.constant 0 : i32
    %c0_i32_0 = arith.constant 0 : i32
    %c0_i32_1 = arith.constant 0 : i32
    return %c0_i32, %c0_i32_0 : i32, i32
  }
  func.func @transform_4(%arg0: i32, %arg1: i32, %arg2: i32) -> (i32, i32) {
    %c0_i32 = arith.constant 0 : i32
    %c0_i32_0 = arith.constant 0 : i32
    %c0_i32_1 = arith.constant 0 : i32
    return %c0_i32, %c0_i32_0 : i32, i32
  }
  func.func @transform_5(%arg0: i32, %arg1: i32, %arg2: i32) -> (i32, i32, i32) {
    %c0_i32 = arith.constant 0 : i32
    %c0_i32_0 = arith.constant 0 : i32
    return %arg0, %arg1, %c0_i32 : i32, i32, i32
  }
  func.func @transform_6(%arg0: i32, %arg1: i32, %arg2: i32) -> (i32, i32, i32) {
    %c0_i32 = arith.constant 0 : i32
    %c0_i32_0 = arith.constant 0 : i32
    return %arg0, %arg1, %c0_i32 : i32, i32, i32
  }
}

module attributes {stable_mosaic.version = 11 : i64} {
  func.func @_sc_kernel(%arg0: i32, %arg1: memref<128x128xbf16, #tpu.memory_space<vmem>>, %arg2: memref<128x512xbf16, #tpu.memory_space<vmem>>, %arg3: memref<1x128xf32, #tpu.memory_space<vmem>>, %arg4: memref<1x128xf32, #tpu.memory_space<vmem>>, %arg5: memref<2x128x128xbf16, #tpu.memory_space<vmem>>, %arg6: memref<2x1x128xf32, #tpu.memory_space<vmem>>, %arg7: memref<128x128xf32, #tpu.memory_space<vmem>>) attributes {dimension_semantics = [#tpu.dimension_semantics<parallel>], iteration_bounds = array<i64: 1>, scalar_prefetch = 0 : i64, scratch_operands = 0 : i64, tpu.core_type = #tpu.core_type<tc>, window_params = [{transform_indices = @transform_0, window_bounds = array<i64: 128, 128>}, {transform_indices = @transform_1, window_bounds = array<i64: 128, 512>}, {pipeline_mode = #tpu.pipeline_mode<synchronous>, transform_indices = @transform_2, window_bounds = array<i64: 1, 128>}, {pipeline_mode = #tpu.pipeline_mode<synchronous>, transform_indices = @transform_3, window_bounds = array<i64: 1, 128>}, {transform_indices = @transform_4, window_bounds = array<i64: 2, 128, 128>}, {pipeline_mode = #tpu.pipeline_mode<synchronous>, transform_indices = @transform_5, window_bounds = array<i64: 2, 1, 128>}, {transform_indices = @transform_6, window_bounds = array<i64: 128, 128>}]} {
    %cst = arith.constant 0.000000e+00 : f32
    %0 = vector.broadcast %cst : f32 to vector<128x128xf32>
    %c0 = arith.constant 0 : index
    %c0_0 = arith.constant 0 : index
    %c0_1 = arith.constant 0 : index
    %1 = vector.load %arg5[%c0, %c0_0, %c0_1] : memref<2x128x128xbf16, #tpu.memory_space<vmem>>, vector<1x128x128xbf16>
    %2 = vector.shape_cast %1 : vector<1x128x128xbf16> to vector<128x128xbf16>
    %3 = arith.extf %2 : vector<128x128xbf16> to vector<128x128xf32>
    %c0_2 = arith.constant 0 : index
    %c0_3 = arith.constant 0 : index
    %c0_4 = arith.constant 0 : index
    %4 = vector.load %arg6[%c0_2, %c0_3, %c0_4] : memref<2x1x128xf32, #tpu.memory_space<vmem>>, vector<1x1x128xf32>
    %5 = vector.shape_cast %4 : vector<1x1x128xf32> to vector<1x128xf32>
    %6 = vector.broadcast %5 : vector<1x128xf32> to vector<128x128xf32>
    %7 = arith.mulf %3, %6 : vector<128x128xf32>
    %8 = arith.addf %0, %7 : vector<128x128xf32>
    %c1 = arith.constant 1 : index
    %c0_5 = arith.constant 0 : index
    %c0_6 = arith.constant 0 : index
    %9 = vector.load %arg5[%c1, %c0_5, %c0_6] : memref<2x128x128xbf16, #tpu.memory_space<vmem>>, vector<1x128x128xbf16>
    %10 = vector.shape_cast %9 : vector<1x128x128xbf16> to vector<128x128xbf16>
    %11 = arith.extf %10 : vector<128x128xbf16> to vector<128x128xf32>
    %c1_7 = arith.constant 1 : index
    %c0_8 = arith.constant 0 : index
    %c0_9 = arith.constant 0 : index
    %12 = vector.load %arg6[%c1_7, %c0_8, %c0_9] : memref<2x1x128xf32, #tpu.memory_space<vmem>>, vector<1x1x128xf32>
    %13 = vector.shape_cast %12 : vector<1x1x128xf32> to vector<1x128xf32>
    %14 = vector.broadcast %13 : vector<1x128xf32> to vector<128x128xf32>
    %15 = arith.mulf %11, %14 : vector<128x128xf32>
    %16 = arith.addf %8, %15 : vector<128x128xf32>
    %c0_10 = arith.constant 0 : index
    %c0_11 = arith.constant 0 : index
    %17 = vector.load %arg1[%c0_10, %c0_11] : memref<128x128xbf16, #tpu.memory_space<vmem>>, vector<128x128xbf16>
    %18 = arith.extf %17 : vector<128x128xbf16> to vector<128x128xf32>
    %c0_12 = arith.constant 0 : index
    %c0_13 = arith.constant 0 : index
    %19 = vector.load %arg3[%c0_12, %c0_13] : memref<1x128xf32, #tpu.memory_space<vmem>>, vector<1x128xf32>
    %c0_14 = arith.constant 0 : index
    %c0_15 = arith.constant 0 : index
    %20 = vector.load %arg4[%c0_14, %c0_15] : memref<1x128xf32, #tpu.memory_space<vmem>>, vector<1x128xf32>
    %21 = vector.broadcast %19 : vector<1x128xf32> to vector<128x128xf32>
    %22 = arith.mulf %18, %21 : vector<128x128xf32>
    %cst_16 = arith.constant dense<0.000000e+00> : vector<128xf32>
    %23 = vector.multi_reduction <add>, %22, %cst_16 [1] : vector<128x128xf32> to vector<128xf32>
    %24 = vector.shape_cast %23 : vector<128xf32> to vector<128x1xf32>
    %c0_17 = arith.constant 0 : index
    %c0_18 = arith.constant 0 : index
    %25 = vector.load %arg2[%c0_17, %c0_18] : memref<128x512xbf16, #tpu.memory_space<vmem>>, vector<128x128xbf16>
    %26 = arith.extf %25 : vector<128x128xbf16> to vector<128x128xf32>
    %27 = vector.broadcast %20 : vector<1x128xf32> to vector<128x128xf32>
    %28 = arith.mulf %26, %27 : vector<128x128xf32>
    %cst_19 = arith.constant dense<0.000000e+00> : vector<128xf32>
    %29 = vector.multi_reduction <add>, %28, %cst_19 [1] : vector<128x128xf32> to vector<128xf32>
    %30 = vector.shape_cast %29 : vector<128xf32> to vector<128x1xf32>
    %31 = arith.addf %24, %30 : vector<128x1xf32>
    %cst_20 = arith.constant 0.000000e+00 : f32
    %32 = vector.broadcast %cst_20 : f32 to vector<128x1xf32>
    %33 = arith.cmpf ogt, %31, %32 : vector<128x1xf32>
    %cst_21 = arith.constant 2.000000e-01 : f32
    %34 = vector.broadcast %cst_21 : f32 to vector<128x1xf32>
    %35 = arith.mulf %34, %31 : vector<128x1xf32>
    %36 = arith.select %33, %31, %35 : vector<128x1xi1>, vector<128x1xf32>
    %c0_22 = arith.constant 0 : index
    %c128 = arith.constant 128 : index
    %37 = vector.load %arg2[%c0_22, %c128] : memref<128x512xbf16, #tpu.memory_space<vmem>>, vector<128x128xbf16>
    %38 = arith.extf %37 : vector<128x128xbf16> to vector<128x128xf32>
    %39 = vector.broadcast %20 : vector<1x128xf32> to vector<128x128xf32>
    %40 = arith.mulf %38, %39 : vector<128x128xf32>
    %cst_23 = arith.constant dense<0.000000e+00> : vector<128xf32>
    %41 = vector.multi_reduction <add>, %40, %cst_23 [1] : vector<128x128xf32> to vector<128xf32>
    %42 = vector.shape_cast %41 : vector<128xf32> to vector<128x1xf32>
    %43 = arith.addf %24, %42 : vector<128x1xf32>
    %cst_24 = arith.constant 0.000000e+00 : f32
    %44 = vector.broadcast %cst_24 : f32 to vector<128x1xf32>
    %45 = arith.cmpf ogt, %43, %44 : vector<128x1xf32>
    %cst_25 = arith.constant 2.000000e-01 : f32
    %46 = vector.broadcast %cst_25 : f32 to vector<128x1xf32>
    %47 = arith.mulf %46, %43 : vector<128x1xf32>
    %48 = arith.select %45, %43, %47 : vector<128x1xi1>, vector<128x1xf32>
    %c0_26 = arith.constant 0 : index
    %c256 = arith.constant 256 : index
    %49 = vector.load %arg2[%c0_26, %c256] : memref<128x512xbf16, #tpu.memory_space<vmem>>, vector<128x128xbf16>
    %50 = arith.extf %49 : vector<128x128xbf16> to vector<128x128xf32>
    %51 = vector.broadcast %20 : vector<1x128xf32> to vector<128x128xf32>
    %52 = arith.mulf %50, %51 : vector<128x128xf32>
    %cst_27 = arith.constant dense<0.000000e+00> : vector<128xf32>
    %53 = vector.multi_reduction <add>, %52, %cst_27 [1] : vector<128x128xf32> to vector<128xf32>
    %54 = vector.shape_cast %53 : vector<128xf32> to vector<128x1xf32>
    %55 = arith.addf %24, %54 : vector<128x1xf32>
    %cst_28 = arith.constant 0.000000e+00 : f32
    %56 = vector.broadcast %cst_28 : f32 to vector<128x1xf32>
    %57 = arith.cmpf ogt, %55, %56 : vector<128x1xf32>
    %cst_29 = arith.constant 2.000000e-01 : f32
    %58 = vector.broadcast %cst_29 : f32 to vector<128x1xf32>
    %59 = arith.mulf %58, %55 : vector<128x1xf32>
    %60 = arith.select %57, %55, %59 : vector<128x1xi1>, vector<128x1xf32>
    %c0_30 = arith.constant 0 : index
    %c384 = arith.constant 384 : index
    %61 = vector.load %arg2[%c0_30, %c384] : memref<128x512xbf16, #tpu.memory_space<vmem>>, vector<128x128xbf16>
    %62 = arith.extf %61 : vector<128x128xbf16> to vector<128x128xf32>
    %63 = vector.broadcast %20 : vector<1x128xf32> to vector<128x128xf32>
    %64 = arith.mulf %62, %63 : vector<128x128xf32>
    %cst_31 = arith.constant dense<0.000000e+00> : vector<128xf32>
    %65 = vector.multi_reduction <add>, %64, %cst_31 [1] : vector<128x128xf32> to vector<128xf32>
    %66 = vector.shape_cast %65 : vector<128xf32> to vector<128x1xf32>
    %67 = arith.addf %24, %66 : vector<128x1xf32>
    %cst_32 = arith.constant 0.000000e+00 : f32
    %68 = vector.broadcast %cst_32 : f32 to vector<128x1xf32>
    %69 = arith.cmpf ogt, %67, %68 : vector<128x1xf32>
    %cst_33 = arith.constant 2.000000e-01 : f32
    %70 = vector.broadcast %cst_33 : f32 to vector<128x1xf32>
    %71 = arith.mulf %70, %67 : vector<128x1xf32>
    %72 = arith.select %69, %67, %71 : vector<128x1xi1>, vector<128x1xf32>
    %73 = arith.maximumf %36, %48 : vector<128x1xf32>
    %74 = arith.maximumf %73, %60 : vector<128x1xf32>
    %75 = arith.maximumf %74, %72 : vector<128x1xf32>
    %76 = arith.subf %36, %75 : vector<128x1xf32>
    %77 = math.exp %76 : vector<128x1xf32>
    %78 = arith.subf %48, %75 : vector<128x1xf32>
    %79 = math.exp %78 : vector<128x1xf32>
    %80 = arith.subf %60, %75 : vector<128x1xf32>
    %81 = math.exp %80 : vector<128x1xf32>
    %82 = arith.subf %72, %75 : vector<128x1xf32>
    %83 = math.exp %82 : vector<128x1xf32>
    %84 = arith.addf %77, %79 : vector<128x1xf32>
    %85 = arith.addf %84, %81 : vector<128x1xf32>
    %86 = arith.addf %85, %83 : vector<128x1xf32>
    %cst_34 = arith.constant 1.000000e+00 : f32
    %87 = vector.broadcast %cst_34 : f32 to vector<128x1xf32>
    %88 = arith.divf %87, %86 : vector<128x1xf32>
    %cst_35 = arith.constant 0.000000e+00 : f32
    %89 = vector.broadcast %cst_35 : f32 to vector<128x128xf32>
    %c0_36 = arith.constant 0 : index
    %c0_37 = arith.constant 0 : index
    %90 = vector.load %arg2[%c0_36, %c0_37] : memref<128x512xbf16, #tpu.memory_space<vmem>>, vector<128x128xbf16>
    %91 = arith.extf %90 : vector<128x128xbf16> to vector<128x128xf32>
    %92 = arith.mulf %77, %88 : vector<128x1xf32>
    %93 = vector.broadcast %92 : vector<128x1xf32> to vector<128x128xf32>
    %94 = arith.mulf %93, %91 : vector<128x128xf32>
    %95 = arith.addf %89, %94 : vector<128x128xf32>
    %c0_38 = arith.constant 0 : index
    %c128_39 = arith.constant 128 : index
    %96 = vector.load %arg2[%c0_38, %c128_39] : memref<128x512xbf16, #tpu.memory_space<vmem>>, vector<128x128xbf16>
    %97 = arith.extf %96 : vector<128x128xbf16> to vector<128x128xf32>
    %98 = arith.mulf %79, %88 : vector<128x1xf32>
    %99 = vector.broadcast %98 : vector<128x1xf32> to vector<128x128xf32>
    %100 = arith.mulf %99, %97 : vector<128x128xf32>
    %101 = arith.addf %95, %100 : vector<128x128xf32>
    %c0_40 = arith.constant 0 : index
    %c256_41 = arith.constant 256 : index
    %102 = vector.load %arg2[%c0_40, %c256_41] : memref<128x512xbf16, #tpu.memory_space<vmem>>, vector<128x128xbf16>
    %103 = arith.extf %102 : vector<128x128xbf16> to vector<128x128xf32>
    %104 = arith.mulf %81, %88 : vector<128x1xf32>
    %105 = vector.broadcast %104 : vector<128x1xf32> to vector<128x128xf32>
    %106 = arith.mulf %105, %103 : vector<128x128xf32>
    %107 = arith.addf %101, %106 : vector<128x128xf32>
    %c0_42 = arith.constant 0 : index
    %c384_43 = arith.constant 384 : index
    %108 = vector.load %arg2[%c0_42, %c384_43] : memref<128x512xbf16, #tpu.memory_space<vmem>>, vector<128x128xbf16>
    %109 = arith.extf %108 : vector<128x128xbf16> to vector<128x128xf32>
    %110 = arith.mulf %83, %88 : vector<128x1xf32>
    %111 = vector.broadcast %110 : vector<128x1xf32> to vector<128x128xf32>
    %112 = arith.mulf %111, %109 : vector<128x128xf32>
    %113 = arith.addf %107, %112 : vector<128x128xf32>
    %cst_44 = arith.constant 0.000000e+00 : f32
    %114 = vector.broadcast %cst_44 : f32 to vector<128x128xf32>
    %115 = arith.cmpf ogt, %113, %114 : vector<128x128xf32>
    %cst_45 = arith.constant 0.000000e+00 : f32
    %116 = vector.broadcast %cst_45 : f32 to vector<128x128xf32>
    %117 = arith.minimumf %113, %116 : vector<128x128xf32>
    %118 = math.exp %117 : vector<128x128xf32>
    %cst_46 = arith.constant 1.000000e+00 : f32
    %119 = vector.broadcast %cst_46 : f32 to vector<128x128xf32>
    %120 = arith.subf %118, %119 : vector<128x128xf32>
    %121 = arith.select %115, %113, %120 : vector<128x128xi1>, vector<128x128xf32>
    %122 = arith.addf %16, %121 : vector<128x128xf32>
    %c0_47 = arith.constant 0 : index
    %c0_48 = arith.constant 0 : index
    %123 = vector.load %arg7[%c0_47, %c0_48] : memref<128x128xf32, #tpu.memory_space<vmem>>, vector<128x128xf32>
    tpu.vector_store %arg7[%c0_47, %c0_48], %122 {strides = array<i32>} : memref<128x128xf32, #tpu.memory_space<vmem>>, vector<128x128xf32>,
    return
  }
  func.func @transform_0(%arg0: i32) -> (i32, i32) {
    %c0_i32 = arith.constant 0 : i32
    %c0_i32_0 = arith.constant 0 : i32
    return %arg0, %c0_i32 : i32, i32
  }
  func.func @transform_1(%arg0: i32) -> (i32, i32) {
    %c0_i32 = arith.constant 0 : i32
    %c0_i32_0 = arith.constant 0 : i32
    return %arg0, %c0_i32 : i32, i32
  }
  func.func @transform_2(%arg0: i32) -> (i32, i32) {
    %c0_i32 = arith.constant 0 : i32
    %c0_i32_0 = arith.constant 0 : i32
    %c0_i32_1 = arith.constant 0 : i32
    return %c0_i32, %c0_i32_0 : i32, i32
  }
  func.func @transform_3(%arg0: i32) -> (i32, i32) {
    %c0_i32 = arith.constant 0 : i32
    %c0_i32_0 = arith.constant 0 : i32
    %c0_i32_1 = arith.constant 0 : i32
    return %c0_i32, %c0_i32_0 : i32, i32
  }
  func.func @transform_4(%arg0: i32) -> (i32, i32, i32) {
    %c0_i32 = arith.constant 0 : i32
    %c0_i32_0 = arith.constant 0 : i32
    %c0_i32_1 = arith.constant 0 : i32
    return %c0_i32, %arg0, %c0_i32_0 : i32, i32, i32
  }
  func.func @transform_5(%arg0: i32) -> (i32, i32, i32) {
    %c0_i32 = arith.constant 0 : i32
    %c0_i32_0 = arith.constant 0 : i32
    %c0_i32_1 = arith.constant 0 : i32
    %c0_i32_2 = arith.constant 0 : i32
    return %c0_i32, %c0_i32_0, %c0_i32_1 : i32, i32, i32
  }
  func.func @transform_6(%arg0: i32) -> (i32, i32) {
    %c0_i32 = arith.constant 0 : i32
    %c0_i32_0 = arith.constant 0 : i32
    return %arg0, %c0_i32 : i32, i32
  }
}

module attributes {stable_mosaic.version = 11 : i64} {
  func.func @_gcn_sem_kernel(%arg0: i32, %arg1: i32, %arg2: i32, %arg3: memref<1x128x128xbf16, #tpu.memory_space<vmem>>, %arg4: memref<128x128xbf16, #tpu.memory_space<vmem>>, %arg5: memref<128x128xbf16, #tpu.memory_space<vmem>>, %arg6: memref<1x128xf32, #tpu.memory_space<vmem>>, %arg7: memref<1x128xf32, #tpu.memory_space<vmem>>, %arg8: memref<1x128x128xbf16, #tpu.memory_space<vmem>>, %arg9: memref<1x1x128xf32, #tpu.memory_space<vmem>>, %arg10: memref<128x128xf32, #tpu.memory_space<vmem>>) attributes {dimension_semantics = [#tpu.dimension_semantics<parallel>, #tpu.dimension_semantics<parallel>, #tpu.dimension_semantics<arbitrary>], iteration_bounds = array<i64: 2, 1, 1>, scalar_prefetch = 0 : i64, scratch_operands = 1 : i64, tpu.core_type = #tpu.core_type<tc>, window_params = [{transform_indices = @transform_0, window_bounds = array<i64: 1, 128, 128>}, {transform_indices = @transform_1, window_bounds = array<i64: 128, 128>}, {pipeline_mode = #tpu.pipeline_mode<synchronous>, transform_indices = @transform_2, window_bounds = array<i64: 128, 128>}, {pipeline_mode = #tpu.pipeline_mode<synchronous>, transform_indices = @transform_3, window_bounds = array<i64: 1, 128>}, {pipeline_mode = #tpu.pipeline_mode<synchronous>, transform_indices = @transform_4, window_bounds = array<i64: 1, 128>}, {transform_indices = @transform_5, window_bounds = array<i64: 1, 128, 128>}, {transform_indices = @transform_6, window_bounds = array<i64: 1, 1, 128>}]} {
    %c128_i32 = arith.constant 128 : i32
    %0 = arith.muli %arg1, %c128_i32 : i32
    %c0_i32 = arith.constant 0 : i32
    %1 = arith.cmpi eq, %arg2, %c0_i32 : i32
    %2 = arith.extui %1 : i1 to i32
    %c0_i32_0 = arith.constant 0 : i32
    %3 = arith.cmpi ne, %2, %c0_i32_0 : i32
    scf.if %3 {
      %cst_11 = arith.constant 0.000000e+00 : f32
      %14 = vector.broadcast %cst_11 : f32 to vector<128x128xf32>
      %c0_12 = arith.constant 0 : index
      %c0_13 = arith.constant 0 : index
      %15 = vector.load %arg10[%c0_12, %c0_13] : memref<128x128xf32, #tpu.memory_space<vmem>>, vector<128x128xf32>
      tpu.vector_store %arg10[%c0_12, %c0_13], %14 {strides = array<i32>} : memref<128x128xf32, #tpu.memory_space<vmem>>, vector<128x128xf32>,
    } else {
    }
    %c0 = arith.constant 0 : index
    %c0_1 = arith.constant 0 : index
    %4 = vector.load %arg10[%c0, %c0_1] : memref<128x128xf32, #tpu.memory_space<vmem>>, vector<128x128xf32>
    %c0_2 = arith.constant 0 : index
    %c0_3 = arith.constant 0 : index
    %c0_4 = arith.constant 0 : index
    %5 = vector.load %arg3[%c0_2, %c0_3, %c0_4] : memref<1x128x128xbf16, #tpu.memory_space<vmem>>, vector<1x128x128xbf16>
    %6 = vector.shape_cast %5 : vector<1x128x128xbf16> to vector<128x128xbf16>
    %c0_5 = arith.constant 0 : index
    %c0_6 = arith.constant 0 : index
    %7 = vector.load %arg4[%c0_5, %c0_6] : memref<128x128xbf16, #tpu.memory_space<vmem>>, vector<128x128xbf16>
    %cst = arith.constant dense<0.000000e+00> : vector<128x128xf32>
    %8 = tpu.matmul %6, %7, %cst {dimension_numbers = #tpu.dot_dimension_numbers<[1], [0], [0], [1], [0, 0, 1, 1], [], []>} : vector<128x128xbf16>, vector<128x128xbf16>, vector<128x128xf32> -> vector<128x128xf32>
    %9 = arith.addf %4, %8 : vector<128x128xf32>
    %c0_7 = arith.constant 0 : index
    %c0_8 = arith.constant 0 : index
    %10 = vector.load %arg10[%c0_7, %c0_8] : memref<128x128xf32, #tpu.memory_space<vmem>>, vector<128x128xf32>
    tpu.vector_store %arg10[%c0_7, %c0_8], %9 {strides = array<i32>} : memref<128x128xf32, #tpu.memory_space<vmem>>, vector<128x128xf32>,
    %c0_i32_9 = arith.constant 0 : i32
    %11 = arith.cmpi eq, %arg2, %c0_i32_9 : i32
    %12 = arith.extui %11 : i1 to i32
    %c0_i32_10 = arith.constant 0 : i32
    %13 = arith.cmpi ne, %12, %c0_i32_10 : i32
    scf.if %13 {
      %c0_11 = arith.constant 0 : index
      %c0_12 = arith.constant 0 : index
      %14 = vector.load %arg10[%c0_11, %c0_12] : memref<128x128xf32, #tpu.memory_space<vmem>>, vector<128x128xf32>
      %cst_13 = arith.constant 0.000000e+00 : f32
      %15 = vector.broadcast %cst_13 : f32 to vector<128x128xf32>
      %16 = arith.cmpf ogt, %14, %15 : vector<128x128xf32>
      %cst_14 = arith.constant 0.000000e+00 : f32
      %17 = vector.broadcast %cst_14 : f32 to vector<128x128xf32>
      %18 = arith.minimumf %14, %17 : vector<128x128xf32>
      %19 = math.exp %18 : vector<128x128xf32>
      %cst_15 = arith.constant 1.000000e+00 : f32
      %20 = vector.broadcast %cst_15 : f32 to vector<128x128xf32>
      %21 = arith.subf %19, %20 : vector<128x128xf32>
      %22 = arith.select %16, %14, %21 : vector<128x128xi1>, vector<128x128xf32>
      %23 = arith.truncf %22 : vector<128x128xf32> to vector<128x128xbf16>
      %c0_16 = arith.constant 0 : index
      %c0_17 = arith.constant 0 : index
      %c0_18 = arith.constant 0 : index
      %24 = vector.load %arg8[%c0_16, %c0_17, %c0_18] : memref<1x128x128xbf16, #tpu.memory_space<vmem>>, vector<1x128x128xbf16>
      %25 = vector.shape_cast %24 : vector<1x128x128xbf16> to vector<128x128xbf16>
      %26 = vector.shape_cast %23 : vector<128x128xbf16> to vector<1x128x128xbf16>
      tpu.vector_store %arg8[%c0_16, %c0_17, %c0_18], %26 {strides = array<i32>} : memref<1x128x128xbf16, #tpu.memory_space<vmem>>, vector<1x128x128xbf16>,
      %27 = arith.truncf %22 : vector<128x128xf32> to vector<128x128xbf16>
      %c0_19 = arith.constant 0 : index
      %c0_20 = arith.constant 0 : index
      %28 = vector.load %arg5[%c0_19, %c0_20] : memref<128x128xbf16, #tpu.memory_space<vmem>>, vector<128x128xbf16>
      %cst_21 = arith.constant dense<0.000000e+00> : vector<128x128xf32>
      %29 = tpu.matmul %27, %28, %cst_21 {dimension_numbers = #tpu.dot_dimension_numbers<[1], [0], [0], [1], [0, 0, 1, 1], [], []>} : vector<128x128xbf16>, vector<128x128xbf16>, vector<128x128xf32> -> vector<128x128xf32>
      %c0_22 = arith.constant 0 : index
      %c0_23 = arith.constant 0 : index
      %30 = vector.load %arg6[%c0_22, %c0_23] : memref<1x128xf32, #tpu.memory_space<vmem>>, vector<1x128xf32>
      %31 = vector.broadcast %30 : vector<1x128xf32> to vector<128x128xf32>
      %32 = arith.addf %29, %31 : vector<128x128xf32>
      %33 = math.tanh %32 : vector<128x128xf32>
      %34 = tpu.iota {dimensions = array<i32: 0>} : vector<128x1xi32>
      %35 = vector.broadcast %0 : i32 to vector<128x1xi32>
      %36 = arith.addi %35, %34 : vector<128x1xi32>
      %c16_i32 = arith.constant 16 : i32
      %37 = vector.broadcast %c16_i32 : i32 to vector<128x1xi32>
      %38 = arith.cmpi slt, %36, %37 : vector<128x1xi32>
      %39 = arith.extui %38 : vector<128x1xi1> to vector<128x1xi32>
      %40 = arith.sitofp %39 : vector<128x1xi32> to vector<128x1xf32>
      %c0_24 = arith.constant 0 : index
      %c0_25 = arith.constant 0 : index
      %41 = vector.load %arg7[%c0_24, %c0_25] : memref<1x128xf32, #tpu.memory_space<vmem>>, vector<1x128xf32>
      %42 = vector.broadcast %41 : vector<1x128xf32> to vector<128x128xf32>
      %43 = arith.mulf %33, %42 : vector<128x128xf32>
      %44 = vector.broadcast %40 : vector<128x1xf32> to vector<128x128xf32>
      %45 = arith.mulf %43, %44 : vector<128x128xf32>
      %cst_26 = arith.constant dense<0.000000e+00> : vector<128xf32>
      %46 = vector.multi_reduction <add>, %45, %cst_26 [0] : vector<128x128xf32> to vector<128xf32>
      %47 = vector.shape_cast %46 : vector<128xf32> to vector<1x128xf32>
      %c0_27 = arith.constant 0 : index
      %c0_28 = arith.constant 0 : index
      %c0_29 = arith.constant 0 : index
      %48 = vector.load %arg9[%c0_27, %c0_28, %c0_29] : memref<1x1x128xf32, #tpu.memory_space<vmem>>, vector<1x1x128xf32>
      %49 = vector.shape_cast %48 : vector<1x1x128xf32> to vector<1x128xf32>
      %50 = vector.shape_cast %47 : vector<1x128xf32> to vector<1x1x128xf32>
      tpu.vector_store %arg9[%c0_27, %c0_28, %c0_29], %50 {strides = array<i32>} : memref<1x1x128xf32, #tpu.memory_space<vmem>>, vector<1x1x128xf32>,
    } else {
    }
    return
  }
  func.func @transform_0(%arg0: i32, %arg1: i32, %arg2: i32) -> (i32, i32, i32) {
    %c0_i32 = arith.constant 0 : i32
    return %arg0, %arg1, %arg2 : i32, i32, i32
  }
  func.func @transform_1(%arg0: i32, %arg1: i32, %arg2: i32) -> (i32, i32) {
    %c0_i32 = arith.constant 0 : i32
    return %arg2, %arg0 : i32, i32
  }
  func.func @transform_2(%arg0: i32, %arg1: i32, %arg2: i32) -> (i32, i32) {
    %c0_i32 = arith.constant 0 : i32
    %c0_i32_0 = arith.constant 0 : i32
    %c0_i32_1 = arith.constant 0 : i32
    return %c0_i32, %c0_i32_0 : i32, i32
  }
  func.func @transform_3(%arg0: i32, %arg1: i32, %arg2: i32) -> (i32, i32) {
    %c0_i32 = arith.constant 0 : i32
    %c0_i32_0 = arith.constant 0 : i32
    %c0_i32_1 = arith.constant 0 : i32
    return %c0_i32, %c0_i32_0 : i32, i32
  }
  func.func @transform_4(%arg0: i32, %arg1: i32, %arg2: i32) -> (i32, i32) {
    %c0_i32 = arith.constant 0 : i32
    %c0_i32_0 = arith.constant 0 : i32
    %c0_i32_1 = arith.constant 0 : i32
    return %c0_i32, %c0_i32_0 : i32, i32
  }
  func.func @transform_5(%arg0: i32, %arg1: i32, %arg2: i32) -> (i32, i32, i32) {
    %c0_i32 = arith.constant 0 : i32
    %c0_i32_0 = arith.constant 0 : i32
    return %arg0, %arg1, %c0_i32 : i32, i32, i32
  }
  func.func @transform_6(%arg0: i32, %arg1: i32, %arg2: i32) -> (i32, i32, i32) {
    %c0_i32 = arith.constant 0 : i32
    %c0_i32_0 = arith.constant 0 : i32
    return %arg0, %arg1, %c0_i32 : i32, i32, i32
  }
}

</mosaic_0001>

<bundles_post_ra>
// kernel: from_hin_forward.12
= control target key start
LH: loop header
LB: loop body
LE: loop exit
PB: predicated region body
PF: predicated region fallthrough
CT: control target
= control target key end

     0   :  { %v521_v1 = vmov 0   ;;  %v49_v25 = vlaneseq  ;;  %s709_s1 = inlined_call_operand.vmem [shape: bf16[128,256], index: 1, kind: input, shape index: {}]   ;;  %s710_s0 = inlined_call_operand.vmem [shape: bf16[128,128], index: 0, kind: input, shape index: {}]   ;;  %s711_s2 = inlined_call_operand.vmem [shape: f32[1,256], index: 2, kind: input, shape index: {}]   ;;  %s712_s3 = inlined_call_operand.vmem [shape: bf16[128,256], index: 3, kind: output, shape index: {}]  }
   0x1   :  { %v489_v0 = vld [vmem:[%s709_s1 + $0x4] ss:$8 sps:$4 sm:$0xff]   ;;  %219 = vmatprep.mubr.bf16.mxu0 %v521_v1  ;;  %259 = vmatprep.mubr.bf16.mxu1 %v521_v1  ;;  %v491_v2 = vld [vmem:[%s709_s1] ss:$8 sps:$4 sm:$0xff]   ;;  %v492_v3 = vld [vmem:[%s709_s1 + $0x14] ss:$8 sps:$4 sm:$0xff]  }
   0x2   :  { %187 = vmatprep.subr.bf16.mxu0 %v489_v0  ;;  %472 = vmatprep.subr.bf16.mxu1 %v489_v0  ;;  %v494_v4 = vld [vmem:[%s709_s1 + $0x10] ss:$8 sps:$4 sm:$0xff]   ;;  %v495_v5 = vld [vmem:[%s709_s1 + $0x24] ss:$8 sps:$4 sm:$0xff]   ;;  %v497_v6 = vld [vmem:[%s709_s1 + $0x20] ss:$8 sps:$4 sm:$0xff]  }
   0x3   :  { %188 = vmatpush1.bf16.msra.mxu0 %v491_v2  ;;  %480 = vmatpush1.bf16.msra.mxu1 %v491_v2  ;;  %v498_v7 = vld [vmem:[%s709_s1 + $0x34] ss:$8 sps:$4 sm:$0xff]   ;;  %v500_v8 = vld [vmem:[%s709_s1 + $0x30] ss:$8 sps:$4 sm:$0xff]   ;;  %v501_v9 = vld [vmem:[%s709_s1 + $0x44] ss:$8 sps:$4 sm:$0xff]  }
   0x4   :  { %189 = vmatprep.subr.bf16.mxu0 %v492_v3  ;;  %473 = vmatprep.subr.bf16.mxu1 %v492_v3  ;;  %v503_v10 = vld [vmem:[%s709_s1 + $0x40] ss:$8 sps:$4 sm:$0xff]   ;;  %v504_v11 = vld [vmem:[%s709_s1 + $0x54] ss:$8 sps:$4 sm:$0xff]   ;;  %v506_v12 = vld [vmem:[%s709_s1 + $0x50] ss:$8 sps:$4 sm:$0xff]  }
   0x5   :  { %v507_v13 = vld [vmem:[%s709_s1 + $0x64] ss:$8 sps:$4 sm:$0xff]   ;;  %v509_v14 = vld [vmem:[%s709_s1 + $0x60] ss:$8 sps:$4 sm:$0xff]   ;;  %v510_v15 = vld [vmem:[%s709_s1 + $0x74] ss:$8 sps:$4 sm:$0xff]  }
   0x6   :  { %v512_v16 = vld [vmem:[%s709_s1 + $0x70] ss:$8 sps:$4 sm:$0xff]   ;;  %v513_v17 = vld [vmem:[%s710_s0] sm:$0xff]   ;;  %v515_v19 = vld [vmem:[%s710_s0 + $0x8] sm:$0xff]   ;;  %v50_v26 = vshrl.u32 %v49_v25, 7 }
   0x7   :  { %190 = vmatpush1.bf16.msra.mxu0 %v494_v4  ;;  %481 = vmatpush1.bf16.msra.mxu1 %v494_v4  ;;  %v514_v18 = vld [vmem:[%s710_s0 + $0x20] sm:$0xff]   ;;  %v516_v20 = vld [vmem:[%s710_s0 + $0x28] sm:$0xff]   ;;  %v517_v21 = vld [vmem:[%s710_s0 + $0x10] sm:$0xff]  }
   0x8   :  { %191 = vmatprep.subr.bf16.mxu0 %v495_v5  ;;  %474 = vmatprep.subr.bf16.mxu1 %v495_v5  ;;  %v518_v22 = vld [vmem:[%s710_s0 + $0x30] sm:$0xff]   ;;  %v519_v23 = vld [vmem:[%s710_s0 + $0x18] sm:$0xff]   ;;  %v51_v27 = vsub.s32 0, %v50_v26  ;;  %v47_v28 = vld [vmem:[%s711_s2] sm:$0x3]  ;;  %v55_v29 = vsub.s32 1, %v50_v26 }
   0x9   :  { %v520_v24 = vld [vmem:[%s710_s0 + $0x38] sm:$0xff]  }
   0xa   :  { %v625_v30 = vrot.slane %v47_v28, %v51_v27  ;;  %v627_v31 = vrot.slane %v47_v28, %v55_v29 }
   0xb   :  { %192 = vmatpush1.bf16.msra.mxu0 %v497_v6  ;;  %482 = vmatpush1.bf16.msra.mxu1 %v497_v6 }
   0xc   :  { %193 = vmatprep.subr.bf16.mxu0 %v498_v7  ;;  %475 = vmatprep.subr.bf16.mxu1 %v498_v7 }
   0xf   :  { %194 = vmatpush1.bf16.msra.mxu0 %v500_v8  ;;  %483 = vmatpush1.bf16.msra.mxu1 %v500_v8 }
  0x10   :  { %195 = vmatprep.subr.bf16.mxu0 %v501_v9  ;;  %476 = vmatprep.subr.bf16.mxu1 %v501_v9 }
  0x13   :  { %196 = vmatpush1.bf16.msra.mxu0 %v503_v10  ;;  %484 = vmatpush1.bf16.msra.mxu1 %v503_v10 }
  0x14   :  { %197 = vmatprep.subr.bf16.mxu0 %v504_v11  ;;  %477 = vmatprep.subr.bf16.mxu1 %v504_v11 }
  0x17   :  { %198 = vmatpush1.bf16.msra.mxu0 %v506_v12  ;;  %485 = vmatpush1.bf16.msra.mxu1 %v506_v12 }
  0x18   :  { %199 = vmatprep.subr.bf16.mxu0 %v507_v13  ;;  %478 = vmatprep.subr.bf16.mxu1 %v507_v13 }
  0x1b   :  { %200 = vmatpush1.bf16.msra.mxu0 %v509_v14  ;;  %486 = vmatpush1.bf16.msra.mxu1 %v509_v14 }
  0x1c   :  { %201 = vmatprep.subr.bf16.mxu0 %v510_v15  ;;  %479 = vmatprep.subr.bf16.mxu1 %v510_v15 }
  0x1f   :  { %202 = vmatpush1.bf16.msra.mxu0 %v512_v16  ;;  %487 = vmatpush1.bf16.msra.mxu1 %v512_v16 }
  0x22   :  { %220 = vmatmul.mubr.bf16.vlgmr.msra.gmra.mrb[0].mxu0 %v513_v17  ;;  %260 = vmatmul.mubr.bf16.vlgmr.msra.gmra.mrb[0].mxu1 %v514_v18 }
  0x23   :  { %229 = vmatprep.mubr.bf16.mxu0 %v521_v1  ;;  %269 = vmatprep.mubr.bf16.mxu1 %v521_v1 }
  0x2a   :  { %230 = vmatmul.mubr.bf16.gmra.mrb[4].mxu0 %v515_v19  ;;  %270 = vmatmul.mubr.bf16.gmra.mrb[4].mxu1 %v516_v20 }
  0x2b   :  { %239 = vmatprep.mubr.bf16.mxu0 %v521_v1  ;;  %279 = vmatprep.mubr.bf16.mxu1 %v521_v1 }
  0x32   :  { %240 = vmatmul.mubr.bf16.gmra.mrb[8].mxu0 %v517_v21  ;;  %280 = vmatmul.mubr.bf16.gmra.mrb[8].mxu1 %v518_v22 }
  0x33   :  { %249 = vmatprep.mubr.bf16.mxu0 %v521_v1  ;;  %289 = vmatprep.mubr.bf16.mxu1 %v521_v1 }
  0x3a   :  { %250 = vmatmul.mubr.bf16.gmra.mrb[12].mxu0 %v519_v23  ;;  %290 = vmatmul.mubr.bf16.gmra.mrb[12].mxu1 %v520_v24 }
  0xf5   :  { %v221_v32 = vpop.f32.mrb[0].mxu0  ;;  %v261_v33 = vpop.f32.mrb[0].mxu1 }
  0xf6   :  { %v222_v34 = vadd.f32 %v221_v32, %v625_v30  ;;  %v262_v35 = vadd.f32 %v261_v33, %v625_v30  ;;  %v223_v36 = vpop.f32.mrb[1].mxu0  ;;  %v263_v37 = vpop.f32.mrb[1].mxu1 }
  0xf7   :  { %v224_v38 = vadd.f32 %v223_v36, %v627_v31  ;;  %v264_v39 = vadd.f32 %v263_v37, %v627_v31  ;;  %v225_v40 = vpop.f32.mrb[2].mxu0  ;;  %v265_v41 = vpop.f32.mrb[2].mxu1 }
  0xf8   :  { %v226_v42 = vadd.f32 %v225_v40, %v625_v30  ;;  %v266_v43 = vadd.f32 %v265_v41, %v625_v30  ;;  %v227_v44 = vpop.f32.mrb[3].mxu0  ;;  %v267_v45 = vpop.f32.mrb[3].mxu1 }
  0xf9   :  { %v456_v46 = vpack.c.bf16 %v224_v38, %v222_v34  ;;  %v464_v47 = vpack.c.bf16 %v264_v39, %v262_v35  ;;  %v228_v48 = vadd.f32 %v227_v44, %v627_v31  ;;  %v268_v49 = vadd.f32 %v267_v45, %v627_v31 }
  0xfb   :  { %396 = vst [vmem:[%s712_s3] sm:$0xff] %v456_v46  ;;  %404 = vst [vmem:[%s712_s3 + $0x40] sm:$0xff] %v464_v47  ;;  %v457_v50 = vpack.c.bf16 %v228_v48, %v226_v42  ;;  %v465_v51 = vpack.c.bf16 %v268_v49, %v266_v43 }
  0xfd   :  { %397 = vst [vmem:[%s712_s3 + $0x8] sm:$0xff] %v457_v50  ;;  %405 = vst [vmem:[%s712_s3 + $0x48] sm:$0xff] %v465_v51  ;;  %v231_v52 = vpop.f32.mrb[4].mxu0  ;;  %v271_v53 = vpop.f32.mrb[4].mxu1 }
  0xfe   :  { %v232_v54 = vadd.f32 %v231_v52, %v625_v30  ;;  %v272_v55 = vadd.f32 %v271_v53, %v625_v30  ;;  %v233_v56 = vpop.f32.mrb[5].mxu0  ;;  %v273_v57 = vpop.f32.mrb[5].mxu1 }
  0xff   :  { %v234_v58 = vadd.f32 %v233_v56, %v627_v31  ;;  %v274_v59 = vadd.f32 %v273_v57, %v627_v31  ;;  %v235_v60 = vpop.f32.mrb[6].mxu0  ;;  %v275_v61 = vpop.f32.mrb[6].mxu1 }
 0x100   :  { %v236_v62 = vadd.f32 %v235_v60, %v625_v30  ;;  %v276_v63 = vadd.f32 %v275_v61, %v625_v30  ;;  %v237_v0 = vpop.f32.mrb[7].mxu0  ;;  %v277_v1 = vpop.f32.mrb[7].mxu1 }
 0x101   :  { %v458_v2 = vpack.c.bf16 %v234_v58, %v232_v54  ;;  %v466_v3 = vpack.c.bf16 %v274_v59, %v272_v55  ;;  %v238_v4 = vadd.f32 %v237_v0, %v627_v31  ;;  %v278_v5 = vadd.f32 %v277_v1, %v627_v31 }
 0x103   :  { %398 = vst [vmem:[%s712_s3 + $0x10] sm:$0xff] %v458_v2  ;;  %406 = vst [vmem:[%s712_s3 + $0x50] sm:$0xff] %v466_v3  ;;  %v459_v6 = vpack.c.bf16 %v238_v4, %v236_v62  ;;  %v467_v7 = vpack.c.bf16 %v278_v5, %v276_v63 }
 0x105   :  { %399 = vst [vmem:[%s712_s3 + $0x18] sm:$0xff] %v459_v6  ;;  %407 = vst [vmem:[%s712_s3 + $0x58] sm:$0xff] %v467_v7  ;;  %v241_v8 = vpop.f32.mrb[8].mxu0  ;;  %v281_v9 = vpop.f32.mrb[8].mxu1 }
 0x106   :  { %v242_v10 = vadd.f32 %v241_v8, %v625_v30  ;;  %v282_v11 = vadd.f32 %v281_v9, %v625_v30  ;;  %v243_v12 = vpop.f32.mrb[9].mxu0  ;;  %v283_v13 = vpop.f32.mrb[9].mxu1 }
 0x107   :  { %v244_v14 = vadd.f32 %v243_v12, %v627_v31  ;;  %v284_v15 = vadd.f32 %v283_v13, %v627_v31  ;;  %v245_v16 = vpop.f32.mrb[10].mxu0  ;;  %v285_v17 = vpop.f32.mrb[10].mxu1 }
 0x108   :  { %v246_v18 = vadd.f32 %v245_v16, %v625_v30  ;;  %v286_v19 = vadd.f32 %v285_v17, %v625_v30  ;;  %v247_v20 = vpop.f32.mrb[11].mxu0  ;;  %v287_v21 = vpop.f32.mrb[11].mxu1 }
 0x109   :  { %v460_v22 = vpack.c.bf16 %v244_v14, %v242_v10  ;;  %v468_v23 = vpack.c.bf16 %v284_v15, %v282_v11  ;;  %v248_v24 = vadd.f32 %v247_v20, %v627_v31  ;;  %v288_v25 = vadd.f32 %v287_v21, %v627_v31 }
 0x10b   :  { %400 = vst [vmem:[%s712_s3 + $0x20] sm:$0xff] %v460_v22  ;;  %408 = vst [vmem:[%s712_s3 + $0x60] sm:$0xff] %v468_v23  ;;  %v461_v26 = vpack.c.bf16 %v248_v24, %v246_v18  ;;  %v469_v27 = vpack.c.bf16 %v288_v25, %v286_v19 }
 0x10d   :  { %401 = vst [vmem:[%s712_s3 + $0x28] sm:$0xff] %v461_v26  ;;  %409 = vst [vmem:[%s712_s3 + $0x68] sm:$0xff] %v469_v27  ;;  %v251_v28 = vpop.f32.mrb[12].mxu0  ;;  %v291_v29 = vpop.f32.mrb[12].mxu1 }
 0x10e   :  { %v252_v32 = vadd.f32 %v251_v28, %v625_v30  ;;  %v292_v33 = vadd.f32 %v291_v29, %v625_v30  ;;  %v253_v34 = vpop.f32.mrb[13].mxu0  ;;  %v293_v35 = vpop.f32.mrb[13].mxu1 }
 0x10f   :  { %v254_v36 = vadd.f32 %v253_v34, %v627_v31  ;;  %v294_v37 = vadd.f32 %v293_v35, %v627_v31  ;;  %v255_v38 = vpop.f32.mrb[14].mxu0  ;;  %v295_v39 = vpop.f32.mrb[14].mxu1 }
 0x110   :  { %v256_v40 = vadd.f32 %v255_v38, %v625_v30  ;;  %v296_v41 = vadd.f32 %v295_v39, %v625_v30  ;;  %v257_v42 = vpop.f32.mrb[15].mxu0  ;;  %v297_v43 = vpop.f32.mrb[15].mxu1 }
 0x111   :  { %v462_v44 = vpack.c.bf16 %v254_v36, %v252_v32  ;;  %v470_v45 = vpack.c.bf16 %v294_v37, %v292_v33  ;;  %v258_v46 = vadd.f32 %v257_v42, %v627_v31  ;;  %v298_v47 = vadd.f32 %v297_v43, %v627_v31 }
 0x113   :  { %402 = vst [vmem:[%s712_s3 + $0x30] sm:$0xff] %v462_v44  ;;  %410 = vst [vmem:[%s712_s3 + $0x70] sm:$0xff] %v470_v45  ;;  %v463_v48 = vpack.c.bf16 %v258_v46, %v256_v40  ;;  %v471_v49 = vpack.c.bf16 %v298_v47, %v296_v41 }
 0x115   :  { %403 = vst [vmem:[%s712_s3 + $0x38] sm:$0xff] %v463_v48  ;;  %411 = vst [vmem:[%s712_s3 + $0x78] sm:$0xff] %v471_v49 }

// kernel: from_hin_forward.9
= control target key start
LH: loop header
LB: loop body
LE: loop exit
PB: predicated region body
PF: predicated region fallthrough
CT: control target
= control target key end

     0   :  { %s858_s1 = inlined_call_operand.vmem [shape: bf16[128,128], index: 1, kind: input, shape index: {}]   ;;  %s859_s0 = inlined_call_operand.vmem [shape: bf16[128,128], index: 0, kind: input, shape index: {}]   ;;  %s860_s2 = inlined_call_operand.vmem [shape: f32[1,128], index: 2, kind: input, shape index: {}]   ;;  %s861_s3 = inlined_call_operand.vmem [shape: bf16[128,128], index: 3, kind: output, shape index: {}]  }
   0x1   :  { %v603_v0 = vld [vmem:[%s858_s1] sm:$0xff]   ;;  %v604_v1 = vld [vmem:[%s858_s1 + $0x8] sm:$0xff]   ;;  %v605_v2 = vld [vmem:[%s858_s1 + $0x10] sm:$0xff]  }
   0x2   :  { %555 = vmatprep.subr.bf16.mxu0 %v603_v0  ;;  %587 = vmatprep.subr.bf16.mxu1 %v603_v0  ;;  %v606_v3 = vld [vmem:[%s858_s1 + $0x18] sm:$0xff]   ;;  %v611_v4 = vld [vmem:[%s859_s0] sm:$0xff]   ;;  %v608_v7 = vld [vmem:[%s858_s1 + $0x28] sm:$0xff]  }
   0x3   :  { %556 = vmatpush3.bf16.msra.mxu0 %v603_v0  ;;  %595 = vmatpush3.bf16.msra.mxu1 %v603_v0  ;;  %v612_v5 = vld [vmem:[%s859_s0 + $0x20] sm:$0xff]   ;;  %v609_v8 = vld [vmem:[%s858_s1 + $0x30] sm:$0xff]   ;;  %v610_v9 = vld [vmem:[%s858_s1 + $0x38] sm:$0xff]  }
   0x4   :  { %557 = vmatprep.subr.bf16.mxu0 %v604_v1  ;;  %588 = vmatprep.subr.bf16.mxu1 %v604_v1  ;;  %v607_v6 = vld [vmem:[%s858_s1 + $0x20] sm:$0xff]   ;;  %v613_v10 = vld [vmem:[%s859_s0 + $0x8] sm:$0xff]   ;;  %v615_v12 = vld [vmem:[%s859_s0 + $0x10] sm:$0xff]  }
   0x5   :  { %571 = vmatprep.mubr.bf16.mxu0 %v611_v4  ;;  %579 = vmatprep.mubr.bf16.mxu1 %v612_v5  ;;  %v614_v11 = vld [vmem:[%s859_s0 + $0x28] sm:$0xff]   ;;  %v616_v13 = vld [vmem:[%s859_s0 + $0x30] sm:$0xff]   ;;  %v617_v14 = vld [vmem:[%s859_s0 + $0x18] sm:$0xff]  }
   0x6   :  { %v618_v15 = vld [vmem:[%s859_s0 + $0x38] sm:$0xff]   ;;  %v722_v16 = vld [vmem:[%s860_s2] ss:$0 sm:$0xff] }
   0x7   :  { %558 = vmatpush3.bf16.msra.mxu0 %v604_v1  ;;  %596 = vmatpush3.bf16.msra.mxu1 %v604_v1 }
   0x8   :  { %559 = vmatprep.subr.bf16.mxu0 %v605_v2  ;;  %589 = vmatprep.subr.bf16.mxu1 %v605_v2 }
   0xb   :  { %560 = vmatpush3.bf16.msra.mxu0 %v605_v2  ;;  %597 = vmatpush3.bf16.msra.mxu1 %v605_v2 }
   0xc   :  { %561 = vmatprep.subr.bf16.mxu0 %v606_v3  ;;  %590 = vmatprep.subr.bf16.mxu1 %v606_v3 }
   0xf   :  { %562 = vmatpush3.bf16.msra.mxu0 %v606_v3  ;;  %598 = vmatpush3.bf16.msra.mxu1 %v606_v3 }
  0x10   :  { %563 = vmatprep.subr.bf16.mxu0 %v607_v6  ;;  %591 = vmatprep.subr.bf16.mxu1 %v607_v6 }
  0x13   :  { %564 = vmatpush3.bf16.msra.mxu0 %v607_v6  ;;  %599 = vmatpush3.bf16.msra.mxu1 %v607_v6 }
  0x14   :  { %565 = vmatprep.subr.bf16.mxu0 %v608_v7  ;;  %592 = vmatprep.subr.bf16.mxu1 %v608_v7 }
  0x17   :  { %566 = vmatpush3.bf16.msra.mxu0 %v608_v7  ;;  %600 = vmatpush3.bf16.msra.mxu1 %v608_v7 }
  0x18   :  { %567 = vmatprep.subr.bf16.mxu0 %v609_v8  ;;  %593 = vmatprep.subr.bf16.mxu1 %v609_v8 }
  0x1b   :  { %568 = vmatpush3.bf16.msra.mxu0 %v609_v8  ;;  %601 = vmatpush3.bf16.msra.mxu1 %v609_v8 }
  0x1c   :  { %569 = vmatprep.subr.bf16.mxu0 %v610_v9  ;;  %594 = vmatprep.subr.bf16.mxu1 %v610_v9 }
  0x1f   :  { %570 = vmatpush3.bf16.msra.mxu0 %v610_v9  ;;  %602 = vmatpush3.bf16.msra.mxu1 %v610_v9 }
  0x22   :  { %572 = vmatmul.mubr.bf16.vlgmr.msra.gmra.mrb[0].mxu0 %v613_v10  ;;  %580 = vmatmul.mubr.bf16.vlgmr.msra.gmra.mrb[0].mxu1 %v614_v11 }
  0x23   :  { %575 = vmatprep.mubr.bf16.mxu0 %v615_v12  ;;  %583 = vmatprep.mubr.bf16.mxu1 %v616_v13 }
  0x2a   :  { %576 = vmatmul.mubr.bf16.gmra.mrb[4].mxu0 %v617_v14  ;;  %584 = vmatmul.mubr.bf16.gmra.mrb[4].mxu1 %v618_v15 }
  0xf5   :  { %v573_v17 = vpop.f32.mrb[0].mxu0  ;;  %v581_v18 = vpop.f32.mrb[0].mxu1 }
  0xf6   :  { %v725_v19 = vadd.f32 %v573_v17, %v722_v16  ;;  %v728_v20 = vadd.f32 %v581_v18, %v722_v16  ;;  %v184_v21 = vpop.f32.mrb[1].mxu0  ;;  %v216_v22 = vpop.f32.mrb[1].mxu1 }
  0xf7   :  { %v731_v23 = vadd.f32 %v722_v16, %v184_v21  ;;  %v734_v24 = vadd.f32 %v722_v16, %v216_v22  ;;  %v574_v25 = vpop.f32.mrb[2].mxu0  ;;  %v582_v26 = vpop.f32.mrb[2].mxu1 }
  0xf8   :  { %v265_v27 = vmin.f32 %v725_v19, 0.0  ;;  %v273_v28 = vmin.f32 %v728_v20, 0.0  ;;  %v187_v29 = vpop.f32.mrb[3].mxu0  ;;  %v219_v30 = vpop.f32.mrb[3].mxu1  ;;  %v741_v35 = vadd.f32 %v574_v25, %v722_v16  ;;  %v744_v36 = vadd.f32 %v582_v26, %v722_v16 }
  0xf9   :  { %v263_v31 = vmin.f32 %v731_v23, 0.0  ;;  %v271_v32 = vmin.f32 %v734_v24, 0.0  ;;  %v747_v39 = vadd.f32 %v722_v16, %v187_v29  ;;  %v750_v40 = vadd.f32 %v722_v16, %v219_v30 }
  0xfa   :  { %v283_v33 = vmul.f32 1.442695, %v265_v27  ;;  %v299_v34 = vmul.f32 1.442695, %v273_v28  ;;  %v266_v41 = vmin.f32 %v741_v35, 0.0  ;;  %v274_v42 = vmin.f32 %v744_v36, 0.0 }
  0xfb   :  { %v279_v37 = vmul.f32 1.442695, %v263_v31  ;;  %v295_v38 = vmul.f32 1.442695, %v271_v32  ;;  %v264_v43 = vmin.f32 %v747_v39, 0.0  ;;  %v272_v47 = vmin.f32 %v750_v40, 0.0 }
  0xfc   :  { %619 = vpow2.f32 %v283_v33  ;;  %v285_v46 = vmul.f32 1.442695, %v266_v41  ;;  %v301_v50 = vmul.f32 1.442695, %v274_v42  ;;  %vm249_vm0 = vcmp.gt.f32.partialorder %v725_v19, 0.0 }
  0xfd   :  { %621 = vpow2.f32 %v299_v34  ;;  %v577_v44 = vpop.f32.mrb[4].mxu0  ;;  %v585_v45 = vpop.f32.mrb[4].mxu1  ;;  %v281_v51 = vmul.f32 1.442695, %v264_v43  ;;  %v297_v55 = vmul.f32 1.442695, %v272_v47 }
  0xfe   :  { %623 = vpow2.f32 %v279_v37  ;;  %v200_v48 = vpop.f32.mrb[5].mxu0  ;;  %v232_v49 = vpop.f32.mrb[5].mxu1  ;;  %v757_v52 = vadd.f32 %v577_v44, %v722_v16  ;;  %v760_v56 = vadd.f32 %v585_v45, %v722_v16  ;;  %vm257_vm1 = vcmp.gt.f32.partialorder %v728_v20, 0.0 }
  0xff   :  { %625 = vpow2.f32 %v295_v38  ;;  %v578_v53 = vpop.f32.mrb[6].mxu0  ;;  %v586_v54 = vpop.f32.mrb[6].mxu1  ;;  %v763_v57 = vadd.f32 %v722_v16, %v200_v48  ;;  %v767_v61 = vadd.f32 %v722_v16, %v232_v49  ;;  %vm247_vm2 = vcmp.gt.f32.partialorder %v731_v23, 0.0 }
 0x100   :  { %627 = vpow2.f32 %v285_v46  ;;  %v203_v58 = vpop.f32.mrb[7].mxu0  ;;  %v235_v59 = vpop.f32.mrb[7].mxu1  ;;  %v269_v60 = vmin.f32 %v757_v52, 0.0  ;;  %v277_v62 = vmin.f32 %v760_v56, 0.0  ;;  %v773_v3 = vadd.f32 %v578_v53, %v722_v16 }
 0x101   :  { %629 = vpow2.f32 %v301_v50  ;;  %v267_v0 = vmin.f32 %v763_v57, 0.0  ;;  %v275_v2 = vmin.f32 %v767_v61, 0.0  ;;  %v776_v4 = vadd.f32 %v586_v54, %v722_v16 }
 0x102   :  { %631 = vpow2.f32 %v281_v51  ;;  %v291_v63 = vmul.f32 1.442695, %v269_v60  ;;  %v307_v1 = vmul.f32 1.442695, %v277_v62  ;;  %v780_v6 = vadd.f32 %v722_v16, %v203_v58 }
 0x103   :  { %633 = vpow2.f32 %v297_v55  ;;  %v287_v5 = vmul.f32 1.442695, %v267_v0  ;;  %v303_v8 = vmul.f32 1.442695, %v275_v2  ;;  %v270_v9 = vmin.f32 %v773_v3, 0.0 }
 0x104   :  { %635 = vpow2.f32 %v291_v63  ;;  %vm255_vm3 = vcmp.gt.f32.partialorder %v734_v24, 0.0  ;;  %v278_v11 = vmin.f32 %v776_v4, 0.0  ;;  %v788_v15 = vadd.f32 %v722_v16, %v235_v59 }
 0x105   :  { %637 = vpow2.f32 %v307_v1  ;;  %v293_v14 = vmul.f32 1.442695, %v270_v9  ;;  %v268_v22 = vmin.f32 %v780_v6, 0.0  ;;  %vm250_vm4 = vcmp.gt.f32.partialorder %v741_v35, 0.0 }
 0x106   :  { %v620_v7 = vpop.eup %619  ;;  %639 = vpow2.f32 %v287_v5  ;;  %v309_v21 = vmul.f32 1.442695, %v278_v11  ;;  %vm258_vm5 = vcmp.gt.f32.partialorder %v744_v36, 0.0  ;;  %vm248_vm6 = vcmp.gt.f32.partialorder %v747_v39, 0.0 }
 0x107   :  { %v622_v10 = vpop.eup %621  ;;  %v446_v13 = vadd.f32 -1.0, %v620_v7  ;;  %641 = vpow2.f32 %v303_v8  ;;  %v289_v16 = vmul.f32 1.442695, %v268_v22  ;;  %v276_v33 = vmin.f32 %v788_v15, 0.0 }
 0x108   :  { %v624_v12 = vpop.eup %623  ;;  %v454_v18 = vadd.f32 -1.0, %v622_v10  ;;  %643 = vpow2.f32 %v293_v14  ;;  %vm256_vm7 = vcmp.gt.f32.partialorder %v750_v40, 0.0  ;;  %vm253_vm8 = vcmp.gt.f32.partialorder %v757_v52, 0.0 }
 0x109   :  { %v626_v17 = vpop.eup %625  ;;  %v444_v27 = vadd.f32 -1.0, %v624_v12  ;;  %645 = vpow2.f32 %v309_v21  ;;  %v329_v30 = vsel %vm249_vm0, %v725_v19, %v446_v13  ;;  %v305_v44 = vmul.f32 1.442695, %v276_v33 }
 0x10a   :  { %v628_v25 = vpop.eup %627  ;;  %v452_v31 = vadd.f32 -1.0, %v626_v17  ;;  %v337_v37 = vsel %vm257_vm1, %v728_v20, %v454_v18  ;;  %647 = vpow2.f32 %v289_v16  ;;  %vm254_vm9 = vcmp.gt.f32.partialorder %v773_v3, 0.0 }
 0x10b   :  { %v630_v26 = vpop.eup %629  ;;  %v447_v28 = vadd.f32 -1.0, %v628_v25  ;;  %v327_v45 = vsel %vm247_vm2, %v731_v23, %v444_v27  ;;  %649 = vpow2.f32 %v305_v44  ;;  %vm261_vm10 = vcmp.gt.f32.partialorder %v760_v56, 0.0 }
 0x10c   :  { %v632_v29 = vpop.eup %631  ;;  %v455_v32 = vadd.f32 -1.0, %v630_v26  ;;  %v335_v47 = vsel %vm255_vm3, %v734_v24, %v452_v31  ;;  %vm262_vm11 = vcmp.gt.f32.partialorder %v776_v4, 0.0  ;;  %vm251_vm12 = vcmp.gt.f32.partialorder %v763_v57, 0.0 }
 0x10d   :  { %v634_v34 = vpop.eup %633  ;;  %v330_v38 = vsel %vm250_vm4, %v741_v35, %v447_v28  ;;  %v445_v41 = vadd.f32 -1.0, %v632_v29  ;;  %vm252_vm13 = vcmp.gt.f32.partialorder %v780_v6, 0.0  ;;  %vm259_vm14 = vcmp.gt.f32.partialorder %v767_v61, 0.0 }
 0x10e   :  { %v500_v42 = vpack.c.bf16 %v330_v38, %v329_v30  ;;  %v338_v19 = vsel %vm258_vm5, %v744_v36, %v455_v32  ;;  %v453_v43 = vadd.f32 -1.0, %v634_v34  ;;  %v636_v35 = vpop.eup %635  ;;  %vm260_vm15 = vcmp.gt.f32.partialorder %v788_v15, 0.0 }
 0x10f   :  { %v520_v46 = vpack.c.bf16 %v338_v19, %v337_v37  ;;  %v328_v20 = vsel %vm248_vm6, %v747_v39, %v445_v41  ;;  %v638_v23 = vpop.eup %637  ;;  %v450_v50 = vadd.f32 -1.0, %v636_v35 }
 0x110   :  { %532 = vst [vmem:[%s861_s3 + $0x8] sm:$0xff] %v500_v42   ;;  %v495_v36 = vpack.c.bf16 %v328_v20, %v327_v45  ;;  %v336_v48 = vsel %vm256_vm7, %v750_v40, %v453_v43  ;;  %v640_v49 = vpop.eup %639  ;;  %v458_v40 = vadd.f32 -1.0, %v638_v23 }
 0x111   :  { %536 = vst [vmem:[%s861_s3 + $0x28] sm:$0xff] %v520_v46   ;;  %v515_v39 = vpack.c.bf16 %v336_v48, %v335_v47  ;;  %v642_v24 = vpop.eup %641  ;;  %v448_v55 = vadd.f32 -1.0, %v640_v49  ;;  %v333_v60 = vsel %vm253_vm8, %v757_v52, %v450_v50 }
 0x112   :  { %496 = vst [vmem:[%s861_s3] sm:$0xff] %v495_v36   ;;  %v644_v51 = vpop.eup %643  ;;  %v341_v63 = vsel %vm261_vm10, %v760_v56, %v458_v40  ;;  %v456_v5 = vadd.f32 -1.0, %v642_v24 }
 0x113   :  { %535 = vst [vmem:[%s861_s3 + $0x20] sm:$0xff] %v515_v39   ;;  %v646_v53 = vpop.eup %645  ;;  %v451_v54 = vadd.f32 -1.0, %v644_v51  ;;  %v331_v52 = vsel %vm251_vm12, %v763_v57, %v448_v55 }
 0x114   :  { %v459_v58 = vadd.f32 -1.0, %v646_v53  ;;  %v648_v59 = vpop.eup %647  ;;  %v339_v9 = vsel %vm259_vm14, %v767_v61, %v456_v5 }
 0x115   :  { %v334_v62 = vsel %vm254_vm9, %v773_v3, %v451_v54  ;;  %v449_v2 = vadd.f32 -1.0, %v648_v59  ;;  %v650_v8 = vpop.eup %649 }
 0x116   :  { %v510_v0 = vpack.c.bf16 %v334_v62, %v333_v60  ;;  %v342_v1 = vsel %vm262_vm11, %v776_v4, %v459_v58  ;;  %v457_v4 = vadd.f32 -1.0, %v650_v8 }
 0x117   :  { %v530_v7 = vpack.c.bf16 %v342_v1, %v341_v63  ;;  %v332_v3 = vsel %vm252_vm13, %v780_v6, %v449_v2 }
 0x118   :  { %534 = vst [vmem:[%s861_s3 + $0x18] sm:$0xff] %v510_v0   ;;  %v505_v56 = vpack.c.bf16 %v332_v3, %v331_v52  ;;  %v340_v57 = vsel %vm260_vm15, %v788_v15, %v457_v4 }
 0x119   :  { %538 = vst [vmem:[%s861_s3 + $0x38] sm:$0xff] %v530_v7   ;;  %v525_v10 = vpack.c.bf16 %v340_v57, %v339_v9 }
 0x11a   :  { %533 = vst [vmem:[%s861_s3 + $0x10] sm:$0xff] %v505_v56  }
 0x11b   :  { %537 = vst [vmem:[%s861_s3 + $0x30] sm:$0xff] %v525_v10  }

// kernel: from_hin_forward.13
= control target key start
LH: loop header
LB: loop body
LE: loop exit
PB: predicated region body
PF: predicated region fallthrough
CT: control target
= control target key end

     0   :  { %s1854_s21 = smov 0   ;;  %s1856_s22 = smov 0   ;;  %s2089_s0 = inlined_call_operand.vmem [shape: bf16[2,128,128], index: 0, kind: input, shape index: {}]   ;;  %s2090_s1 = inlined_call_operand.vmem [shape: bf16[128,256], index: 1, kind: input, shape index: {}]   ;;  %s2091_s2 = inlined_call_operand.vmem [shape: bf16[128,128], index: 2, kind: input, shape index: {}]   ;;  %s2092_s3 = inlined_call_operand.vmem [shape: f32[1,128], index: 3, kind: input, shape index: {}]   ;;  %s2093_s4 = inlined_call_operand.vmem [shape: f32[1,128], index: 4, kind: input, shape index: {}]   ;;  %s2094_s5 = inlined_call_operand.vmem [shape: bf16[2,128,128], index: 5, kind: output, shape index: {0}]   ;;  %s2095_s6 = inlined_call_operand.vmem [shape: f32[2,1,128], index: 6, kind: output, shape index: {1}]  }
   0x1   :  { %s1858_s23 = smov 0   ;;  %s1860_s24 = smov 0  }
   0x2   :  { %s1862_s25 = smov 0  }
   0x3 LB: > { %s36_s26 = sadd.s32 1, %s1813_s24  ;;  %p82_p1 = scmp.ne.s32.totalorder %s1805_s22, %s1801_s21  ;;  %s1817_s25 = sphi %s1862_s25, %s17_s25   ;;  %s1813_s24 = sphi %s1860_s24, %s2099_s24   ;;  %s1809_s23 = sphi %s1858_s23, %s2098_s23   ;;  %s1805_s22 = sphi %s1856_s22, %s2097_s22   ;;  %s1801_s21 = sphi %s1854_s21, %s2096_s21  }
   0x4   : > { %p38_p0 = scmp.ge.s32.totalorder %s36_s26, 2  ;;  %p83_p2 = scmp.eq.s32.totalorder %s1817_s25, 0 }
   0x5   : > { %s75_s28 = sadd.s32 1, %s1805_s22  ;;  %p1421_p5 = scmp.ge.s32.totalorder %s1817_s25, 2 }
   0x6   : > { %s2101_s26 = smov (%p38_p0, %s36_s26), 0  ;;  %p84_p3 = por %p83_p2, %p82_p1 }
   0x7   : > { %s71_s27 = ssub.s32 %s1813_s24, %s2101_s26  ;;  %236 = sbr.rel (%p1421_p5) target bundleno = 28 (0x1c), region = 28 }
   0x8   : > { %p73_p4 = scmp.eq.s32.totalorder %s71_s27, 0 }
   0xa   : > { %s1889_s29 = scalar_select %p73_p4, %s1805_s22, %s75_s28  }
   0xe   : > { %255 = sbr.rel (!%p84_p3) target bundleno = 28 (0x1c), region = 36  ;;  %s257_s30 = sand.u32 (%p84_p3), 1, %s1805_s22  }
   0xf   : > { %s1423_s7 = sshll.u32 (%p84_p3), %s1813_s24, 2  ;;  %s1422_s8 = sshll.u32 (%p84_p3), %s257_s30, 6 }
  0x10   : > { %s1897_s11 = scalar_lea.vmem (%p84_p3), %s2090_s1, %s1423_s7  ;;  %s259_s12 = scalar_lea.vmem (%p84_p3), [#allocation3], %s1422_s8 }
  0x11   : > { %v280_v0 = vld [vmem:[%s1897_s11] sm:$0xf] (%p84_p3)  ;;  %v282_v1 = vld [vmem:[%s1897_s11 + $0x8] sm:$0xf] (%p84_p3)  ;;  %v284_v2 = vld [vmem:[%s1897_s11 + $0x10] sm:$0xf] (%p84_p3) }
  0x12   : > { %281 = vst [vmem:[%s259_s12] sm:$0xf] (%p84_p3), %v280_v0  ;;  %283 = vst [vmem:[%s259_s12 + $0x4] sm:$0xf] (%p84_p3), %v282_v1  ;;  %v286_v3 = vld [vmem:[%s1897_s11 + $0x18] sm:$0xf] (%p84_p3) }
  0x13   : > { %v288_v4 = vld [vmem:[%s1897_s11 + $0x20] sm:$0xf] (%p84_p3)  ;;  %285 = vst [vmem:[%s259_s12 + $0x8] sm:$0xf] (%p84_p3), %v284_v2  ;;  %287 = vst [vmem:[%s259_s12 + $0xc] sm:$0xf] (%p84_p3), %v286_v3 }
  0x14   : > { %289 = vst [vmem:[%s259_s12 + $0x10] sm:$0xf] (%p84_p3), %v288_v4  ;;  %v290_v5 = vld [vmem:[%s1897_s11 + $0x28] sm:$0xf] (%p84_p3)  ;;  %v292_v6 = vld [vmem:[%s1897_s11 + $0x30] sm:$0xf] (%p84_p3) }
  0x15   : > { %v294_v7 = vld [vmem:[%s1897_s11 + $0x38] sm:$0xf]  ;;  %291 = vst [vmem:[%s259_s12 + $0x14] sm:$0xf] %v290_v5  ;;  %293 = vst [vmem:[%s259_s12 + $0x18] sm:$0xf] %v292_v6 }
  0x16   : > { %295 = vst [vmem:[%s259_s12 + $0x1c] sm:$0xf] %v294_v7  ;;  %v296_v8 = vld [vmem:[%s1897_s11 + $0x40] sm:$0xf]  ;;  %v298_v9 = vld [vmem:[%s1897_s11 + $0x48] sm:$0xf] }
  0x17   : > { %v300_v10 = vld [vmem:[%s1897_s11 + $0x50] sm:$0xf]  ;;  %297 = vst [vmem:[%s259_s12 + $0x20] sm:$0xf] %v296_v8  ;;  %299 = vst [vmem:[%s259_s12 + $0x24] sm:$0xf] %v298_v9 }
  0x18   : > { %301 = vst [vmem:[%s259_s12 + $0x28] sm:$0xf] %v300_v10  ;;  %v302_v11 = vld [vmem:[%s1897_s11 + $0x58] sm:$0xf]  ;;  %v304_v12 = vld [vmem:[%s1897_s11 + $0x60] sm:$0xf] }
  0x19   : > { %v306_v13 = vld [vmem:[%s1897_s11 + $0x68] sm:$0xf]  ;;  %303 = vst [vmem:[%s259_s12 + $0x2c] sm:$0xf] %v302_v11  ;;  %305 = vst [vmem:[%s259_s12 + $0x30] sm:$0xf] %v304_v12 }
  0x1a   : > { %307 = vst [vmem:[%s259_s12 + $0x34] sm:$0xf] %v306_v13  ;;  %v308_v14 = vld [vmem:[%s1897_s11 + $0x70] sm:$0xf]  ;;  %v310_v15 = vld [vmem:[%s1897_s11 + $0x78] sm:$0xf] }
  0x1b   : > { %309 = vst [vmem:[%s259_s12 + $0x38] sm:$0xf] %v308_v14  ;;  %311 = vst [vmem:[%s259_s12 + $0x3c] sm:$0xf] %v310_v15 }
  0x1c PF: > { %p1424_p6 = scmp.ge.s32.totalorder %s1817_s25, 1  ;;  %p365_p7 = scmp.lt.s32.totalorder %s1817_s25, 3 }
  0x1e   : > { %p366_p8 = pnand %p1424_p6, %p365_p7 }
  0x1f   : > { %s372_s13 = sand.u32 (!%p366_p8), 1, %s1801_s21   ;;  %p424_p9 = scmp.lt.s32.totalorder (!%p366_p8), %s1809_s23, 1  ;;  %v1707_v16 = vld [vmem:[%s2091_s2] sm:$0xff] (!%p366_p8)   ;;  %v1708_v17 = vld [vmem:[%s2091_s2 + $0x8] sm:$0xff] (!%p366_p8)   ;;  %v1709_v34 = vld [vmem:[%s2091_s2 + $0x10] sm:$0xff] (!%p366_p8)  }
  0x20   : > { %369 = sbr.rel (%p366_p8) target bundleno = 578 (0x242), region = 77  ;;  %s1425_s14 = sshll.u32 (!%p366_p8), %s372_s13, 6  ;;  %1619 = vmatprep.subr.bf16.mxu1 (!%p366_p8), %v1707_v16  ;;  %v1710_v35 = vld [vmem:[%s2091_s2 + $0x18] sm:$0xff] (!%p366_p8)   ;;  %v1711_v36 = vld [vmem:[%s2091_s2 + $0x20] sm:$0xff] (!%p366_p8)   ;;  %v1712_v37 = vld [vmem:[%s2091_s2 + $0x28] sm:$0xff] (!%p366_p8)  }
  0x21   : > { %s374_s19 = scalar_lea.vmem (!%p366_p8), [#allocation3], %s1425_s14  ;;  %1620 = vmatpush3.bf16.msra.mxu1 (!%p366_p8), %v1707_v16  ;;  %v1713_v38 = vld [vmem:[%s2091_s2 + $0x30] sm:$0xff] (!%p366_p8)   ;;  %v1714_v39 = vld [vmem:[%s2091_s2 + $0x38] sm:$0xff] (!%p366_p8)  }
  0x22   : > { %v1691_v18 = vld [vmem:[%s374_s19] sm:$0xff] (!%p366_p8)   ;;  %v1692_v19 = vld [vmem:[%s374_s19 + $0x8] sm:$0xff] (!%p366_p8)   ;;  %1621 = vmatprep.subr.bf16.mxu1 (!%p366_p8), %v1708_v17  ;;  %v1693_v20 = vld [vmem:[%s374_s19 + $0x10] sm:$0xff] (!%p366_p8)  }
  0x23   : > { %1587 = vmatprep.subr.bf16.mxu0 (!%p366_p8), %v1691_v18  ;;  %v1694_v21 = vld [vmem:[%s374_s19 + $0x18] sm:$0xff] (!%p366_p8)   ;;  %v1695_v23 = vld [vmem:[%s374_s19 + $0x20] sm:$0xff] (!%p366_p8)   ;;  %v1696_v24 = vld [vmem:[%s374_s19 + $0x28] sm:$0xff] (!%p366_p8)  }
  0x24   : > { %1588 = vmatpush3.bf16.msra.mxu0 (!%p366_p8), %v1691_v18  ;;  %v1697_v25 = vld [vmem:[%s374_s19 + $0x30] sm:$0xff] (!%p366_p8)   ;;  %v1698_v26 = vld [vmem:[%s374_s19 + $0x38] sm:$0xff] (!%p366_p8)  }
  0x25   : > { %1589 = vmatprep.subr.bf16.mxu0 (!%p366_p8), %v1692_v19  ;;  %1622 = vmatpush3.bf16.msra.mxu1 (!%p366_p8), %v1708_v17 }
  0x26   : > { %1623 = vmatprep.subr.bf16.mxu1 (!%p366_p8), %v1709_v34 }
  0x27   : > { %s2103_s23 = smov (!%p424_p9, %s1809_s23), 1 }
  0x28   : > { %s1490_s20 = sshll.u32 %s2103_s23, 6  ;;  %1590 = vmatpush3.bf16.msra.mxu0 %v1692_v19  ;;  %s452_s9 = scalar_lea.vmem %s2095_s6, %s2103_s23 }
  0x29   : > { %s1934_s28 = scalar_lea.vmem %s2089_s0, %s1490_s20  ;;  %1591 = vmatprep.subr.bf16.mxu0 %v1693_v20  ;;  %1624 = vmatpush3.bf16.msra.mxu1 %v1709_v34  ;;  %s1991_s21 = scalar_lea.vmem %s2094_s5, %s1490_s20 }
  0x2a   : > { %v1699_v22 = vld [vmem:[%s1934_s28] sm:$0xff]   ;;  %v1700_v27 = vld [vmem:[%s1934_s28 + $0x8] sm:$0xff]   ;;  %v1701_v28 = vld [vmem:[%s1934_s28 + $0x10] sm:$0xff]   ;;  %1625 = vmatprep.subr.bf16.mxu1 %v1710_v35 }
  0x2b   : > { %1603 = vmatprep.mubr.bf16.mxu0 %v1699_v22  ;;  %v1702_v29 = vld [vmem:[%s1934_s28 + $0x18] sm:$0xff]   ;;  %v1703_v30 = vld [vmem:[%s1934_s28 + $0x20] sm:$0xff]   ;;  %v1704_v31 = vld [vmem:[%s1934_s28 + $0x28] sm:$0xff]  }
  0x2c   : > { %1592 = vmatpush3.bf16.msra.mxu0 %v1693_v20  ;;  %v1705_v32 = vld [vmem:[%s1934_s28 + $0x30] sm:$0xff]   ;;  %v1706_v33 = vld [vmem:[%s1934_s28 + $0x38] sm:$0xff]  }
  0x2d   : > { %1593 = vmatprep.subr.bf16.mxu0 %v1694_v21  ;;  %1626 = vmatpush3.bf16.msra.mxu1 %v1710_v35 }
  0x2e   : > { %1627 = vmatprep.subr.bf16.mxu1 %v1711_v36 }
  0x30   : > { %1594 = vmatpush3.bf16.msra.mxu0 %v1694_v21 }
  0x31   : > { %1595 = vmatprep.subr.bf16.mxu0 %v1695_v23  ;;  %1628 = vmatpush3.bf16.msra.mxu1 %v1711_v36 }
  0x32   : > { %1629 = vmatprep.subr.bf16.mxu1 %v1712_v37 }
  0x34   : > { %1596 = vmatpush3.bf16.msra.mxu0 %v1695_v23 }
  0x35   : > { %1597 = vmatprep.subr.bf16.mxu0 %v1696_v24  ;;  %1630 = vmatpush3.bf16.msra.mxu1 %v1712_v37 }
  0x36   : > { %1631 = vmatprep.subr.bf16.mxu1 %v1713_v38 }
  0x38   : > { %1598 = vmatpush3.bf16.msra.mxu0 %v1696_v24 }
  0x39   : > { %1599 = vmatprep.subr.bf16.mxu0 %v1697_v25  ;;  %1632 = vmatpush3.bf16.msra.mxu1 %v1713_v38 }
  0x3a   : > { %1633 = vmatprep.subr.bf16.mxu1 %v1714_v39 }
  0x3c   : > { %1600 = vmatpush3.bf16.msra.mxu0 %v1697_v25 }
  0x3d   : > { %1601 = vmatprep.subr.bf16.mxu0 %v1698_v26  ;;  %1634 = vmatpush3.bf16.msra.mxu1 %v1714_v39 }
  0x40   : > { %1602 = vmatpush3.bf16.msra.mxu0 %v1698_v26 }
  0x43   : > { %1604 = vmatmul.mubr.bf16.vlgmr.msra.gmra.mrb[0].mxu0 %v1700_v27 }
  0x44   : > { %1607 = vmatprep.mubr.bf16.mxu0 %v1701_v28 }
  0x4b   : > { %1608 = vmatmul.mubr.bf16.gmra.mrb[4].mxu0 %v1702_v29 }
  0x4c   : > { %1611 = vmatprep.mubr.bf16.mxu0 %v1703_v30 }
  0x53   : > { %1612 = vmatmul.mubr.bf16.gmra.mrb[8].mxu0 %v1704_v31 }
  0x54   : > { %1615 = vmatprep.mubr.bf16.mxu0 %v1705_v32 }
  0x5b   : > { %1616 = vmatmul.mubr.bf16.gmra.mrb[12].mxu0 %v1706_v33 }
 0x116   : > { %v1605_v40 = vpop.f32.mrb[0].mxu0 }
 0x117   : > { %v785_v41 = vmin.f32 %v1605_v40, 0.0  ;;  %v653_v42 = vpop.f32.mrb[1].mxu0  ;;  %vm769_vm0 = vcmp.gt.f32.partialorder %v1605_v40, 0.0 }
 0x118   : > { %v783_v43 = vmin.f32 %v653_v42, 0.0  ;;  %v1606_v44 = vpop.f32.mrb[2].mxu0  ;;  %vm767_vm1 = vcmp.gt.f32.partialorder %v653_v42, 0.0 }
 0x119   : > { %v803_v45 = vmul.f32 1.442695, %v785_v41  ;;  %v786_v46 = vmin.f32 %v1606_v44, 0.0  ;;  %v656_v47 = vpop.f32.mrb[3].mxu0  ;;  %vm770_vm2 = vcmp.gt.f32.partialorder %v1606_v44, 0.0 }
 0x11a   : > { %v799_v48 = vmul.f32 1.442695, %v783_v43  ;;  %v784_v49 = vmin.f32 %v656_v47, 0.0  ;;  %vm768_vm3 = vcmp.gt.f32.partialorder %v656_v47, 0.0 }
 0x11b   : > { %1715 = vpow2.f32 %v803_v45  ;;  %v805_v50 = vmul.f32 1.442695, %v786_v46 }
 0x11c   : > { %1717 = vpow2.f32 %v799_v48  ;;  %v801_v51 = vmul.f32 1.442695, %v784_v49 }
 0x11d   : > { %1719 = vpow2.f32 %v805_v50 }
 0x11e   : > { %1721 = vpow2.f32 %v801_v51  ;;  %v1962_v52 = vpop.f32.mrb[4].mxu0 }
 0x11f   : > { %v789_v53 = vmin.f32 %v1962_v52, 0.0  ;;  %v1965_v54 = vpop.f32.mrb[5].mxu0  ;;  %vm773_vm4 = vcmp.gt.f32.partialorder %v1962_v52, 0.0 }
 0x120   : > { %v787_v55 = vmin.f32 %v1965_v54, 0.0  ;;  %v1968_v56 = vpop.f32.mrb[6].mxu0  ;;  %vm771_vm5 = vcmp.gt.f32.partialorder %v1965_v54, 0.0 }
 0x121   : > { %v811_v57 = vmul.f32 1.442695, %v789_v53  ;;  %v790_v58 = vmin.f32 %v1968_v56, 0.0  ;;  %v1971_v59 = vpop.f32.mrb[7].mxu0  ;;  %vm774_vm6 = vcmp.gt.f32.partialorder %v1968_v56, 0.0 }
 0x122   : > { %v807_v60 = vmul.f32 1.442695, %v787_v55  ;;  %v788_v61 = vmin.f32 %v1971_v59, 0.0  ;;  %vm772_vm7 = vcmp.gt.f32.partialorder %v1971_v59, 0.0 }
 0x123   : > { %1723 = vpow2.f32 %v811_v57  ;;  %v813_v62 = vmul.f32 1.442695, %v790_v58 }
 0x124   : > { %1725 = vpow2.f32 %v807_v60  ;;  %v809_v63 = vmul.f32 1.442695, %v788_v61 }
 0x125   : > { %v1716_v0 = vpop.eup %1715  ;;  %1727 = vpow2.f32 %v813_v62 }
 0x126   : > { %v1718_v1 = vpop.eup %1717  ;;  %v1448_v2 = vadd.f32 -1.0, %v1716_v0  ;;  %1729 = vpow2.f32 %v809_v63  ;;  %v1974_v3 = vpop.f32.mrb[8].mxu0 }
 0x127   : > { %v1720_v4 = vpop.eup %1719  ;;  %v793_v5 = vmin.f32 %v1974_v3, 0.0  ;;  %v1977_v6 = vpop.f32.mrb[9].mxu0  ;;  %v1446_v7 = vadd.f32 -1.0, %v1718_v1  ;;  %vm777_vm8 = vcmp.gt.f32.partialorder %v1974_v3, 0.0 }
 0x128   : > { %v1722_v8 = vpop.eup %1721  ;;  %v1449_v9 = vadd.f32 -1.0, %v1720_v4  ;;  %v791_v10 = vmin.f32 %v1977_v6, 0.0  ;;  %v1980_v11 = vpop.f32.mrb[10].mxu0  ;;  %v849_v16 = vsel %vm769_vm0, %v1605_v40, %v1448_v2  ;;  %vm775_vm10 = vcmp.gt.f32.partialorder %v1977_v6, 0.0 }
 0x129   : > { %v819_v12 = vmul.f32 1.442695, %v793_v5  ;;  %v794_v13 = vmin.f32 %v1980_v11, 0.0  ;;  %v1983_v14 = vpop.f32.mrb[11].mxu0  ;;  %v1447_v15 = vadd.f32 -1.0, %v1722_v8  ;;  %v847_v21 = vsel %vm767_vm1, %v653_v42, %v1446_v7 }
 0x12a   : > { %v850_v17 = vsel %vm770_vm2, %v1606_v44, %v1449_v9  ;;  %v815_v18 = vmul.f32 1.442695, %v791_v10  ;;  %v792_v19 = vmin.f32 %v1983_v14, 0.0  ;;  %vm778_vm9 = vcmp.gt.f32.partialorder %v1980_v11, 0.0 }
 0x12b   : > { %1731 = vpow2.f32 %v819_v12  ;;  %v821_v20 = vmul.f32 1.442695, %v794_v13  ;;  %v848_v22 = vsel %vm768_vm3, %v656_v47, %v1447_v15  ;;  %v864_v25 = vpack.c.bf16 %v850_v17, %v849_v16  ;;  %v2031_v16 = vld [vmem:[%s2092_s3] ss:$0 sm:$0xff] }
 0x12c   : > { %1733 = vpow2.f32 %v815_v18  ;;  %v817_v23 = vmul.f32 1.442695, %v792_v19  ;;  %v863_v24 = vpack.c.bf16 %v848_v22, %v847_v21  ;;  %vm776_vm11 = vcmp.gt.f32.partialorder %v1983_v14, 0.0 }
 0x12d   : > { %v1724_v26 = vpop.eup %1723  ;;  %1735 = vpow2.f32 %v821_v20  ;;  %1548 = vst [vmem:[%s1991_s21 + $0x8] sm:$0xff] %v864_v25  }
 0x12e   : > { %v1726_v27 = vpop.eup %1725  ;;  %v1452_v28 = vadd.f32 -1.0, %v1724_v26  ;;  %1737 = vpow2.f32 %v817_v23  ;;  %v1994_v29 = vpop.f32.mrb[12].mxu0  ;;  %1512 = vst [vmem:[%s1991_s21] sm:$0xff] %v863_v24   ;;  %1635 = vmatprep.mubr.bf16.mxu1 %v863_v24 }
 0x12f   : > { %v1728_v30 = vpop.eup %1727  ;;  %v1450_v31 = vadd.f32 -1.0, %v1726_v27  ;;  %v797_v32 = vmin.f32 %v1994_v29, 0.0  ;;  %v2000_v33 = vpop.f32.mrb[13].mxu0  ;;  %1636 = vmatmul.mubr.bf16.vlgmr.msra.gmra.mrb[0].mxu1 %v864_v25  ;;  %vm781_vm12 = vcmp.gt.f32.partialorder %v1994_v29, 0.0 }
 0x130   : > { %v1730_v34 = vpop.eup %1729  ;;  %v1453_v35 = vadd.f32 -1.0, %v1728_v30  ;;  %v795_v36 = vmin.f32 %v2000_v33, 0.0  ;;  %v1618_v37 = vpop.f32.mrb[14].mxu0  ;;  %v853_v38 = vsel %vm773_vm4, %v1962_v52, %v1452_v28  ;;  %vm779_vm14 = vcmp.gt.f32.partialorder %v2000_v33, 0.0 }
 0x131   : > { %v1451_v39 = vadd.f32 -1.0, %v1730_v34  ;;  %v827_v40 = vmul.f32 1.442695, %v797_v32  ;;  %v704_v41 = vpop.f32.mrb[15].mxu0  ;;  %v851_v42 = vsel %vm771_vm5, %v1965_v54, %v1450_v31  ;;  %v798_v45 = vmin.f32 %v1618_v37, 0.0 }
 0x132   : > { %v854_v43 = vsel %vm774_vm6, %v1968_v56, %v1453_v35  ;;  %v823_v44 = vmul.f32 1.442695, %v795_v36  ;;  %v796_v47 = vmin.f32 %v704_v41, 0.0  ;;  %vm782_vm13 = vcmp.gt.f32.partialorder %v1618_v37, 0.0  ;;  %v2044_v35 = vld [vmem:[%s2093_s4] ss:$0 sm:$0xff] }
 0x133   : > { %v852_v46 = vsel %vm772_vm7, %v1971_v59, %v1451_v39  ;;  %1739 = vpow2.f32 %v827_v40  ;;  %v866_v48 = vpack.c.bf16 %v854_v43, %v853_v38  ;;  %v829_v49 = vmul.f32 1.442695, %v798_v45 }
 0x134   : > { %1741 = vpow2.f32 %v823_v44  ;;  %v865_v50 = vpack.c.bf16 %v852_v46, %v851_v42  ;;  %v825_v52 = vmul.f32 1.442695, %v796_v47  ;;  %vm780_vm15 = vcmp.gt.f32.partialorder %v704_v41, 0.0 }
 0x135   : > { %v1732_v51 = vpop.eup %1731  ;;  %1550 = vst [vmem:[%s1991_s21 + $0x18] sm:$0xff] %v866_v48   ;;  %1743 = vpow2.f32 %v829_v49 }
 0x136   : > { %v1734_v53 = vpop.eup %1733  ;;  %v1456_v55 = vadd.f32 -1.0, %v1732_v51  ;;  %1549 = vst [vmem:[%s1991_s21 + $0x10] sm:$0xff] %v865_v50   ;;  %1639 = vmatprep.mubr.bf16.mxu1 %v865_v50  ;;  %1745 = vpow2.f32 %v825_v52 }
 0x137   : > { %v1736_v54 = vpop.eup %1735  ;;  %v1454_v56 = vadd.f32 -1.0, %v1734_v53  ;;  %1640 = vmatmul.mubr.bf16.gmra.mrb[4].mxu1 %v866_v48 }
 0x138   : > { %v1738_v57 = vpop.eup %1737  ;;  %v1457_v58 = vadd.f32 -1.0, %v1736_v54  ;;  %v857_v60 = vsel %vm777_vm8, %v1974_v3, %v1456_v55 }
 0x139   : > { %v1455_v59 = vadd.f32 -1.0, %v1738_v57  ;;  %v855_v62 = vsel %vm775_vm10, %v1977_v6, %v1454_v56 }
 0x13a   : > { %v858_v61 = vsel %vm778_vm9, %v1980_v11, %v1457_v58 }
 0x13b   : > { %v856_v63 = vsel %vm776_vm11, %v1983_v14, %v1455_v59  ;;  %v868_v0 = vpack.c.bf16 %v858_v61, %v857_v60 }
 0x13c   : > { %v867_v1 = vpack.c.bf16 %v856_v63, %v855_v62 }
 0x13d   : > { %v1740_v2 = vpop.eup %1739  ;;  %1552 = vst [vmem:[%s1991_s21 + $0x28] sm:$0xff] %v868_v0  }
 0x13e   : > { %v1742_v4 = vpop.eup %1741  ;;  %1551 = vst [vmem:[%s1991_s21 + $0x20] sm:$0xff] %v867_v1   ;;  %1643 = vmatprep.mubr.bf16.mxu1 %v867_v1  ;;  %v1460_v5 = vadd.f32 -1.0, %v1740_v2 }
 0x13f   : > { %1644 = vmatmul.mubr.bf16.gmra.mrb[8].mxu1 %v868_v0  ;;  %v1744_v3 = vpop.eup %1743  ;;  %v1458_v7 = vadd.f32 -1.0, %v1742_v4 }
 0x140   : > { %v1746_v8 = vpop.eup %1745  ;;  %v1461_v9 = vadd.f32 -1.0, %v1744_v3  ;;  %v861_v10 = vsel %vm781_vm12, %v1994_v29, %v1460_v5 }
 0x141   : > { %v1459_v6 = vadd.f32 -1.0, %v1746_v8  ;;  %v859_v12 = vsel %vm779_vm14, %v2000_v33, %v1458_v7 }
 0x142   : > { %v862_v11 = vsel %vm782_vm13, %v1618_v37, %v1461_v9 }
 0x143   : > { %v860_v13 = vsel %vm780_vm15, %v704_v41, %v1459_v6  ;;  %v870_v14 = vpack.c.bf16 %v862_v11, %v861_v10 }
 0x144   : > { %v869_v15 = vpack.c.bf16 %v860_v13, %v859_v12 }
 0x145   : > { %1554 = vst [vmem:[%s1991_s21 + $0x38] sm:$0xff] %v870_v14  }
 0x146   : > { %1553 = vst [vmem:[%s1991_s21 + $0x30] sm:$0xff] %v869_v15   ;;  %1647 = vmatprep.mubr.bf16.mxu1 %v869_v15 }
 0x147   : > { %1648 = vmatmul.mubr.bf16.gmra.mrb[12].mxu1 %v870_v14 }
 0x202   : > { %v1637_v17 = vpop.f32.mrb[0].mxu1 }
 0x203   : > { %v1057_v18 = vadd.f32 %v1637_v17, %v2031_v16  ;;  %v1048_v19 = vpop.f32.mrb[1].mxu1 }
 0x204   : > { %v1049_v20 = vadd.f32 %v2031_v16, %v1048_v19  ;;  %v1638_v21 = vpop.f32.mrb[2].mxu1 }
 0x205   : > { %1747 = vtanh.f32 %v1057_v18  ;;  %v1060_v22 = vadd.f32 %v1638_v21, %v2031_v16  ;;  %v1051_v23 = vpop.f32.mrb[3].mxu1 }
 0x206   : > { %1749 = vtanh.f32 %v1049_v20  ;;  %v1052_v24 = vadd.f32 %v2031_v16, %v1051_v23 }
 0x207   : > { %1751 = vtanh.f32 %v1060_v22 }
 0x208   : > { %1753 = vtanh.f32 %v1052_v24 }
 0x20a   : > { %v1641_v25 = vpop.f32.mrb[4].mxu1 }
 0x20b   : > { %v1073_v26 = vadd.f32 %v1641_v25, %v2031_v16  ;;  %v1064_v27 = vpop.f32.mrb[5].mxu1 }
 0x20c   : > { %v1065_v28 = vadd.f32 %v2031_v16, %v1064_v27  ;;  %v1642_v29 = vpop.f32.mrb[6].mxu1 }
 0x20d   : > { %1755 = vtanh.f32 %v1073_v26  ;;  %v1076_v30 = vadd.f32 %v1642_v29, %v2031_v16  ;;  %v1067_v31 = vpop.f32.mrb[7].mxu1 }
 0x20e   : > { %1757 = vtanh.f32 %v1065_v28  ;;  %v1068_v32 = vadd.f32 %v2031_v16, %v1067_v31 }
 0x20f   : > { %v1748_v33 = vpop.eup %1747  ;;  %1759 = vtanh.f32 %v1076_v30 }
 0x210   : > { %v1750_v34 = vpop.eup %1749  ;;  %1761 = vtanh.f32 %v1068_v32  ;;  %v1218_v46 = vmul.f32 %v1748_v33, %v2044_v35 }
 0x211   : > { %v1752_v36 = vpop.eup %1751  ;;  %v1216_v39 = vmul.f32 %v1750_v34, %v2044_v35 }
 0x212   : > { %v1754_v37 = vpop.eup %1753  ;;  %v1645_v38 = vpop.f32.mrb[8].mxu1  ;;  %v1219_v40 = vmul.f32 %v1752_v36, %v2044_v35 }
 0x213   : > { %v1217_v41 = vmul.f32 %v1754_v37, %v2044_v35  ;;  %v1089_v42 = vadd.f32 %v1645_v38, %v2031_v16  ;;  %v1080_v43 = vpop.f32.mrb[9].mxu1 }
 0x214   : > { %v1081_v44 = vadd.f32 %v2031_v16, %v1080_v43  ;;  %v1646_v45 = vpop.f32.mrb[10].mxu1  ;;  %v1235_v52 = vmul.f32 0.0, %v1219_v40 }
 0x215   : > { %v1248_v47 = vadd.f32 %v1217_v41, %v1216_v39  ;;  %1763 = vtanh.f32 %v1089_v42  ;;  %v1092_v48 = vadd.f32 %v1646_v45, %v2031_v16  ;;  %v1083_v49 = vpop.f32.mrb[11].mxu1 }
 0x216   : > { %1765 = vtanh.f32 %v1081_v44  ;;  %v1084_v50 = vadd.f32 %v2031_v16, %v1083_v49 }
 0x217   : > { %v1756_v51 = vpop.eup %1755  ;;  %v1249_v53 = vadd.f32 %v1248_v47, %v1218_v46  ;;  %1767 = vtanh.f32 %v1092_v48 }
 0x218   : > { %v1758_v55 = vpop.eup %1757  ;;  %1769 = vtanh.f32 %v1084_v50  ;;  %v1222_v59 = vmul.f32 %v1756_v51, %v2044_v35 }
 0x219   : > { %v1760_v54 = vpop.eup %1759  ;;  %v1220_v56 = vmul.f32 %v1758_v55, %v2044_v35  ;;  %v1250_v57 = vadd.f32 %v1249_v53, %v1235_v52 }
 0x21a   : > { %v1762_v58 = vpop.eup %1761  ;;  %v1649_v62 = vpop.f32.mrb[12].mxu1  ;;  %v1223_v2 = vmul.f32 %v1760_v54, %v2044_v35  ;;  %v1238_v6 = vmul.f32 0.0, %v1222_v59 }
 0x21b   : > { %v1236_v60 = vmul.f32 0.0, %v1220_v56  ;;  %v1221_v61 = vmul.f32 %v1762_v58, %v2044_v35  ;;  %v1105_v63 = vadd.f32 %v1649_v62, %v2031_v16  ;;  %v1096_v0 = vpop.f32.mrb[13].mxu1 }
 0x21c   : > { %v1097_v5 = vadd.f32 %v2031_v16, %v1096_v0  ;;  %v1650_v3 = vpop.f32.mrb[14].mxu1  ;;  %v1239_v14 = vmul.f32 0.0, %v1223_v2 }
 0x21d   : > { %v1251_v1 = vadd.f32 %v1250_v57, %v1236_v60  ;;  %v1237_v4 = vmul.f32 0.0, %v1221_v61  ;;  %1771 = vtanh.f32 %v1105_v63  ;;  %v1108_v7 = vadd.f32 %v1650_v3, %v2031_v16  ;;  %v1099_v8 = vpop.f32.mrb[15].mxu1 }
 0x21e   : > { %1773 = vtanh.f32 %v1097_v5  ;;  %v1100_v11 = vadd.f32 %v2031_v16, %v1099_v8 }
 0x21f   : > { %v1764_v9 = vpop.eup %1763  ;;  %v1252_v10 = vadd.f32 %v1251_v1, %v1237_v4  ;;  %1775 = vtanh.f32 %v1108_v7 }
 0x220   : > { %v1766_v12 = vpop.eup %1765  ;;  %1777 = vtanh.f32 %v1100_v11  ;;  %v1226_v19 = vmul.f32 %v1764_v9, %v2044_v35 }
 0x221   : > { %v1768_v13 = vpop.eup %1767  ;;  %v1253_v15 = vadd.f32 %v1252_v10, %v1238_v6  ;;  %v1224_v17 = vmul.f32 %v1766_v12, %v2044_v35 }
 0x222   : > { %v1770_v18 = vpop.eup %1769  ;;  %v1227_v24 = vmul.f32 %v1768_v13, %v2044_v35  ;;  %v1242_v16 = vmul.f32 0.0, %v1226_v19 }
 0x223   : > { %v1240_v20 = vmul.f32 0.0, %v1224_v17  ;;  %v1254_v21 = vadd.f32 %v1253_v15, %v1239_v14  ;;  %v1225_v22 = vmul.f32 %v1770_v18, %v2044_v35 }
 0x224   : > { %v1243_v29 = vmul.f32 0.0, %v1227_v24 }
 0x225   : > { %v1255_v23 = vadd.f32 %v1254_v21, %v1240_v20  ;;  %v1241_v25 = vmul.f32 0.0, %v1225_v22 }
 0x227   : > { %v1256_v26 = vadd.f32 %v1255_v23, %v1241_v25  ;;  %v1772_v27 = vpop.eup %1771 }
 0x228   : > { %v1774_v28 = vpop.eup %1773  ;;  %v1230_v36 = vmul.f32 %v1772_v27, %v2044_v35 }
 0x229   : > { %v1257_v30 = vadd.f32 %v1256_v26, %v1242_v16  ;;  %v1776_v31 = vpop.eup %1775  ;;  %v1228_v32 = vmul.f32 %v1774_v28, %v2044_v35 }
 0x22a   : > { %v1778_v33 = vpop.eup %1777  ;;  %v1231_v40 = vmul.f32 %v1776_v31, %v2044_v35  ;;  %v1246_v42 = vmul.f32 0.0, %v1230_v36 }
 0x22b   : > { %v1258_v34 = vadd.f32 %v1257_v30, %v1243_v29  ;;  %v1244_v37 = vmul.f32 0.0, %v1228_v32  ;;  %v1229_v38 = vmul.f32 %v1778_v33, %v2044_v35 }
 0x22c   : > { %v1247_v44 = vmul.f32 0.0, %v1231_v40 }
 0x22d   : > { %v1259_v39 = vadd.f32 %v1258_v34, %v1244_v37  ;;  %v1245_v41 = vmul.f32 0.0, %v1229_v38 }
 0x22f   : > { %v1260_v43 = vadd.f32 %v1259_v39, %v1245_v41 }
 0x231   : > { %v1261_v45 = vadd.f32 %v1260_v43, %v1246_v42 }
 0x233   : > { %v1262_v46 = vadd.f32 %v1261_v45, %v1247_v44 }
 0x235   : > { %v1263_v47 = vrot.slane %v1262_v46, 4 }
 0x237   : > { %v1264_v48 = vadd.f32 %v1263_v47, %v1262_v46 }
 0x239   : > { %v1265_v49 = vrot.slane %v1264_v48, 2 }
 0x23b   : > { %v1266_v50 = vadd.f32 %v1265_v49, %v1264_v48 }
 0x23d   : > { %v1267_v51 = vrot.slane %v1266_v50, 1 }
 0x23f   : > { %v1268_v52 = vadd.f32 %v1267_v51, %v1266_v50 }
 0x241   : > { %1269 = vst [vmem:[%s452_s9] sm:$0x1] %v1268_v52 }
 0x242 PF: > { %s17_s25 = sadd.s32 1, %s1817_s25   ;;  %s2096_s21 = smov %s1805_s22 }
 0x243   : > { %p14_p10 = scmp.ge.s32.totalorder %s17_s25, 4   ;;  %s2097_s22 = smov %s1889_s29 }
 0x244   : > { %s2098_s23 = smov %s1813_s24  ;;  %s2099_s24 = smov %s2101_s26 }
 0x245   :  { %16 = sbr.rel (!%p14_p10) target bundleno = 3 (0x3), region = 139 }

// kernel: from_hin_forward.11
= control target key start
LH: loop header
LB: loop body
LE: loop exit
PB: predicated region body
PF: predicated region fallthrough
CT: control target
= control target key end

     0   :  { %s1854_s21 = smov 0   ;;  %s1856_s22 = smov 0   ;;  %s2089_s0 = inlined_call_operand.vmem [shape: bf16[2,128,128], index: 0, kind: input, shape index: {}]   ;;  %s2090_s1 = inlined_call_operand.vmem [shape: bf16[128,256], index: 1, kind: input, shape index: {}]   ;;  %s2091_s2 = inlined_call_operand.vmem [shape: bf16[128,128], index: 2, kind: input, shape index: {}]   ;;  %s2092_s3 = inlined_call_operand.vmem [shape: f32[1,128], index: 3, kind: input, shape index: {}]   ;;  %s2093_s4 = inlined_call_operand.vmem [shape: f32[1,128], index: 4, kind: input, shape index: {}]   ;;  %s2094_s5 = inlined_call_operand.vmem [shape: bf16[2,128,128], index: 5, kind: output, shape index: {0}]   ;;  %s2095_s6 = inlined_call_operand.vmem [shape: f32[2,1,128], index: 6, kind: output, shape index: {1}]  }
   0x1   :  { %s1858_s23 = smov 0   ;;  %s1860_s24 = smov 0  }
   0x2   :  { %s1862_s25 = smov 0  }
   0x3 LB: > { %s36_s26 = sadd.s32 1, %s1813_s24  ;;  %p82_p1 = scmp.ne.s32.totalorder %s1805_s22, %s1801_s21  ;;  %s1817_s25 = sphi %s1862_s25, %s17_s25   ;;  %s1813_s24 = sphi %s1860_s24, %s2099_s24   ;;  %s1809_s23 = sphi %s1858_s23, %s2098_s23   ;;  %s1805_s22 = sphi %s1856_s22, %s2097_s22   ;;  %s1801_s21 = sphi %s1854_s21, %s2096_s21  }
   0x4   : > { %p38_p0 = scmp.ge.s32.totalorder %s36_s26, 2  ;;  %p83_p2 = scmp.eq.s32.totalorder %s1817_s25, 0 }
   0x5   : > { %s75_s28 = sadd.s32 1, %s1805_s22  ;;  %p1421_p5 = scmp.ge.s32.totalorder %s1817_s25, 2 }
   0x6   : > { %s2101_s26 = smov (%p38_p0, %s36_s26), 0  ;;  %p84_p3 = por %p83_p2, %p82_p1 }
   0x7   : > { %s71_s27 = ssub.s32 %s1813_s24, %s2101_s26  ;;  %236 = sbr.rel (%p1421_p5) target bundleno = 28 (0x1c), region = 28 }
   0x8   : > { %p73_p4 = scmp.eq.s32.totalorder %s71_s27, 0 }
   0xa   : > { %s1889_s29 = scalar_select %p73_p4, %s1805_s22, %s75_s28  }
   0xe   : > { %255 = sbr.rel (!%p84_p3) target bundleno = 28 (0x1c), region = 36  ;;  %s257_s30 = sand.u32 (%p84_p3), 1, %s1805_s22  }
   0xf   : > { %s1423_s7 = sshll.u32 (%p84_p3), %s1813_s24, 2  ;;  %s1422_s8 = sshll.u32 (%p84_p3), %s257_s30, 6 }
  0x10   : > { %s1897_s11 = scalar_lea.vmem (%p84_p3), %s2090_s1, %s1423_s7  ;;  %s259_s12 = scalar_lea.vmem (%p84_p3), [#allocation3], %s1422_s8 }
  0x11   : > { %v280_v0 = vld [vmem:[%s1897_s11] sm:$0xf] (%p84_p3)  ;;  %v282_v1 = vld [vmem:[%s1897_s11 + $0x8] sm:$0xf] (%p84_p3)  ;;  %v284_v2 = vld [vmem:[%s1897_s11 + $0x10] sm:$0xf] (%p84_p3) }
  0x12   : > { %281 = vst [vmem:[%s259_s12] sm:$0xf] (%p84_p3), %v280_v0  ;;  %283 = vst [vmem:[%s259_s12 + $0x4] sm:$0xf] (%p84_p3), %v282_v1  ;;  %v286_v3 = vld [vmem:[%s1897_s11 + $0x18] sm:$0xf] (%p84_p3) }
  0x13   : > { %v288_v4 = vld [vmem:[%s1897_s11 + $0x20] sm:$0xf] (%p84_p3)  ;;  %285 = vst [vmem:[%s259_s12 + $0x8] sm:$0xf] (%p84_p3), %v284_v2  ;;  %287 = vst [vmem:[%s259_s12 + $0xc] sm:$0xf] (%p84_p3), %v286_v3 }
  0x14   : > { %289 = vst [vmem:[%s259_s12 + $0x10] sm:$0xf] (%p84_p3), %v288_v4  ;;  %v290_v5 = vld [vmem:[%s1897_s11 + $0x28] sm:$0xf] (%p84_p3)  ;;  %v292_v6 = vld [vmem:[%s1897_s11 + $0x30] sm:$0xf] (%p84_p3) }
  0x15   : > { %v294_v7 = vld [vmem:[%s1897_s11 + $0x38] sm:$0xf]  ;;  %291 = vst [vmem:[%s259_s12 + $0x14] sm:$0xf] %v290_v5  ;;  %293 = vst [vmem:[%s259_s12 + $0x18] sm:$0xf] %v292_v6 }
  0x16   : > { %295 = vst [vmem:[%s259_s12 + $0x1c] sm:$0xf] %v294_v7  ;;  %v296_v8 = vld [vmem:[%s1897_s11 + $0x40] sm:$0xf]  ;;  %v298_v9 = vld [vmem:[%s1897_s11 + $0x48] sm:$0xf] }
  0x17   : > { %v300_v10 = vld [vmem:[%s1897_s11 + $0x50] sm:$0xf]  ;;  %297 = vst [vmem:[%s259_s12 + $0x20] sm:$0xf] %v296_v8  ;;  %299 = vst [vmem:[%s259_s12 + $0x24] sm:$0xf] %v298_v9 }
  0x18   : > { %301 = vst [vmem:[%s259_s12 + $0x28] sm:$0xf] %v300_v10  ;;  %v302_v11 = vld [vmem:[%s1897_s11 + $0x58] sm:$0xf]  ;;  %v304_v12 = vld [vmem:[%s1897_s11 + $0x60] sm:$0xf] }
  0x19   : > { %v306_v13 = vld [vmem:[%s1897_s11 + $0x68] sm:$0xf]  ;;  %303 = vst [vmem:[%s259_s12 + $0x2c] sm:$0xf] %v302_v11  ;;  %305 = vst [vmem:[%s259_s12 + $0x30] sm:$0xf] %v304_v12 }
  0x1a   : > { %307 = vst [vmem:[%s259_s12 + $0x34] sm:$0xf] %v306_v13  ;;  %v308_v14 = vld [vmem:[%s1897_s11 + $0x70] sm:$0xf]  ;;  %v310_v15 = vld [vmem:[%s1897_s11 + $0x78] sm:$0xf] }
  0x1b   : > { %309 = vst [vmem:[%s259_s12 + $0x38] sm:$0xf] %v308_v14  ;;  %311 = vst [vmem:[%s259_s12 + $0x3c] sm:$0xf] %v310_v15 }
  0x1c PF: > { %p1424_p6 = scmp.ge.s32.totalorder %s1817_s25, 1  ;;  %p365_p7 = scmp.lt.s32.totalorder %s1817_s25, 3 }
  0x1e   : > { %p366_p8 = pnand %p1424_p6, %p365_p7 }
  0x1f   : > { %s372_s13 = sand.u32 (!%p366_p8), 1, %s1801_s21   ;;  %p424_p9 = scmp.lt.s32.totalorder (!%p366_p8), %s1809_s23, 1  ;;  %v1707_v16 = vld [vmem:[%s2091_s2] sm:$0xff] (!%p366_p8)   ;;  %v1708_v17 = vld [vmem:[%s2091_s2 + $0x8] sm:$0xff] (!%p366_p8)   ;;  %v1709_v34 = vld [vmem:[%s2091_s2 + $0x10] sm:$0xff] (!%p366_p8)  }
  0x20   : > { %369 = sbr.rel (%p366_p8) target bundleno = 578 (0x242), region = 77  ;;  %s1425_s14 = sshll.u32 (!%p366_p8), %s372_s13, 6  ;;  %1619 = vmatprep.subr.bf16.mxu1 (!%p366_p8), %v1707_v16  ;;  %v1710_v35 = vld [vmem:[%s2091_s2 + $0x18] sm:$0xff] (!%p366_p8)   ;;  %v1711_v36 = vld [vmem:[%s2091_s2 + $0x20] sm:$0xff] (!%p366_p8)   ;;  %v1712_v37 = vld [vmem:[%s2091_s2 + $0x28] sm:$0xff] (!%p366_p8)  }
  0x21   : > { %s374_s19 = scalar_lea.vmem (!%p366_p8), [#allocation3], %s1425_s14  ;;  %1620 = vmatpush3.bf16.msra.mxu1 (!%p366_p8), %v1707_v16  ;;  %v1713_v38 = vld [vmem:[%s2091_s2 + $0x30] sm:$0xff] (!%p366_p8)   ;;  %v1714_v39 = vld [vmem:[%s2091_s2 + $0x38] sm:$0xff] (!%p366_p8)  }
  0x22   : > { %v1691_v18 = vld [vmem:[%s374_s19] sm:$0xff] (!%p366_p8)   ;;  %v1692_v19 = vld [vmem:[%s374_s19 + $0x8] sm:$0xff] (!%p366_p8)   ;;  %1621 = vmatprep.subr.bf16.mxu1 (!%p366_p8), %v1708_v17  ;;  %v1693_v20 = vld [vmem:[%s374_s19 + $0x10] sm:$0xff] (!%p366_p8)  }
  0x23   : > { %1587 = vmatprep.subr.bf16.mxu0 (!%p366_p8), %v1691_v18  ;;  %v1694_v21 = vld [vmem:[%s374_s19 + $0x18] sm:$0xff] (!%p366_p8)   ;;  %v1695_v23 = vld [vmem:[%s374_s19 + $0x20] sm:$0xff] (!%p366_p8)   ;;  %v1696_v24 = vld [vmem:[%s374_s19 + $0x28] sm:$0xff] (!%p366_p8)  }
  0x24   : > { %1588 = vmatpush3.bf16.msra.mxu0 (!%p366_p8), %v1691_v18  ;;  %v1697_v25 = vld [vmem:[%s374_s19 + $0x30] sm:$0xff] (!%p366_p8)   ;;  %v1698_v26 = vld [vmem:[%s374_s19 + $0x38] sm:$0xff] (!%p366_p8)  }
  0x25   : > { %1589 = vmatprep.subr.bf16.mxu0 (!%p366_p8), %v1692_v19  ;;  %1622 = vmatpush3.bf16.msra.mxu1 (!%p366_p8), %v1708_v17 }
  0x26   : > { %1623 = vmatprep.subr.bf16.mxu1 (!%p366_p8), %v1709_v34 }
  0x27   : > { %s2103_s23 = smov (!%p424_p9, %s1809_s23), 1 }
  0x28   : > { %s1490_s20 = sshll.u32 %s2103_s23, 6  ;;  %1590 = vmatpush3.bf16.msra.mxu0 %v1692_v19  ;;  %s452_s9 = scalar_lea.vmem %s2095_s6, %s2103_s23 }
  0x29   : > { %s1934_s28 = scalar_lea.vmem %s2089_s0, %s1490_s20  ;;  %1591 = vmatprep.subr.bf16.mxu0 %v1693_v20  ;;  %1624 = vmatpush3.bf16.msra.mxu1 %v1709_v34  ;;  %s1991_s21 = scalar_lea.vmem %s2094_s5, %s1490_s20 }
  0x2a   : > { %v1699_v22 = vld [vmem:[%s1934_s28] sm:$0xff]   ;;  %v1700_v27 = vld [vmem:[%s1934_s28 + $0x8] sm:$0xff]   ;;  %v1701_v28 = vld [vmem:[%s1934_s28 + $0x10] sm:$0xff]   ;;  %1625 = vmatprep.subr.bf16.mxu1 %v1710_v35 }
  0x2b   : > { %1603 = vmatprep.mubr.bf16.mxu0 %v1699_v22  ;;  %v1702_v29 = vld [vmem:[%s1934_s28 + $0x18] sm:$0xff]   ;;  %v1703_v30 = vld [vmem:[%s1934_s28 + $0x20] sm:$0xff]   ;;  %v1704_v31 = vld [vmem:[%s1934_s28 + $0x28] sm:$0xff]  }
  0x2c   : > { %1592 = vmatpush3.bf16.msra.mxu0 %v1693_v20  ;;  %v1705_v32 = vld [vmem:[%s1934_s28 + $0x30] sm:$0xff]   ;;  %v1706_v33 = vld [vmem:[%s1934_s28 + $0x38] sm:$0xff]  }
  0x2d   : > { %1593 = vmatprep.subr.bf16.mxu0 %v1694_v21  ;;  %1626 = vmatpush3.bf16.msra.mxu1 %v1710_v35 }
  0x2e   : > { %1627 = vmatprep.subr.bf16.mxu1 %v1711_v36 }
  0x30   : > { %1594 = vmatpush3.bf16.msra.mxu0 %v1694_v21 }
  0x31   : > { %1595 = vmatprep.subr.bf16.mxu0 %v1695_v23  ;;  %1628 = vmatpush3.bf16.msra.mxu1 %v1711_v36 }
  0x32   : > { %1629 = vmatprep.subr.bf16.mxu1 %v1712_v37 }
  0x34   : > { %1596 = vmatpush3.bf16.msra.mxu0 %v1695_v23 }
  0x35   : > { %1597 = vmatprep.subr.bf16.mxu0 %v1696_v24  ;;  %1630 = vmatpush3.bf16.msra.mxu1 %v1712_v37 }
  0x36   : > { %1631 = vmatprep.subr.bf16.mxu1 %v1713_v38 }
  0x38   : > { %1598 = vmatpush3.bf16.msra.mxu0 %v1696_v24 }
  0x39   : > { %1599 = vmatprep.subr.bf16.mxu0 %v1697_v25  ;;  %1632 = vmatpush3.bf16.msra.mxu1 %v1713_v38 }
  0x3a   : > { %1633 = vmatprep.subr.bf16.mxu1 %v1714_v39 }
  0x3c   : > { %1600 = vmatpush3.bf16.msra.mxu0 %v1697_v25 }
  0x3d   : > { %1601 = vmatprep.subr.bf16.mxu0 %v1698_v26  ;;  %1634 = vmatpush3.bf16.msra.mxu1 %v1714_v39 }
  0x40   : > { %1602 = vmatpush3.bf16.msra.mxu0 %v1698_v26 }
  0x43   : > { %1604 = vmatmul.mubr.bf16.vlgmr.msra.gmra.mrb[0].mxu0 %v1700_v27 }
  0x44   : > { %1607 = vmatprep.mubr.bf16.mxu0 %v1701_v28 }
  0x4b   : > { %1608 = vmatmul.mubr.bf16.gmra.mrb[4].mxu0 %v1702_v29 }
  0x4c   : > { %1611 = vmatprep.mubr.bf16.mxu0 %v1703_v30 }
  0x53   : > { %1612 = vmatmul.mubr.bf16.gmra.mrb[8].mxu0 %v1704_v31 }
  0x54   : > { %1615 = vmatprep.mubr.bf16.mxu0 %v1705_v32 }
  0x5b   : > { %1616 = vmatmul.mubr.bf16.gmra.mrb[12].mxu0 %v1706_v33 }
 0x116   : > { %v1605_v40 = vpop.f32.mrb[0].mxu0 }
 0x117   : > { %v785_v41 = vmin.f32 %v1605_v40, 0.0  ;;  %v653_v42 = vpop.f32.mrb[1].mxu0  ;;  %vm769_vm0 = vcmp.gt.f32.partialorder %v1605_v40, 0.0 }
 0x118   : > { %v783_v43 = vmin.f32 %v653_v42, 0.0  ;;  %v1606_v44 = vpop.f32.mrb[2].mxu0  ;;  %vm767_vm1 = vcmp.gt.f32.partialorder %v653_v42, 0.0 }
 0x119   : > { %v803_v45 = vmul.f32 1.442695, %v785_v41  ;;  %v786_v46 = vmin.f32 %v1606_v44, 0.0  ;;  %v656_v47 = vpop.f32.mrb[3].mxu0  ;;  %vm770_vm2 = vcmp.gt.f32.partialorder %v1606_v44, 0.0 }
 0x11a   : > { %v799_v48 = vmul.f32 1.442695, %v783_v43  ;;  %v784_v49 = vmin.f32 %v656_v47, 0.0  ;;  %vm768_vm3 = vcmp.gt.f32.partialorder %v656_v47, 0.0 }
 0x11b   : > { %1715 = vpow2.f32 %v803_v45  ;;  %v805_v50 = vmul.f32 1.442695, %v786_v46 }
 0x11c   : > { %1717 = vpow2.f32 %v799_v48  ;;  %v801_v51 = vmul.f32 1.442695, %v784_v49 }
 0x11d   : > { %1719 = vpow2.f32 %v805_v50 }
 0x11e   : > { %1721 = vpow2.f32 %v801_v51  ;;  %v1962_v52 = vpop.f32.mrb[4].mxu0 }
 0x11f   : > { %v789_v53 = vmin.f32 %v1962_v52, 0.0  ;;  %v1965_v54 = vpop.f32.mrb[5].mxu0  ;;  %vm773_vm4 = vcmp.gt.f32.partialorder %v1962_v52, 0.0 }
 0x120   : > { %v787_v55 = vmin.f32 %v1965_v54, 0.0  ;;  %v1968_v56 = vpop.f32.mrb[6].mxu0  ;;  %vm771_vm5 = vcmp.gt.f32.partialorder %v1965_v54, 0.0 }
 0x121   : > { %v811_v57 = vmul.f32 1.442695, %v789_v53  ;;  %v790_v58 = vmin.f32 %v1968_v56, 0.0  ;;  %v1971_v59 = vpop.f32.mrb[7].mxu0  ;;  %vm774_vm6 = vcmp.gt.f32.partialorder %v1968_v56, 0.0 }
 0x122   : > { %v807_v60 = vmul.f32 1.442695, %v787_v55  ;;  %v788_v61 = vmin.f32 %v1971_v59, 0.0  ;;  %vm772_vm7 = vcmp.gt.f32.partialorder %v1971_v59, 0.0 }
 0x123   : > { %1723 = vpow2.f32 %v811_v57  ;;  %v813_v62 = vmul.f32 1.442695, %v790_v58 }
 0x124   : > { %1725 = vpow2.f32 %v807_v60  ;;  %v809_v63 = vmul.f32 1.442695, %v788_v61 }
 0x125   : > { %v1716_v0 = vpop.eup %1715  ;;  %1727 = vpow2.f32 %v813_v62 }
 0x126   : > { %v1718_v1 = vpop.eup %1717  ;;  %v1448_v2 = vadd.f32 -1.0, %v1716_v0  ;;  %1729 = vpow2.f32 %v809_v63  ;;  %v1974_v3 = vpop.f32.mrb[8].mxu0 }
 0x127   : > { %v1720_v4 = vpop.eup %1719  ;;  %v793_v5 = vmin.f32 %v1974_v3, 0.0  ;;  %v1977_v6 = vpop.f32.mrb[9].mxu0  ;;  %v1446_v7 = vadd.f32 -1.0, %v1718_v1  ;;  %vm777_vm8 = vcmp.gt.f32.partialorder %v1974_v3, 0.0 }
 0x128   : > { %v1722_v8 = vpop.eup %1721  ;;  %v1449_v9 = vadd.f32 -1.0, %v1720_v4  ;;  %v791_v10 = vmin.f32 %v1977_v6, 0.0  ;;  %v1980_v11 = vpop.f32.mrb[10].mxu0  ;;  %v849_v16 = vsel %vm769_vm0, %v1605_v40, %v1448_v2  ;;  %vm775_vm10 = vcmp.gt.f32.partialorder %v1977_v6, 0.0 }
 0x129   : > { %v819_v12 = vmul.f32 1.442695, %v793_v5  ;;  %v794_v13 = vmin.f32 %v1980_v11, 0.0  ;;  %v1983_v14 = vpop.f32.mrb[11].mxu0  ;;  %v1447_v15 = vadd.f32 -1.0, %v1722_v8  ;;  %v847_v21 = vsel %vm767_vm1, %v653_v42, %v1446_v7 }
 0x12a   : > { %v850_v17 = vsel %vm770_vm2, %v1606_v44, %v1449_v9  ;;  %v815_v18 = vmul.f32 1.442695, %v791_v10  ;;  %v792_v19 = vmin.f32 %v1983_v14, 0.0  ;;  %vm778_vm9 = vcmp.gt.f32.partialorder %v1980_v11, 0.0 }
 0x12b   : > { %1731 = vpow2.f32 %v819_v12  ;;  %v821_v20 = vmul.f32 1.442695, %v794_v13  ;;  %v848_v22 = vsel %vm768_vm3, %v656_v47, %v1447_v15  ;;  %v864_v25 = vpack.c.bf16 %v850_v17, %v849_v16  ;;  %v2031_v16 = vld [vmem:[%s2092_s3] ss:$0 sm:$0xff] }
 0x12c   : > { %1733 = vpow2.f32 %v815_v18  ;;  %v817_v23 = vmul.f32 1.442695, %v792_v19  ;;  %v863_v24 = vpack.c.bf16 %v848_v22, %v847_v21  ;;  %vm776_vm11 = vcmp.gt.f32.partialorder %v1983_v14, 0.0 }
 0x12d   : > { %v1724_v26 = vpop.eup %1723  ;;  %1735 = vpow2.f32 %v821_v20  ;;  %1548 = vst [vmem:[%s1991_s21 + $0x8] sm:$0xff] %v864_v25  }
 0x12e   : > { %v1726_v27 = vpop.eup %1725  ;;  %v1452_v28 = vadd.f32 -1.0, %v1724_v26  ;;  %1737 = vpow2.f32 %v817_v23  ;;  %v1994_v29 = vpop.f32.mrb[12].mxu0  ;;  %1512 = vst [vmem:[%s1991_s21] sm:$0xff] %v863_v24   ;;  %1635 = vmatprep.mubr.bf16.mxu1 %v863_v24 }
 0x12f   : > { %v1728_v30 = vpop.eup %1727  ;;  %v1450_v31 = vadd.f32 -1.0, %v1726_v27  ;;  %v797_v32 = vmin.f32 %v1994_v29, 0.0  ;;  %v2000_v33 = vpop.f32.mrb[13].mxu0  ;;  %1636 = vmatmul.mubr.bf16.vlgmr.msra.gmra.mrb[0].mxu1 %v864_v25  ;;  %vm781_vm12 = vcmp.gt.f32.partialorder %v1994_v29, 0.0 }
 0x130   : > { %v1730_v34 = vpop.eup %1729  ;;  %v1453_v35 = vadd.f32 -1.0, %v1728_v30  ;;  %v795_v36 = vmin.f32 %v2000_v33, 0.0  ;;  %v1618_v37 = vpop.f32.mrb[14].mxu0  ;;  %v853_v38 = vsel %vm773_vm4, %v1962_v52, %v1452_v28  ;;  %vm779_vm14 = vcmp.gt.f32.partialorder %v2000_v33, 0.0 }
 0x131   : > { %v1451_v39 = vadd.f32 -1.0, %v1730_v34  ;;  %v827_v40 = vmul.f32 1.442695, %v797_v32  ;;  %v704_v41 = vpop.f32.mrb[15].mxu0  ;;  %v851_v42 = vsel %vm771_vm5, %v1965_v54, %v1450_v31  ;;  %v798_v45 = vmin.f32 %v1618_v37, 0.0 }
 0x132   : > { %v854_v43 = vsel %vm774_vm6, %v1968_v56, %v1453_v35  ;;  %v823_v44 = vmul.f32 1.442695, %v795_v36  ;;  %v796_v47 = vmin.f32 %v704_v41, 0.0  ;;  %vm782_vm13 = vcmp.gt.f32.partialorder %v1618_v37, 0.0  ;;  %v2043_v32 = vld [vmem:[%s2093_s4] ss:$0 sm:$0xff] }
 0x133   : > { %v852_v46 = vsel %vm772_vm7, %v1971_v59, %v1451_v39  ;;  %1739 = vpow2.f32 %v827_v40  ;;  %v866_v48 = vpack.c.bf16 %v854_v43, %v853_v38  ;;  %v829_v49 = vmul.f32 1.442695, %v798_v45 }
 0x134   : > { %1741 = vpow2.f32 %v823_v44  ;;  %v865_v50 = vpack.c.bf16 %v852_v46, %v851_v42  ;;  %v825_v52 = vmul.f32 1.442695, %v796_v47  ;;  %vm780_vm15 = vcmp.gt.f32.partialorder %v704_v41, 0.0 }
 0x135   : > { %v1732_v51 = vpop.eup %1731  ;;  %1550 = vst [vmem:[%s1991_s21 + $0x18] sm:$0xff] %v866_v48   ;;  %1743 = vpow2.f32 %v829_v49 }
 0x136   : > { %v1734_v53 = vpop.eup %1733  ;;  %v1456_v55 = vadd.f32 -1.0, %v1732_v51  ;;  %1549 = vst [vmem:[%s1991_s21 + $0x10] sm:$0xff] %v865_v50   ;;  %1639 = vmatprep.mubr.bf16.mxu1 %v865_v50  ;;  %1745 = vpow2.f32 %v825_v52 }
 0x137   : > { %v1736_v54 = vpop.eup %1735  ;;  %v1454_v56 = vadd.f32 -1.0, %v1734_v53  ;;  %1640 = vmatmul.mubr.bf16.gmra.mrb[4].mxu1 %v866_v48 }
 0x138   : > { %v1738_v57 = vpop.eup %1737  ;;  %v1457_v58 = vadd.f32 -1.0, %v1736_v54  ;;  %v857_v60 = vsel %vm777_vm8, %v1974_v3, %v1456_v55 }
 0x139   : > { %v1455_v59 = vadd.f32 -1.0, %v1738_v57  ;;  %v855_v62 = vsel %vm775_vm10, %v1977_v6, %v1454_v56 }
 0x13a   : > { %v858_v61 = vsel %vm778_vm9, %v1980_v11, %v1457_v58 }
 0x13b   : > { %v856_v63 = vsel %vm776_vm11, %v1983_v14, %v1455_v59  ;;  %v868_v0 = vpack.c.bf16 %v858_v61, %v857_v60 }
 0x13c   : > { %v867_v1 = vpack.c.bf16 %v856_v63, %v855_v62 }
 0x13d   : > { %v1740_v2 = vpop.eup %1739  ;;  %1552 = vst [vmem:[%s1991_s21 + $0x28] sm:$0xff] %v868_v0  }
 0x13e   : > { %v1742_v4 = vpop.eup %1741  ;;  %1551 = vst [vmem:[%s1991_s21 + $0x20] sm:$0xff] %v867_v1   ;;  %1643 = vmatprep.mubr.bf16.mxu1 %v867_v1  ;;  %v1460_v5 = vadd.f32 -1.0, %v1740_v2 }
 0x13f   : > { %1644 = vmatmul.mubr.bf16.gmra.mrb[8].mxu1 %v868_v0  ;;  %v1744_v3 = vpop.eup %1743  ;;  %v1458_v7 = vadd.f32 -1.0, %v1742_v4 }
 0x140   : > { %v1746_v8 = vpop.eup %1745  ;;  %v1461_v9 = vadd.f32 -1.0, %v1744_v3  ;;  %v861_v10 = vsel %vm781_vm12, %v1994_v29, %v1460_v5 }
 0x141   : > { %v1459_v6 = vadd.f32 -1.0, %v1746_v8  ;;  %v859_v12 = vsel %vm779_vm14, %v2000_v33, %v1458_v7 }
 0x142   : > { %v862_v11 = vsel %vm782_vm13, %v1618_v37, %v1461_v9 }
 0x143   : > { %v860_v13 = vsel %vm780_vm15, %v704_v41, %v1459_v6  ;;  %v870_v14 = vpack.c.bf16 %v862_v11, %v861_v10 }
 0x144   : > { %v869_v15 = vpack.c.bf16 %v860_v13, %v859_v12 }
 0x145   : > { %1554 = vst [vmem:[%s1991_s21 + $0x38] sm:$0xff] %v870_v14  }
 0x146   : > { %1553 = vst [vmem:[%s1991_s21 + $0x30] sm:$0xff] %v869_v15   ;;  %1647 = vmatprep.mubr.bf16.mxu1 %v869_v15 }
 0x147   : > { %1648 = vmatmul.mubr.bf16.gmra.mrb[12].mxu1 %v870_v14 }
 0x202   : > { %v1637_v17 = vpop.f32.mrb[0].mxu1 }
 0x203   : > { %v1057_v18 = vadd.f32 %v1637_v17, %v2031_v16  ;;  %v1048_v19 = vpop.f32.mrb[1].mxu1 }
 0x204   : > { %v1049_v20 = vadd.f32 %v2031_v16, %v1048_v19  ;;  %v1638_v21 = vpop.f32.mrb[2].mxu1 }
 0x205   : > { %1747 = vtanh.f32 %v1057_v18  ;;  %v1060_v22 = vadd.f32 %v1638_v21, %v2031_v16  ;;  %v1051_v23 = vpop.f32.mrb[3].mxu1 }
 0x206   : > { %1749 = vtanh.f32 %v1049_v20  ;;  %v1052_v24 = vadd.f32 %v2031_v16, %v1051_v23 }
 0x207   : > { %1751 = vtanh.f32 %v1060_v22 }
 0x208   : > { %1753 = vtanh.f32 %v1052_v24 }
 0x20a   : > { %v1641_v25 = vpop.f32.mrb[4].mxu1 }
 0x20b   : > { %v1073_v26 = vadd.f32 %v1641_v25, %v2031_v16  ;;  %v1064_v27 = vpop.f32.mrb[5].mxu1 }
 0x20c   : > { %v1065_v28 = vadd.f32 %v2031_v16, %v1064_v27  ;;  %v1642_v29 = vpop.f32.mrb[6].mxu1 }
 0x20d   : > { %1755 = vtanh.f32 %v1073_v26  ;;  %v1076_v30 = vadd.f32 %v1642_v29, %v2031_v16  ;;  %v1067_v31 = vpop.f32.mrb[7].mxu1 }
 0x20e   : > { %1757 = vtanh.f32 %v1065_v28  ;;  %v1068_v33 = vadd.f32 %v2031_v16, %v1067_v31 }
 0x20f   : > { %v1748_v34 = vpop.eup %1747  ;;  %1759 = vtanh.f32 %v1076_v30 }
 0x210   : > { %v1750_v35 = vpop.eup %1749  ;;  %1761 = vtanh.f32 %v1068_v33  ;;  %v1218_v37 = vmul.f32 %v1748_v34, %v2043_v32 }
 0x211   : > { %v1752_v36 = vpop.eup %1751  ;;  %v1216_v40 = vmul.f32 %v1750_v35, %v2043_v32 }
 0x212   : > { %v1754_v38 = vpop.eup %1753  ;;  %v1645_v39 = vpop.f32.mrb[8].mxu1  ;;  %v1219_v41 = vmul.f32 %v1752_v36, %v2043_v32  ;;  %v1234_v47 = vmul.f32 0.0, %v1218_v37 }
 0x213   : > { %v1217_v42 = vmul.f32 %v1754_v38, %v2043_v32  ;;  %v1089_v43 = vadd.f32 %v1645_v39, %v2031_v16  ;;  %v1080_v44 = vpop.f32.mrb[9].mxu1 }
 0x214   : > { %v1081_v45 = vadd.f32 %v2031_v16, %v1080_v44  ;;  %v1646_v46 = vpop.f32.mrb[10].mxu1  ;;  %v1235_v53 = vmul.f32 0.0, %v1219_v41 }
 0x215   : > { %v1248_v48 = vadd.f32 %v1217_v42, %v1216_v40  ;;  %1763 = vtanh.f32 %v1089_v43  ;;  %v1092_v49 = vadd.f32 %v1646_v46, %v2031_v16  ;;  %v1083_v50 = vpop.f32.mrb[11].mxu1 }
 0x216   : > { %1765 = vtanh.f32 %v1081_v45  ;;  %v1084_v51 = vadd.f32 %v2031_v16, %v1083_v50 }
 0x217   : > { %v1756_v52 = vpop.eup %1755  ;;  %v1249_v55 = vadd.f32 %v1248_v48, %v1234_v47  ;;  %1767 = vtanh.f32 %v1092_v49 }
 0x218   : > { %v1758_v54 = vpop.eup %1757  ;;  %1769 = vtanh.f32 %v1084_v51  ;;  %v1222_v60 = vmul.f32 %v1756_v52, %v2043_v32 }
 0x219   : > { %v1760_v56 = vpop.eup %1759  ;;  %v1220_v57 = vmul.f32 %v1758_v54, %v2043_v32  ;;  %v1250_v58 = vadd.f32 %v1249_v55, %v1235_v53 }
 0x21a   : > { %v1762_v59 = vpop.eup %1761  ;;  %v1649_v63 = vpop.f32.mrb[12].mxu1  ;;  %v1223_v4 = vmul.f32 %v1760_v56, %v2043_v32  ;;  %v1238_v10 = vmul.f32 0.0, %v1222_v60 }
 0x21b   : > { %v1236_v61 = vmul.f32 0.0, %v1220_v57  ;;  %v1221_v62 = vmul.f32 %v1762_v59, %v2043_v32  ;;  %v1105_v0 = vadd.f32 %v1649_v63, %v2031_v16  ;;  %v1096_v1 = vpop.f32.mrb[13].mxu1 }
 0x21c   : > { %v1097_v3 = vadd.f32 %v2031_v16, %v1096_v1  ;;  %v1650_v7 = vpop.f32.mrb[14].mxu1  ;;  %v1239_v15 = vmul.f32 0.0, %v1223_v4 }
 0x21d   : > { %v1251_v2 = vadd.f32 %v1250_v58, %v1236_v61  ;;  %v1237_v5 = vmul.f32 0.0, %v1221_v62  ;;  %1771 = vtanh.f32 %v1105_v0  ;;  %v1108_v8 = vadd.f32 %v1650_v7, %v2031_v16  ;;  %v1099_v9 = vpop.f32.mrb[15].mxu1 }
 0x21e   : > { %1773 = vtanh.f32 %v1097_v3  ;;  %v1100_v12 = vadd.f32 %v2031_v16, %v1099_v9 }
 0x21f   : > { %v1764_v6 = vpop.eup %1763  ;;  %v1252_v11 = vadd.f32 %v1251_v2, %v1237_v5  ;;  %1775 = vtanh.f32 %v1108_v8 }
 0x220   : > { %v1766_v13 = vpop.eup %1765  ;;  %1777 = vtanh.f32 %v1100_v12  ;;  %v1226_v20 = vmul.f32 %v1764_v6, %v2043_v32 }
 0x221   : > { %v1768_v14 = vpop.eup %1767  ;;  %v1253_v17 = vadd.f32 %v1252_v11, %v1238_v10  ;;  %v1224_v18 = vmul.f32 %v1766_v13, %v2043_v32 }
 0x222   : > { %v1770_v19 = vpop.eup %1769  ;;  %v1227_v25 = vmul.f32 %v1768_v14, %v2043_v32  ;;  %v1242_v16 = vmul.f32 0.0, %v1226_v20 }
 0x223   : > { %v1240_v21 = vmul.f32 0.0, %v1224_v18  ;;  %v1254_v22 = vadd.f32 %v1253_v17, %v1239_v15  ;;  %v1225_v23 = vmul.f32 %v1770_v19, %v2043_v32 }
 0x224   : > { %v1243_v30 = vmul.f32 0.0, %v1227_v25 }
 0x225   : > { %v1255_v24 = vadd.f32 %v1254_v22, %v1240_v21  ;;  %v1241_v26 = vmul.f32 0.0, %v1225_v23 }
 0x227   : > { %v1256_v27 = vadd.f32 %v1255_v24, %v1241_v26  ;;  %v1772_v28 = vpop.eup %1771 }
 0x228   : > { %v1774_v29 = vpop.eup %1773  ;;  %v1230_v37 = vmul.f32 %v1772_v28, %v2043_v32 }
 0x229   : > { %v1257_v31 = vadd.f32 %v1256_v27, %v1242_v16  ;;  %v1776_v33 = vpop.eup %1775  ;;  %v1228_v34 = vmul.f32 %v1774_v29, %v2043_v32 }
 0x22a   : > { %v1778_v35 = vpop.eup %1777  ;;  %v1231_v41 = vmul.f32 %v1776_v33, %v2043_v32  ;;  %v1246_v43 = vmul.f32 0.0, %v1230_v37 }
 0x22b   : > { %v1258_v36 = vadd.f32 %v1257_v31, %v1243_v30  ;;  %v1244_v38 = vmul.f32 0.0, %v1228_v34  ;;  %v1229_v39 = vmul.f32 %v1778_v35, %v2043_v32 }
 0x22c   : > { %v1247_v45 = vmul.f32 0.0, %v1231_v41 }
 0x22d   : > { %v1259_v40 = vadd.f32 %v1258_v36, %v1244_v38  ;;  %v1245_v42 = vmul.f32 0.0, %v1229_v39 }
 0x22f   : > { %v1260_v44 = vadd.f32 %v1259_v40, %v1245_v42 }
 0x231   : > { %v1261_v46 = vadd.f32 %v1260_v44, %v1246_v43 }
 0x233   : > { %v1262_v47 = vadd.f32 %v1261_v46, %v1247_v45 }
 0x235   : > { %v1263_v48 = vrot.slane %v1262_v47, 4 }
 0x237   : > { %v1264_v49 = vadd.f32 %v1263_v48, %v1262_v47 }
 0x239   : > { %v1265_v50 = vrot.slane %v1264_v49, 2 }
 0x23b   : > { %v1266_v51 = vadd.f32 %v1265_v50, %v1264_v49 }
 0x23d   : > { %v1267_v52 = vrot.slane %v1266_v51, 1 }
 0x23f   : > { %v1268_v53 = vadd.f32 %v1267_v52, %v1266_v51 }
 0x241   : > { %1269 = vst [vmem:[%s452_s9] sm:$0x1] %v1268_v53 }
 0x242 PF: > { %s17_s25 = sadd.s32 1, %s1817_s25   ;;  %s2096_s21 = smov %s1805_s22 }
 0x243   : > { %p14_p10 = scmp.ge.s32.totalorder %s17_s25, 4   ;;  %s2097_s22 = smov %s1889_s29 }
 0x244   : > { %s2098_s23 = smov %s1813_s24  ;;  %s2099_s24 = smov %s2101_s26 }
 0x245   :  { %16 = sbr.rel (!%p14_p10) target bundleno = 3 (0x3), region = 139 }

// kernel: from_hin_forward.15
= control target key start
LH: loop header
LB: loop body
LE: loop exit
PB: predicated region body
PF: predicated region fallthrough
CT: control target
= control target key end

     0   :  { %s3411_s0 = inlined_call_operand.vmem [shape: bf16[128,128], index: 0, kind: input, shape index: {}]   ;;  %s3412_s2 = inlined_call_operand.vmem [shape: f32[1,128], index: 2, kind: input, shape index: {}]   ;;  %s3413_s1 = inlined_call_operand.vmem [shape: bf16[128,512], index: 1, kind: input, shape index: {}]   ;;  %s3414_s3 = inlined_call_operand.vmem [shape: f32[1,128], index: 3, kind: input, shape index: {}]   ;;  %s3415_s4 = inlined_call_operand.vmem [shape: bf16[2,128,128], index: 4, kind: input, shape index: {}]   ;;  %s3416_s5 = inlined_call_operand.vmem [shape: f32[2,1,128], index: 5, kind: input, shape index: {}]   ;;  %s3417_s6 = inlined_call_operand.vmem [shape: f32[128,128], index: 6, kind: output, shape index: {}]  }
   0x1   :  { %v1629_v0 = vld [vmem:[%s3411_s0 + $0x8] sm:$0xff]   ;;  %v1500_v1 = vld [vmem:[%s3412_s2] ss:$0 sm:$0xff]  ;;  %v1630_v7 = vld [vmem:[%s3411_s0 + $0x10] sm:$0xff]  }
   0x2   :  { %v1583_v2 = vld [vmem:[%s3411_s0] sm:$0xff]   ;;  %v1588_v3 = vunpack.c.l.bf16 %v1629_v0  ;;  %v1589_v5 = vunpack.c.h.bf16 %v1629_v0  ;;  %v1593_v12 = vunpack.c.h.bf16 %v1630_v7  ;;  %v1592_v13 = vunpack.c.l.bf16 %v1630_v7  ;;  %v1631_v14 = vld [vmem:[%s3411_s0 + $0x18] sm:$0xff]   ;;  %v1633_v24 = vld [vmem:[%s3411_s0 + $0x28] sm:$0xff]  }
   0x3   :  { %v1584_v4 = vunpack.c.l.bf16 %v1583_v2  ;;  %v1585_v6 = vunpack.c.h.bf16 %v1583_v2  ;;  %v1597_v17 = vunpack.c.h.bf16 %v1631_v14  ;;  %v1596_v18 = vunpack.c.l.bf16 %v1631_v14  ;;  %v1632_v19 = vld [vmem:[%s3411_s0 + $0x20] sm:$0xff]   ;;  %v1634_v29 = vld [vmem:[%s3411_s0 + $0x30] sm:$0xff]   ;;  %v1635_v34 = vld [vmem:[%s3411_s0 + $0x38] sm:$0xff]  }
   0x4   :  { %v209_v8 = vmul.f32 %v1588_v3, %v1500_v1  ;;  %v210_v10 = vmul.f32 %v1589_v5, %v1500_v1  ;;  %v212_v15 = vmul.f32 %v1593_v12, %v1500_v1  ;;  %v211_v16 = vmul.f32 %v1592_v13, %v1500_v1  ;;  %v1895_v39 = vld [vmem:[%s3413_s1 + $0x10] sm:$0xff]   ;;  %v1900_v40 = vld [vmem:[%s3413_s1] sm:$0xff]  }
   0x5   :  { %v207_v9 = vmul.f32 %v1584_v4, %v1500_v1  ;;  %v208_v11 = vmul.f32 %v1585_v6, %v1500_v1  ;;  %v214_v20 = vmul.f32 %v1597_v17, %v1500_v1  ;;  %v213_v21 = vmul.f32 %v1596_v18, %v1500_v1  ;;  %3599 = vst [vmem:[#allocation2_spill] sm:$0xff] %v1895_v39  ;;  %v1907_v45 = vld [vmem:[%s3414_s3] ss:$0 sm:$0xff]  ;;  %v1912_v46 = vld [vmem:[%s3413_s1 + $0x30] sm:$0xff]  }
   0x6   :  { %227 = vadd.xlane.f32.xlu1 %v209_v8  ;;  %v1601_v22 = vunpack.c.h.bf16 %v1632_v19  ;;  %v1600_v23 = vunpack.c.l.bf16 %v1632_v19  ;;  %v1605_v27 = vunpack.c.h.bf16 %v1633_v24  ;;  %v1604_v28 = vunpack.c.l.bf16 %v1633_v24  ;;  %3600 = vst [vmem:[#allocation3_spill] sm:$0xff] %v1900_v40  ;;  %3601 = vst [vmem:[#allocation4_spill] sm:$0xff] %v1912_v46  ;;  %v1917_v47 = vld [vmem:[%s3413_s1 + $0x20] sm:$0xff]   ;;  %v1930_v52 = vld [vmem:[%s3413_s1 + $0x50] sm:$0xff]  }
   0x7   :  { %223 = vadd.xlane.f32.xlu0 %v207_v9  ;;  %v1609_v32 = vunpack.c.h.bf16 %v1634_v29  ;;  %v1608_v33 = vunpack.c.l.bf16 %v1634_v29  ;;  %v1613_v37 = vunpack.c.h.bf16 %v1635_v34  ;;  %v1612_v38 = vunpack.c.l.bf16 %v1635_v34  ;;  %3602 = vst [vmem:[#allocation5_spill] sm:$0xff] %v1917_v47  ;;  %3603 = vst [vmem:[#allocation6_spill] sm:$0xff] %v1930_v52  ;;  %v1935_v53 = vld [vmem:[%s3413_s1 + $0x40] sm:$0xff]   ;;  %v1948_v58 = vld [vmem:[%s3413_s1 + $0x70] sm:$0xff]  }
   0x8   :  { %v216_v25 = vmul.f32 %v1601_v22, %v1500_v1  ;;  %v215_v26 = vmul.f32 %v1600_v23, %v1500_v1  ;;  %v218_v30 = vmul.f32 %v1605_v27, %v1500_v1  ;;  %v217_v31 = vmul.f32 %v1604_v28, %v1500_v1  ;;  %3604 = vst [vmem:[#allocation7_spill] sm:$0xff] %v1935_v53  ;;  %v1953_v59 = vld [vmem:[%s3413_s1 + $0x60] sm:$0xff]   ;;  %v1966_v0 = vld [vmem:[%s3413_s1 + $0x90] sm:$0xff]  }
   0x9   :  { %v220_v35 = vmul.f32 %v1609_v32, %v1500_v1  ;;  %v219_v36 = vmul.f32 %v1608_v33, %v1500_v1  ;;  %v222_v41 = vmul.f32 %v1613_v37, %v1500_v1  ;;  %v221_v42 = vmul.f32 %v1612_v38, %v1500_v1  ;;  %3605 = vst [vmem:[#allocation8_spill] sm:$0xff] %v1948_v58  ;;  %v1971_v1 = vld [vmem:[%s3413_s1 + $0x80] sm:$0xff]   ;;  %v1984_v6 = vld [vmem:[%s3413_s1 + $0xb0] sm:$0xff]  }
   0xa   :  { %229 = vadd.xlane.f32.xlu1 %v210_v10  ;;  %v3481_v43 = vunpack.c.l.bf16 %v1895_v39  ;;  %v3477_v44 = vunpack.c.l.bf16 %v1900_v40  ;;  %v3473_v50 = vunpack.c.l.bf16 %v1912_v46  ;;  %v3470_v51 = vunpack.c.l.bf16 %v1917_v47  ;;  %3606 = vst [vmem:[#allocation9_spill] sm:$0xff] %v1953_v59  ;;  %3607 = vst [vmem:[#allocation10_spill] sm:$0xff] %v1966_v0  ;;  %v1989_v7 = vld [vmem:[%s3413_s1 + $0xa0] sm:$0xff]   ;;  %v2002_v12 = vld [vmem:[%s3413_s1 + $0xd0] sm:$0xff]  }
   0xb   :  { %225 = vadd.xlane.f32.xlu0 %v208_v11  ;;  %v3463_v56 = vunpack.c.l.bf16 %v1930_v52  ;;  %v3455_v57 = vunpack.c.l.bf16 %v1935_v53  ;;  %v3447_v62 = vunpack.c.l.bf16 %v1948_v58  ;;  %v3444_v63 = vunpack.c.l.bf16 %v1953_v59  ;;  %3608 = vst [vmem:[#allocation11_spill] sm:$0xff] %v1971_v1  ;;  %3609 = vst [vmem:[#allocation12_spill] sm:$0xff] %v1984_v6  ;;  %v2007_v13 = vld [vmem:[%s3413_s1 + $0xc0] sm:$0xff]   ;;  %v2020_v18 = vld [vmem:[%s3413_s1 + $0xf0] sm:$0xff]  }
   0xc   :  { %v294_v48 = vmul.f32 %v1907_v45, %v3481_v43  ;;  %v293_v49 = vmul.f32 %v1907_v45, %v3477_v44  ;;  %v296_v54 = vmul.f32 %v1907_v45, %v3473_v50  ;;  %v295_v55 = vmul.f32 %v1907_v45, %v3470_v51  ;;  %3610 = vst [vmem:[#allocation13_spill] sm:$0xff] %v1989_v7  ;;  %v2025_v19 = vld [vmem:[%s3413_s1 + $0xe0] sm:$0xff]  }
   0xd   :  { %v298_v60 = vmul.f32 %v1907_v45, %v3463_v56  ;;  %v297_v61 = vmul.f32 %v1907_v45, %v3455_v57  ;;  %v300_v2 = vmul.f32 %v1907_v45, %v3447_v62  ;;  %v299_v3 = vmul.f32 %v1907_v45, %v3444_v63  ;;  %3611 = vst [vmem:[#allocation14_spill] sm:$0xff] %v2002_v12 }
   0xe   :  { %233 = vadd.xlane.f32.xlu1 %v212_v15  ;;  %v3435_v4 = vunpack.c.l.bf16 %v1966_v0  ;;  %v3431_v5 = vunpack.c.l.bf16 %v1971_v1  ;;  %v3429_v10 = vunpack.c.l.bf16 %v1984_v6  ;;  %v3427_v11 = vunpack.c.l.bf16 %v1989_v7  ;;  %3612 = vst [vmem:[#allocation15_spill] sm:$0xff] %v2007_v13  ;;  %3613 = vst [vmem:[#allocation16_spill] sm:$0xff] %v2020_v18 }
   0xf   :  { %231 = vadd.xlane.f32.xlu0 %v211_v16  ;;  %v3425_v16 = vunpack.c.l.bf16 %v2002_v12  ;;  %v3423_v17 = vunpack.c.l.bf16 %v2007_v13  ;;  %3614 = vst [vmem:[#allocation17_spill] sm:$0xff] %v2025_v19  ;;  %v3421_v22 = vunpack.c.l.bf16 %v2020_v18  ;;  %v3419_v23 = vunpack.c.l.bf16 %v2025_v19 }
  0x10   :  { %v302_v8 = vmul.f32 %v1907_v45, %v3435_v4  ;;  %v301_v9 = vmul.f32 %v1907_v45, %v3431_v5  ;;  %v304_v14 = vmul.f32 %v1907_v45, %v3429_v10  ;;  %v303_v15 = vmul.f32 %v1907_v45, %v3427_v11  ;;  %v2192_v11 = vld [vmem:[%s3413_s1 + $0xb8] sm:$0xff]  }
  0x11   :  { %v308_v24 = vmul.f32 %v1907_v45, %v3421_v22  ;;  %v3476_v27 = vunpack.c.h.bf16 %v1900_v40  ;;  %v3460_v34 = vunpack.c.h.bf16 %v1930_v52  ;;  %v3446_v38 = vunpack.c.h.bf16 %v1948_v58  ;;  %3625 = vst [vmem:[#allocation28_spill] sm:$0xff] %v2192_v11  ;;  %v2210_v5 = vld [vmem:[%s3413_s1 + $0xd8] sm:$0xff]   ;;  %v2519_v40 = vld [vmem:[%s3416_s5 + $0x1] ss:$0 sm:$0xff] }
  0x12   :  { %237 = vadd.xlane.f32.xlu1 %v214_v20  ;;  %v306_v20 = vmul.f32 %v1907_v45, %v3425_v16  ;;  %v3437_v10 = vunpack.c.l.bf16 %v2192_v11  ;;  %3627 = vst [vmem:[#allocation30_spill] sm:$0xff] %v2210_v5  ;;  %v2228_v4 = vld [vmem:[%s3413_s1 + $0xf8] sm:$0xff]  }
  0x13   :  { %235 = vadd.xlane.f32.xlu0 %v213_v21  ;;  %v305_v21 = vmul.f32 %v1907_v45, %v3423_v17  ;;  %v437_v29 = vmul.f32 %v1907_v45, %v3476_v27  ;;  %v2174_v17 = vld [vmem:[%s3413_s1 + $0x98] sm:$0xff]   ;;  %3629 = vst [vmem:[#allocation32_spill] sm:$0xff] %v2228_v4 }
  0x14   :  { %3623 = vst [vmem:[#allocation26_spill] sm:$0xff] %v2174_v17  ;;  %v3433_v16 = vunpack.c.l.bf16 %v2174_v17 }
  0x16   :  { %241 = vadd.xlane.f32.xlu1 %v216_v25  ;;  %v307_v25 = vmul.f32 %v1907_v45, %v3419_v23  ;;  %v2156_v23 = vld [vmem:[%s3413_s1 + $0x78] sm:$0xff]  }
  0x17   :  { %239 = vadd.xlane.f32.xlu0 %v215_v26  ;;  %v3480_v26 = vunpack.c.h.bf16 %v1895_v39  ;;  %3621 = vst [vmem:[#allocation24_spill] sm:$0xff] %v2156_v23  ;;  %v3445_v22 = vunpack.c.l.bf16 %v2156_v23 }
  0x19   :  { %v438_v28 = vmul.f32 %v1907_v45, %v3480_v26 }
  0x1a   :  { %245 = vadd.xlane.f32.xlu1 %v218_v30  ;;  %v3472_v30 = vunpack.c.h.bf16 %v1912_v46 }
  0x1b   :  { %243 = vadd.xlane.f32.xlu0 %v217_v31  ;;  %v3467_v31 = vunpack.c.h.bf16 %v1917_v47 }
  0x1c   :  { %v440_v32 = vmul.f32 %v1907_v45, %v3472_v30 }
  0x1d   :  { %v439_v33 = vmul.f32 %v1907_v45, %v3467_v31 }
  0x1e   :  { %249 = vadd.xlane.f32.xlu1 %v220_v35  ;;  %v3451_v35 = vunpack.c.h.bf16 %v1935_v53 }
  0x1f   :  { %247 = vadd.xlane.f32.xlu0 %v219_v36  ;;  %v442_v36 = vmul.f32 %v1907_v45, %v3460_v34 }
  0x20   :  { %v441_v37 = vmul.f32 %v1907_v45, %v3451_v35 }
  0x22   :  { %253 = vadd.xlane.f32.xlu1 %v222_v41  ;;  %v3439_v41 = vunpack.c.h.bf16 %v1953_v59 }
  0x23   :  { %251 = vadd.xlane.f32.xlu0 %v221_v42  ;;  %v444_v42 = vmul.f32 %v1907_v45, %v3446_v38 }
  0x26   :  { %311 = vadd.xlane.f32.xlu1 %v294_v48  ;;  %v443_v48 = vmul.f32 %v1907_v45, %v3439_v41 }
  0x27   :  { %309 = vadd.xlane.f32.xlu0 %v293_v49  ;;  %v3434_v49 = vunpack.c.h.bf16 %v1966_v0 }
  0x2a   :  { %315 = vadd.xlane.f32.xlu1 %v296_v54  ;;  %v3430_v54 = vunpack.c.h.bf16 %v1971_v1 }
  0x2b   :  { %313 = vadd.xlane.f32.xlu0 %v295_v55  ;;  %v446_v55 = vmul.f32 %v1907_v45, %v3434_v49 }
  0x2e   :  { %319 = vadd.xlane.f32.xlu1 %v298_v60  ;;  %v445_v60 = vmul.f32 %v1907_v45, %v3430_v54 }
  0x2f   :  { %317 = vadd.xlane.f32.xlu0 %v297_v61  ;;  %v3428_v61 = vunpack.c.h.bf16 %v1984_v6 }
  0x32   :  { %323 = vadd.xlane.f32.xlu1 %v300_v2  ;;  %v3426_v2 = vunpack.c.h.bf16 %v1989_v7 }
  0x33   :  { %321 = vadd.xlane.f32.xlu0 %v299_v3  ;;  %v448_v3 = vmul.f32 %v1907_v45, %v3428_v61 }
  0x36   :  { %327 = vadd.xlane.f32.xlu1 %v302_v8  ;;  %v447_v8 = vmul.f32 %v1907_v45, %v3426_v2 }
  0x37   :  { %325 = vadd.xlane.f32.xlu0 %v301_v9  ;;  %v3424_v9 = vunpack.c.h.bf16 %v2002_v12 }
  0x3a   :  { %331 = vadd.xlane.f32.xlu1 %v304_v14  ;;  %v3422_v14 = vunpack.c.h.bf16 %v2007_v13 }
  0x3b   :  { %329 = vadd.xlane.f32.xlu0 %v303_v15  ;;  %v450_v15 = vmul.f32 %v1907_v45, %v3424_v9 }
  0x3e   :  { %335 = vadd.xlane.f32.xlu1 %v306_v20  ;;  %v449_v20 = vmul.f32 %v1907_v45, %v3422_v14 }
  0x3f   :  { %333 = vadd.xlane.f32.xlu0 %v305_v21  ;;  %v3420_v21 = vunpack.c.h.bf16 %v2020_v18 }
  0x42   :  { %339 = vadd.xlane.f32.xlu1 %v308_v24  ;;  %v3418_v24 = vunpack.c.h.bf16 %v2025_v19 }
  0x43   :  { %337 = vadd.xlane.f32.xlu0 %v307_v25  ;;  %v2102_v25 = vld [vmem:[%s3413_s1 + $0x18] sm:$0xff]  }
  0x44   :  { %3615 = vst [vmem:[#allocation18_spill] sm:$0xff] %v2102_v25 }
  0x46   :  { %455 = vadd.xlane.f32.xlu1 %v438_v28  ;;  %v2107_v28 = vld [vmem:[%s3413_s1 + $0x8] sm:$0xff]  }
  0x47   :  { %453 = vadd.xlane.f32.xlu0 %v437_v29  ;;  %3616 = vst [vmem:[#allocation19_spill] sm:$0xff] %v2107_v28  ;;  %v452_v29 = vmul.f32 %v1907_v45, %v3420_v21 }
  0x4a   :  { %459 = vadd.xlane.f32.xlu1 %v440_v32  ;;  %v451_v32 = vmul.f32 %v1907_v45, %v3418_v24 }
  0x4b   :  { %457 = vadd.xlane.f32.xlu0 %v439_v33  ;;  %v3479_v33 = vunpack.c.l.bf16 %v2102_v25 }
  0x4e   :  { %463 = vadd.xlane.f32.xlu1 %v442_v36  ;;  %v3475_v36 = vunpack.c.l.bf16 %v2107_v28 }
  0x4f   :  { %461 = vadd.xlane.f32.xlu0 %v441_v37  ;;  %v2120_v37 = vld [vmem:[%s3413_s1 + $0x38] sm:$0xff]  }
  0x50   :  { %3617 = vst [vmem:[#allocation20_spill] sm:$0xff] %v2120_v37 }
  0x52   :  { %467 = vadd.xlane.f32.xlu1 %v444_v42  ;;  %v2125_v42 = vld [vmem:[%s3413_s1 + $0x28] sm:$0xff]  }
  0x53   :  { %465 = vadd.xlane.f32.xlu0 %v443_v48  ;;  %3618 = vst [vmem:[#allocation21_spill] sm:$0xff] %v2125_v42  ;;  %v582_v48 = vmul.f32 %v1907_v45, %v3479_v33 }
  0x56   :  { %471 = vadd.xlane.f32.xlu1 %v446_v55  ;;  %v581_v55 = vmul.f32 %v1907_v45, %v3475_v36 }
  0x57   :  { %469 = vadd.xlane.f32.xlu0 %v445_v60  ;;  %v3471_v60 = vunpack.c.l.bf16 %v2120_v37 }
  0x5a   :  { %475 = vadd.xlane.f32.xlu1 %v448_v3  ;;  %v3465_v3 = vunpack.c.l.bf16 %v2125_v42 }
  0x5b   :  { %473 = vadd.xlane.f32.xlu0 %v447_v8  ;;  %v2138_v8 = vld [vmem:[%s3413_s1 + $0x58] sm:$0xff]  }
  0x5c   :  { %3619 = vst [vmem:[#allocation22_spill] sm:$0xff] %v2138_v8 }
  0x5e   :  { %479 = vadd.xlane.f32.xlu1 %v450_v15  ;;  %v2143_v15 = vld [vmem:[%s3413_s1 + $0x48] sm:$0xff]  }
  0x5f   :  { %477 = vadd.xlane.f32.xlu0 %v449_v20  ;;  %3620 = vst [vmem:[#allocation23_spill] sm:$0xff] %v2143_v15  ;;  %v584_v20 = vmul.f32 %v1907_v45, %v3471_v60  ;;  %v3448_v24 = vunpack.c.l.bf16 %v2143_v15  ;;  %v3449_v63 = vunpack.c.h.bf16 %v2143_v15 }
  0x61   :  { %v585_v21 = vmul.f32 %v1907_v45, %v3448_v24 }
  0x62   :  { %483 = vadd.xlane.f32.xlu1 %v452_v29  ;;  %v583_v29 = vmul.f32 %v1907_v45, %v3465_v3 }
  0x63   :  { %481 = vadd.xlane.f32.xlu0 %v451_v32  ;;  %v3459_v32 = vunpack.c.l.bf16 %v2138_v8 }
  0x66   :  { %599 = vadd.xlane.f32.xlu1 %v582_v48  ;;  %v2161_v48 = vld [vmem:[%s3413_s1 + $0x68] sm:$0xff]  }
  0x67   :  { %597 = vadd.xlane.f32.xlu0 %v581_v55  ;;  %3622 = vst [vmem:[#allocation25_spill] sm:$0xff] %v2161_v48  ;;  %v586_v55 = vmul.f32 %v1907_v45, %v3459_v32  ;;  %v3438_v14 = vunpack.c.l.bf16 %v2161_v48  ;;  %v3452_v38 = vunpack.c.h.bf16 %v2161_v48 }
  0x69   :  { %v587_v9 = vmul.f32 %v1907_v45, %v3438_v14 }
  0x6a   :  { %603 = vadd.xlane.f32.xlu1 %v584_v20  ;;  %v2179_v20 = vld [vmem:[%s3413_s1 + $0x88] sm:$0xff]  }
  0x6b   :  { %601 = vadd.xlane.f32.xlu0 %v583_v29  ;;  %3624 = vst [vmem:[#allocation27_spill] sm:$0xff] %v2179_v20  ;;  %v588_v29 = vmul.f32 %v1907_v45, %v3445_v22  ;;  %v3432_v2 = vunpack.c.l.bf16 %v2179_v20  ;;  %v3453_v24 = vunpack.c.h.bf16 %v2179_v20 }
  0x6d   :  { %v589_v61 = vmul.f32 %v1907_v45, %v3432_v2 }
  0x6e   :  { %607 = vadd.xlane.f32.xlu1 %v586_v55  ;;  %v590_v55 = vmul.f32 %v1907_v45, %v3433_v16  ;;  %v3440_v16 = vunpack.c.l.bf16 %v2210_v5 }
  0x6f   :  { %605 = vadd.xlane.f32.xlu0 %v585_v21  ;;  %v2197_v21 = vld [vmem:[%s3413_s1 + $0xa8] sm:$0xff]  }
  0x70   :  { %3626 = vst [vmem:[#allocation29_spill] sm:$0xff] %v2197_v21  ;;  %v3436_v54 = vunpack.c.l.bf16 %v2197_v21 }
  0x72   :  { %611 = vadd.xlane.f32.xlu1 %v588_v29  ;;  %v592_v29 = vmul.f32 %v1907_v45, %v3437_v10  ;;  %v591_v2 = vmul.f32 %v1907_v45, %v3436_v54  ;;  %v3442_v10 = vunpack.c.l.bf16 %v2228_v4 }
  0x73   :  { %609 = vadd.xlane.f32.xlu0 %v587_v9  ;;  %v2215_v9 = vld [vmem:[%s3413_s1 + $0xc8] sm:$0xff]  }
  0x74   :  { %3628 = vst [vmem:[#allocation31_spill] sm:$0xff] %v2215_v9  ;;  %v3441_v49 = vunpack.c.l.bf16 %v2215_v9  ;;  %v596_v41 = vmul.f32 %v1907_v45, %v3442_v10  ;;  %v3464_v10 = vunpack.c.h.bf16 %v2125_v42 }
  0x76   :  { %615 = vadd.xlane.f32.xlu1 %v590_v55  ;;  %v594_v55 = vmul.f32 %v1907_v45, %v3440_v16  ;;  %v593_v54 = vmul.f32 %v1907_v45, %v3441_v49  ;;  %v3474_v16 = vunpack.c.h.bf16 %v2107_v28  ;;  %v1519_v28 = vld [vmem:[%s3415_s4] sm:$0xff]  }
  0x77   :  { %613 = vadd.xlane.f32.xlu0 %v589_v61  ;;  %v2233_v61 = vld [vmem:[%s3413_s1 + $0xe8] sm:$0xff]  }
  0x78   :  { %3630 = vst [vmem:[#allocation33_spill] sm:$0xff] %v2233_v61  ;;  %v3443_v14 = vunpack.c.l.bf16 %v2233_v61 }
  0x7a   :  { %619 = vadd.xlane.f32.xlu1 %v592_v29  ;;  %v3478_v29 = vunpack.c.h.bf16 %v2102_v25  ;;  %v1520_v25 = vunpack.c.l.bf16 %v1519_v28 }
  0x7b   :  { %617 = vadd.xlane.f32.xlu0 %v591_v2  ;;  %v595_v2 = vmul.f32 %v1907_v45, %v3443_v14 }
  0x7c   :  { %v726_v49 = vmul.f32 %v1907_v45, %v3478_v29 }
  0x7e   :  { %623 = vadd.xlane.f32.xlu1 %v594_v55  ;;  %v3469_v55 = vunpack.c.h.bf16 %v2120_v37 }
  0x7f   :  { %621 = vadd.xlane.f32.xlu0 %v593_v54  ;;  %v725_v54 = vmul.f32 %v1907_v45, %v3474_v16 }
  0x80   :  { %v728_v14 = vmul.f32 %v1907_v45, %v3469_v55 }
  0x82   :  { %627 = vadd.xlane.f32.xlu1 %v596_v41  ;;  %v727_v41 = vmul.f32 %v1907_v45, %v3464_v10 }
  0x83   :  { %625 = vadd.xlane.f32.xlu0 %v595_v2  ;;  %v3456_v2 = vunpack.c.h.bf16 %v2138_v8 }
  0x85   :  { %v730_v22 = vmul.f32 %v1907_v45, %v3456_v2 }
  0x86   :  { %743 = vadd.xlane.f32.xlu1 %v726_v49  ;;  %v729_v49 = vmul.f32 %v1907_v45, %v3449_v63 }
  0x87   :  { %741 = vadd.xlane.f32.xlu0 %v725_v54  ;;  %v3450_v54 = vunpack.c.h.bf16 %v2156_v23 }
  0x89   :  { %v732_v62 = vmul.f32 %v1907_v45, %v3450_v54  ;;  %v3457_v54 = vunpack.c.h.bf16 %v2197_v21 }
  0x8a   :  { %747 = vadd.xlane.f32.xlu1 %v728_v14  ;;  %v731_v14 = vmul.f32 %v1907_v45, %v3452_v38 }
  0x8b   :  { %745 = vadd.xlane.f32.xlu0 %v727_v41  ;;  %v3454_v41 = vunpack.c.h.bf16 %v2174_v17 }
  0x8d   :  { %v734_v63 = vmul.f32 %v1907_v45, %v3454_v41  ;;  %v3462_v41 = vunpack.c.h.bf16 %v2215_v9 }
  0x8e   :  { %751 = vadd.xlane.f32.xlu1 %v730_v22  ;;  %v733_v22 = vmul.f32 %v1907_v45, %v3453_v24  ;;  %v3461_v24 = vunpack.c.h.bf16 %v2210_v5 }
  0x8f   :  { %749 = vadd.xlane.f32.xlu0 %v729_v49  ;;  %v3458_v49 = vunpack.c.h.bf16 %v2192_v11 }
  0x92   :  { %755 = vadd.xlane.f32.xlu1 %v732_v62  ;;  %v736_v62 = vmul.f32 %v1907_v45, %v3458_v49  ;;  %v3468_v49 = vunpack.c.h.bf16 %v2233_v61 }
  0x93   :  { %753 = vadd.xlane.f32.xlu0 %v731_v14  ;;  %v2291_v35 = vpop.xlane.xlu1 %227  ;;  %v735_v14 = vmul.f32 %v1907_v45, %v3457_v54  ;;  %v3466_v54 = vunpack.c.h.bf16 %v2228_v4 }
  0x94   :  { %v2293_v38 = vpop.xlane.xlu0 %223 }
  0x96   :  { %759 = vadd.xlane.f32.xlu1 %v734_v63  ;;  %v738_v63 = vmul.f32 %v1907_v45, %v3461_v24 }
  0x97   :  { %757 = vadd.xlane.f32.xlu0 %v733_v22  ;;  %v2303_v57 = vpop.xlane.xlu1 %229  ;;  %v737_v22 = vmul.f32 %v1907_v45, %v3462_v41 }
  0x98   :  { %v2305_v2 = vpop.xlane.xlu0 %225 }
  0x9a   :  { %763 = vadd.xlane.f32.xlu1 %v736_v62  ;;  %v740_v62 = vmul.f32 %v1907_v45, %v3466_v54 }
  0x9b   :  { %761 = vadd.xlane.f32.xlu0 %v735_v14  ;;  %v2315_v32 = vpop.xlane.xlu1 %233  ;;  %v739_v14 = vmul.f32 %v1907_v45, %v3468_v49 }
  0x9c   :  { %v2317_v34 = vpop.xlane.xlu0 %231 }
  0x9e   :  { %767 = vadd.xlane.f32.xlu1 %v738_v63 }
  0x9f   :  { %765 = vadd.xlane.f32.xlu0 %v737_v22  ;;  %v2325_v24 = vpop.xlane.xlu1 %237 }
  0xa0   :  { %v2327_v41 = vpop.xlane.xlu0 %235 }
  0xa2   :  { %771 = vadd.xlane.f32.xlu1 %v740_v62 }
  0xa3   :  { %769 = vadd.xlane.f32.xlu0 %v739_v14  ;;  %v2329_v56 = vpop.xlane.xlu1 %241 }
  0xa4   :  { %v2331_v10 = vpop.xlane.xlu0 %239 }
  0xa7   :  { %v2333_v63 = vpop.xlane.xlu1 %245 }
  0xa8   :  { %3631 = vst [vmem:[#allocation34_spill] sm:$0xff] %v2333_v63  ;;  %v2335_v22 = vpop.xlane.xlu0 %243 }
  0xa9   :  { %3632 = vst [vmem:[#allocation35_spill] sm:$0xff] %v2335_v22 }
  0xab   :  { %v2337_v3 = vpop.xlane.xlu1 %249 }
  0xac   :  { %3633 = vst [vmem:[#allocation36_spill] sm:$0xff] %v2337_v3  ;;  %v2339_v54 = vpop.xlane.xlu0 %247 }
  0xad   :  { %3634 = vst [vmem:[#allocation37_spill] sm:$0xff] %v2339_v54 }
  0xaf   :  { %v2341_v31 = vpop.xlane.xlu1 %253 }
  0xb0   :  { %3635 = vst [vmem:[#allocation38_spill] sm:$0xff] %v2341_v31  ;;  %v2343_v45 = vpop.xlane.xlu0 %251 }
  0xb1   :  { %3636 = vst [vmem:[#allocation39_spill] sm:$0xff] %v2343_v45 }
  0xb3   :  { %v2345_v49 = vpop.xlane.xlu1 %311 }
  0xb4   :  { %v2347_v62 = vpop.xlane.xlu0 %309 }
  0xb7   :  { %v316_v14 = vpop.xlane.xlu1 %315 }
  0xb8   :  { %v314_v55 = vpop.xlane.xlu0 %313  ;;  %v344_v61 = vadd.f32 %v316_v14, %v2303_v57 }
  0xb9   :  { %v343_v19 = vadd.f32 %v314_v55, %v2291_v35 }
  0xba   :  { %v376_v12 = vmul.f32 0.2, %v344_v61  ;;  %vm360_vm0 = vcmp.gt.f32.partialorder %v344_v61, 0.0 }
  0xbb   :  { %v320_v51 = vpop.xlane.xlu1 %319  ;;  %v375_v21 = vmul.f32 0.2, %v343_v19  ;;  %vm359_vm1 = vcmp.gt.f32.partialorder %v343_v19, 0.0 }
  0xbc   :  { %v318_v60 = vpop.xlane.xlu0 %317  ;;  %v346_v4 = vadd.f32 %v320_v51, %v2315_v32  ;;  %v2369_v20 = vsel %vm360_vm0, %v344_v61, %v376_v12 }
  0xbd   :  { %v345_v18 = vadd.f32 %v318_v60, %v2317_v34  ;;  %3637 = vst [vmem:[#allocation40_spill] sm:$0xff] %v2369_v20  ;;  %v2371_v1 = vsel %vm359_vm1, %v343_v19, %v375_v21 }
  0xbe   :  { %vm362_vm2 = vcmp.gt.f32.partialorder %v346_v4, 0.0  ;;  %v378_v14 = vmul.f32 0.2, %v346_v4  ;;  %3638 = vst [vmem:[#allocation41_spill] sm:$0xff] %v2371_v1 }
  0xbf   :  { %v324_v30 = vpop.xlane.xlu1 %323  ;;  %v377_v11 = vmul.f32 0.2, %v345_v18  ;;  %vm361_vm3 = vcmp.gt.f32.partialorder %v345_v18, 0.0 }
  0xc0   :  { %v322_v50 = vpop.xlane.xlu0 %321  ;;  %v348_v9 = vadd.f32 %v324_v30, %v2325_v24  ;;  %v2374_v48 = vsel %vm362_vm2, %v346_v4, %v378_v14 }
  0xc1   :  { %v347_v7 = vadd.f32 %v322_v50, %v2327_v41  ;;  %3639 = vst [vmem:[#allocation42_spill] sm:$0xff] %v2374_v48  ;;  %v2376_v59 = vsel %vm361_vm3, %v345_v18, %v377_v11 }
  0xc2   :  { %v380_v55 = vmul.f32 0.2, %v348_v9  ;;  %vm364_vm4 = vcmp.gt.f32.partialorder %v348_v9, 0.0  ;;  %3640 = vst [vmem:[#allocation43_spill] sm:$0xff] %v2376_v59 }
  0xc3   :  { %v328_v16 = vpop.xlane.xlu1 %327  ;;  %vm363_vm5 = vcmp.gt.f32.partialorder %v347_v7, 0.0  ;;  %v379_v50 = vmul.f32 0.2, %v347_v7 }
  0xc4   :  { %v326_v36 = vpop.xlane.xlu0 %325  ;;  %v2378_v23 = vsel %vm364_vm4, %v348_v9, %v380_v55 }
  0xc5   :  { %3641 = vst [vmem:[#allocation44_spill] sm:$0xff] %v2378_v23  ;;  %v2388_v15 = vsel %vm363_vm5, %v347_v7, %v379_v50  ;;  %v349_v4 = vadd.f32 %v326_v36, %v2331_v10 }
  0xc7   :  { %v332_v27 = vpop.xlane.xlu1 %331  ;;  %vm365_vm11 = vcmp.gt.f32.partialorder %v349_v4, 0.0 }
  0xc8   :  { %v330_v44 = vpop.xlane.xlu0 %329  ;;  %v352_v9 = vadd.f32 %v332_v27, %v2333_v63 }
  0xc9   :  { %v351_v14 = vadd.f32 %v330_v44, %v2335_v22 }
  0xca   :  { %vm368_vm14 = vcmp.gt.f32.partialorder %v352_v9, 0.0 }
  0xcb   :  { %v2349_v29 = vpop.xlane.xlu1 %335  ;;  %vm367_vm15 = vcmp.gt.f32.partialorder %v351_v14, 0.0 }
  0xcc   :  { %v2351_v33 = vpop.xlane.xlu0 %333  ;;  %v354_v53 = vadd.f32 %v2349_v29, %v2337_v3 }
  0xcd   :  { %v353_v29 = vadd.f32 %v2351_v33, %v2339_v54 }
  0xce   :  { %vm370_vm2 = vcmp.gt.f32.partialorder %v354_v53, 0.0 }
  0xcf   :  { %v2353_v26 = vpop.xlane.xlu1 %339  ;;  %vm369_vm5 = vcmp.gt.f32.partialorder %v353_v29, 0.0 }
  0xd0   :  { %v2355_v43 = vpop.xlane.xlu0 %337 }
  0xd3   :  { %v2362_v13 = vpop.xlane.xlu1 %455 }
  0xd4   :  { %v2364_v5 = vpop.xlane.xlu0 %453 }
  0xd7   :  { %v460_v6 = vpop.xlane.xlu1 %459 }
  0xd8   :  { %v458_v51 = vpop.xlane.xlu0 %457  ;;  %v488_v30 = vadd.f32 %v460_v6, %v2303_v57  ;;  %v350_v6 = vadd.f32 %v328_v16, %v2329_v56 }
  0xd9   :  { %v487_v60 = vadd.f32 %v458_v51, %v2291_v35 }
  0xda   :  { %vm504_vm6 = vcmp.gt.f32.partialorder %v488_v30, 0.0  ;;  %v520_v17 = vmul.f32 0.2, %v488_v30  ;;  %vm366_vm10 = vcmp.gt.f32.partialorder %v350_v6, 0.0  ;;  %v382_v18 = vmul.f32 0.2, %v350_v6 }
  0xdb   :  { %vm503_vm7 = vcmp.gt.f32.partialorder %v487_v60, 0.0  ;;  %v519_v0 = vmul.f32 0.2, %v487_v60  ;;  %v464_v51 = vpop.xlane.xlu1 %463 }
  0xdc   :  { %v462_v12 = vpop.xlane.xlu0 %461  ;;  %v2381_v61 = vsel %vm504_vm6, %v488_v30, %v520_v17  ;;  %v490_v21 = vadd.f32 %v464_v51, %v2315_v32  ;;  %v381_v51 = vmul.f32 0.2, %v349_v4  ;;  %v2414_v27 = vsel %vm366_vm10, %v350_v6, %v382_v18 }
  0xdd   :  { %3642 = vst [vmem:[#allocation45_spill] sm:$0xff] %v2381_v61  ;;  %v2383_v19 = vsel %vm503_vm7, %v487_v60, %v519_v0  ;;  %v489_v58 = vadd.f32 %v462_v12, %v2317_v34 }
  0xde   :  { %3643 = vst [vmem:[#allocation46_spill] sm:$0xff] %v2383_v19  ;;  %vm506_vm8 = vcmp.gt.f32.partialorder %v490_v21, 0.0  ;;  %v522_v17 = vmul.f32 0.2, %v490_v21 }
  0xdf   :  { %vm505_vm9 = vcmp.gt.f32.partialorder %v489_v58, 0.0  ;;  %v521_v0 = vmul.f32 0.2, %v489_v58  ;;  %v468_v7 = vpop.xlane.xlu1 %467 }
  0xe0   :  { %v466_v55 = vpop.xlane.xlu0 %465  ;;  %v2397_v30 = vsel %vm506_vm8, %v490_v21, %v522_v17  ;;  %v492_v60 = vadd.f32 %v468_v7, %v2325_v24  ;;  %v384_v21 = vmul.f32 0.2, %v352_v9 }
  0xe1   :  { %3644 = vst [vmem:[#allocation47_spill] sm:$0xff] %v2397_v30  ;;  %v2399_v36 = vsel %vm505_vm9, %v489_v58, %v521_v0  ;;  %v491_v50 = vadd.f32 %v466_v55, %v2327_v41  ;;  %v383_v58 = vmul.f32 0.2, %v351_v14 }
  0xe2   :  { %3645 = vst [vmem:[#allocation48_spill] sm:$0xff] %v2399_v36  ;;  %vm508_vm12 = vcmp.gt.f32.partialorder %v492_v60, 0.0  ;;  %v524_v44 = vmul.f32 0.2, %v492_v60 }
  0xe3   :  { %vm507_vm13 = vcmp.gt.f32.partialorder %v491_v50, 0.0  ;;  %v523_v16 = vmul.f32 0.2, %v491_v50  ;;  %v472_v17 = vpop.xlane.xlu1 %471  ;;  %v2429_v6 = vsel %vm367_vm15, %v351_v14, %v383_v58  ;;  %v355_v58 = vadd.f32 %v2355_v43, %v2343_v45 }
  0xe4   :  { %v470_v0 = vpop.xlane.xlu0 %469  ;;  %v2407_v7 = vsel %vm508_vm12, %v492_v60, %v524_v44  ;;  %v494_v11 = vadd.f32 %v472_v17, %v2329_v56  ;;  %v2426_v44 = vsel %vm368_vm14, %v352_v9, %v384_v21  ;;  %3649 = vst [vmem:[#allocation52_spill] sm:$0xff] %v2429_v6 }
  0xe5   :  { %3646 = vst [vmem:[#allocation49_spill] sm:$0xff] %v2407_v7  ;;  %v2409_v55 = vsel %vm507_vm13, %v491_v50, %v523_v16  ;;  %v493_v12 = vadd.f32 %v470_v0, %v2331_v10  ;;  %v2423_v50 = vsel %vm365_vm11, %v349_v4, %v381_v51  ;;  %3648 = vst [vmem:[#allocation51_spill] sm:$0xff] %v2426_v44  ;;  %v386_v51 = vmul.f32 0.2, %v354_v53 }
  0xe6   :  { %vm510_vm0 = vcmp.gt.f32.partialorder %v494_v11, 0.0  ;;  %v526_v60 = vmul.f32 0.2, %v494_v11  ;;  %3647 = vst [vmem:[#allocation50_spill] sm:$0xff] %v2423_v50  ;;  %vm371_vm9 = vcmp.gt.f32.partialorder %v355_v58, 0.0 }
  0xe7   :  { %vm509_vm1 = vcmp.gt.f32.partialorder %v493_v12, 0.0  ;;  %v525_v16 = vmul.f32 0.2, %v493_v12  ;;  %v476_v18 = vpop.xlane.xlu1 %475  ;;  %v2458_v37 = vsel %vm370_vm2, %v354_v53, %v386_v51  ;;  %v2514_v53 = vld [vmem:[%s3416_s5] ss:$0 sm:$0xff] }
  0xe8   :  { %v474_v17 = vpop.xlane.xlu0 %473  ;;  %v2433_v0 = vsel %vm510_vm0, %v494_v11, %v526_v60  ;;  %v496_v52 = vadd.f32 %v476_v18, %v2333_v63  ;;  %v385_v11 = vmul.f32 0.2, %v353_v29  ;;  %3653 = vst [vmem:[#allocation56_spill] sm:$0xff] %v2458_v37 }
  0xe9   :  { %v2435_v8 = vsel %vm509_vm1, %v493_v12, %v525_v16  ;;  %v495_v4 = vadd.f32 %v474_v17, %v2335_v22  ;;  %v356_v12 = vadd.f32 %v2353_v26, %v2341_v31 }
  0xea   :  { %3650 = vst [vmem:[#allocation53_spill] sm:$0xff] %v2435_v8  ;;  %vm512_vm3 = vcmp.gt.f32.partialorder %v496_v52, 0.0  ;;  %v528_v33 = vmul.f32 0.2, %v496_v52 }
  0xeb   :  { %vm511_vm4 = vcmp.gt.f32.partialorder %v495_v4, 0.0  ;;  %v527_v21 = vmul.f32 0.2, %v495_v4  ;;  %v480_v60 = vpop.xlane.xlu1 %479  ;;  %vm372_vm8 = vcmp.gt.f32.partialorder %v356_v12, 0.0 }
  0xec   :  { %v478_v16 = vpop.xlane.xlu0 %477  ;;  %v2447_v18 = vsel %vm512_vm3, %v496_v52, %v528_v33  ;;  %v498_v14 = vadd.f32 %v480_v60, %v2337_v3  ;;  %v2461_v52 = vsel %vm369_vm5, %v353_v29, %v385_v11  ;;  %v387_v33 = vmul.f32 0.2, %v355_v58 }
  0xed   :  { %3651 = vst [vmem:[#allocation54_spill] sm:$0xff] %v2447_v18  ;;  %v2449_v17 = vsel %vm511_vm4, %v495_v4, %v527_v21  ;;  %v497_v9 = vadd.f32 %v478_v16, %v2339_v54  ;;  %3654 = vst [vmem:[#allocation57_spill] sm:$0xff] %v2461_v52  ;;  %v388_v4 = vmul.f32 0.2, %v356_v12  ;;  %v1521_v29 = vunpack.c.h.bf16 %v1519_v28  ;;  %v1615_v28 = vld [vmem:[%s3415_s4 + $0x10] sm:$0xff]  }
  0xee   :  { %3652 = vst [vmem:[#allocation55_spill] sm:$0xff] %v2449_v17  ;;  %vm514_vm6 = vcmp.gt.f32.partialorder %v498_v14, 0.0  ;;  %v530_v26 = vmul.f32 0.2, %v498_v14 }
  0xef   :  { %vm513_vm7 = vcmp.gt.f32.partialorder %v497_v9, 0.0  ;;  %v529_v43 = vmul.f32 0.2, %v497_v9  ;;  %v484_v21 = vpop.xlane.xlu1 %483  ;;  %v63_v61 = vmul.f32 %v1521_v29, %v2514_v53 }
  0xf0   :  { %v482_v60 = vpop.xlane.xlu0 %481  ;;  %v2463_v16 = vsel %vm514_vm6, %v498_v14, %v530_v26  ;;  %v500_v47 = vadd.f32 %v484_v21, %v2341_v31 }
  0xf1   :  { %3655 = vst [vmem:[#allocation58_spill] sm:$0xff] %v2463_v16  ;;  %v2465_v42 = vsel %vm513_vm7, %v497_v9, %v529_v43  ;;  %v499_v46 = vadd.f32 %v482_v60, %v2343_v45  ;;  %v2475_v9 = vsel %vm372_vm8, %v356_v12, %v388_v4  ;;  %v2477_v43 = vsel %vm371_vm9, %v355_v58, %v387_v33  ;;  %v1621_v12 = vld [vmem:[%s3415_s4 + $0x40] sm:$0xff]   ;;  %v1614_v33 = vld [vmem:[%s3415_s4 + $0x8] sm:$0xff]  }
  0xf2   :  { %3656 = vst [vmem:[#allocation59_spill] sm:$0xff] %v2465_v42  ;;  %vm516_vm10 = vcmp.gt.f32.partialorder %v500_v47, 0.0  ;;  %v532_v51 = vmul.f32 0.2, %v500_v47  ;;  %3657 = vst [vmem:[#allocation60_spill] sm:$0xff] %v2475_v9  ;;  %v1552_v39 = vunpack.c.l.bf16 %v1621_v12  ;;  %v1524_v30 = vunpack.c.l.bf16 %v1614_v33 }
  0xf3   :  { %vm515_vm11 = vcmp.gt.f32.partialorder %v499_v46, 0.0  ;;  %v531_v11 = vmul.f32 0.2, %v499_v46  ;;  %v600_v14 = vpop.xlane.xlu1 %599  ;;  %3658 = vst [vmem:[#allocation61_spill] sm:$0xff] %v2477_v43  ;;  %v1528_v42 = vunpack.c.l.bf16 %v1615_v28 }
  0xf4   :  { %v2473_v26 = vpop.xlane.xlu0 %597  ;;  %v2479_v21 = vsel %vm516_vm10, %v500_v47, %v532_v51  ;;  %v486_v47 = vadd.f32 %v2362_v13, %v2305_v2  ;;  %v1622_v51 = vld [vmem:[%s3415_s4 + $0x48] sm:$0xff]   ;;  %v341_v13 = vadd.f32 %v2347_v62, %v2293_v38  ;;  %v630_v52 = vadd.f32 %v600_v14, %v2305_v2 }
  0xf5   :  { %3659 = vst [vmem:[#allocation62_spill] sm:$0xff] %v2479_v21  ;;  %v2481_v60 = vsel %vm515_vm11, %v499_v46, %v531_v11  ;;  %v485_v46 = vadd.f32 %v2364_v5, %v2293_v38  ;;  %v342_v11 = vadd.f32 %v2345_v49, %v2305_v2  ;;  %v1553_v5 = vunpack.c.h.bf16 %v1621_v12 }
  0xf6   :  { %3660 = vst [vmem:[#allocation63_spill] sm:$0xff] %v2481_v60  ;;  %v518_v7 = vmul.f32 0.2, %v486_v47  ;;  %v1525_v49 = vunpack.c.h.bf16 %v1614_v33  ;;  %v1557_v36 = vunpack.c.h.bf16 %v1622_v51  ;;  %vm502_vm12 = vcmp.gt.f32.partialorder %v486_v47, 0.0 }
  0xf7   :  { %v2497_v58 = vpop.xlane.xlu1 %603  ;;  %v517_v23 = vmul.f32 0.2, %v485_v46  ;;  %vm501_vm13 = vcmp.gt.f32.partialorder %v485_v46, 0.0  ;;  %v1556_v48 = vunpack.c.l.bf16 %v1622_v51  ;;  %v374_v19 = vmul.f32 0.2, %v342_v11 }
  0xf8   :  { %v2499_v4 = vpop.xlane.xlu0 %601  ;;  %v373_v1 = vmul.f32 0.2, %v341_v13  ;;  %v136_v20 = vmul.f32 %v1553_v5, %v2519_v40  ;;  %vm358_vm14 = vcmp.gt.f32.partialorder %v342_v11, 0.0  ;;  %vm357_vm15 = vcmp.gt.f32.partialorder %v341_v13, 0.0  ;;  %v2541_v5 = vld [vmem:[%s3415_s4 + $0x50] sm:$0xff]  }
  0xf9   :  { %v62_v12 = vmul.f32 %v1520_v25, %v2514_v53  ;;  %v135_v60 = vmul.f32 %v1552_v39, %v2519_v40  ;;  %v2532_v43 = vsel %vm502_vm12, %v486_v47, %v518_v7  ;;  %v2534_v33 = vsel %vm501_vm13, %v485_v46, %v517_v23 }
  0xfa   :  { %v65_v51 = vmul.f32 %v1525_v49, %v2514_v53  ;;  %v138_v29 = vmul.f32 %v1557_v36, %v2519_v40  ;;  %v64_v25 = vmul.f32 %v1524_v30, %v2514_v53  ;;  %v137_v39 = vmul.f32 %v1556_v48, %v2519_v40 }
  0xfb   :  { %v2521_v62 = vpop.xlane.xlu1 %607  ;;  %v1529_v7 = vunpack.c.h.bf16 %v1615_v28  ;;  %v2547_v47 = vsel %vm358_vm14, %v342_v11, %v374_v19  ;;  %v2549_v23 = vsel %vm357_vm15, %v341_v13, %v373_v1  ;;  %v2552_v36 = vadd.f32 %v136_v20, %v63_v61 }
  0xfc   :  { %v2523_v59 = vpop.xlane.xlu0 %605  ;;  %v1561_v30 = vunpack.c.h.bf16 %v2541_v5  ;;  %v2560_v19 = vadd.f32 %v135_v60, %v62_v12  ;;  %v2562_v1 = vadd.f32 %v138_v29, %v65_v51  ;;  %v629_v20 = vadd.f32 %v2473_v26, %v2293_v38 }
  0xfd   :  { %3661 = vst [vmem:[#allocation64_spill] sm:$0xff] %v2552_v36  ;;  %v2566_v11 = vadd.f32 %v137_v39, %v64_v25  ;;  %v2569_v13 = vmul.f32 %v1529_v7, %v2514_v53  ;;  %vm646_vm1 = vcmp.gt.f32.partialorder %v630_v52, 0.0  ;;  %v662_v51 = vmul.f32 0.2, %v630_v52 }
  0xfe   :  { %3662 = vst [vmem:[#allocation65_spill] sm:$0xff] %v2560_v19  ;;  %3663 = vst [vmem:[#allocation66_spill] sm:$0xff] %v2562_v1  ;;  %v3665_v26 = vmax.f32 %v2388_v15, %v2409_v55  ;;  %v2583_v25 = vmul.f32 %v1561_v30, %v2519_v40  ;;  %vm645_vm4 = vcmp.gt.f32.partialorder %v629_v20, 0.0  ;;  %v661_v7 = vmul.f32 0.2, %v629_v20 }
  0xff   :  { %v2543_v21 = vpop.xlane.xlu1 %611  ;;  %3664 = vst [vmem:[#allocation67_spill] sm:$0xff] %v2566_v11  ;;  %v2597_v1 = vsel %vm646_vm1, %v630_v52, %v662_v51  ;;  %v631_v19 = vadd.f32 %v2499_v4, %v2291_v35  ;;  %v634_v4 = vadd.f32 %v2521_v62, %v2315_v32 }
 0x100   :  { %v610_v9 = vpop.xlane.xlu0 %609  ;;  %v2614_v51 = vsel %vm645_vm4, %v629_v20, %v661_v7  ;;  %v3673_v20 = vmax.f32 %v2426_v44, %v2447_v18  ;;  %v3707_v44 = vld [vmem:[#allocation48_spill] sm:$0xff] }
 0x101   :  { %v635_v46 = vadd.f32 %v610_v9, %v2327_v41  ;;  %vm647_vm8 = vcmp.gt.f32.partialorder %v631_v19, 0.0  ;;  %vm650_vm11 = vcmp.gt.f32.partialorder %v634_v4, 0.0 }
 0x103   :  { %vm651_vm0 = vcmp.gt.f32.partialorder %v635_v46, 0.0  ;;  %v667_v48 = vmul.f32 0.2, %v635_v46  ;;  %v616_v61 = vpop.xlane.xlu1 %615 }
 0x104   :  { %v614_v9 = vpop.xlane.xlu0 %613  ;;  %v638_v49 = vadd.f32 %v616_v61, %v2329_v56 }
 0x105   :  { %v2571_v14 = vsel %vm651_vm0, %v635_v46, %v667_v48  ;;  %v637_v60 = vadd.f32 %v614_v9, %v2331_v10  ;;  %v632_v46 = vadd.f32 %v2497_v58, %v2303_v57  ;;  %v2588_v9 = vmul.f32 %v1528_v42, %v2514_v53 }
 0x106   :  { %v2580_v29 = vmax.f32 %v3665_v26, %v2571_v14  ;;  %vm654_vm2 = vcmp.gt.f32.partialorder %v638_v49, 0.0  ;;  %v670_v28 = vmul.f32 0.2, %v638_v49  ;;  %v3668_v58 = vmax.f32 %v2414_v27, %v2433_v0 }
 0x107   :  { %vm653_vm3 = vcmp.gt.f32.partialorder %v637_v60, 0.0  ;;  %v669_v39 = vmul.f32 0.2, %v637_v60  ;;  %v620_v48 = vpop.xlane.xlu1 %619  ;;  %3666 = vst [vmem:[#allocation68_spill] sm:$0xff] %v2588_v9  ;;  %v3669_v53 = vmax.f32 %v2423_v50, %v2435_v8  ;;  %vm648_vm7 = vcmp.gt.f32.partialorder %v632_v46, 0.0 }
 0x108   :  { %v618_v61 = vpop.xlane.xlu0 %617  ;;  %v2590_v12 = vsel %vm654_vm2, %v638_v49, %v670_v28  ;;  %v640_v30 = vadd.f32 %v620_v48, %v2333_v63  ;;  %v633_v28 = vadd.f32 %v2523_v59, %v2317_v34  ;;  %v664_v9 = vmul.f32 0.2, %v632_v46 }
 0x109   :  { %v2592_v26 = vsel %vm653_vm3, %v637_v60, %v669_v39  ;;  %v639_v11 = vadd.f32 %v618_v61, %v2335_v22  ;;  %v2605_v42 = vmax.f32 %v3668_v58, %v2590_v12  ;;  %v3675_v59 = vmax.f32 %v2429_v6, %v2449_v17 }
 0x10a   :  { %3667 = vst [vmem:[#allocation69_spill] sm:$0xff] %v2592_v26  ;;  %v2611_v49 = vmax.f32 %v3669_v53, %v2592_v26  ;;  %vm656_vm5 = vcmp.gt.f32.partialorder %v640_v30, 0.0  ;;  %v672_v60 = vmul.f32 0.2, %v640_v30  ;;  %vm649_vm12 = vcmp.gt.f32.partialorder %v633_v28, 0.0 }
 0x10b   :  { %vm655_vm6 = vcmp.gt.f32.partialorder %v639_v11, 0.0  ;;  %v671_v52 = vmul.f32 0.2, %v639_v11  ;;  %v624_v39 = vpop.xlane.xlu1 %623  ;;  %v3679_v6 = vmax.f32 %v2458_v37, %v2463_v16  ;;  %v3704_v37 = vld [vmem:[#allocation47_spill] sm:$0xff] }
 0x10c   :  { %3670 = vst [vmem:[#allocation70_spill] sm:$0xff] %v2611_v49  ;;  %v622_v48 = vpop.xlane.xlu0 %621  ;;  %v2620_v61 = vsel %vm656_vm5, %v640_v30, %v672_v60  ;;  %v642_v53 = vadd.f32 %v624_v39, %v2337_v3  ;;  %v663_v60 = vmul.f32 0.2, %v631_v19 }
 0x10d   :  { %3671 = vst [vmem:[#allocation71_spill] sm:$0xff] %v2620_v61  ;;  %v2622_v58 = vsel %vm655_vm6, %v639_v11, %v671_v52  ;;  %v641_v22 = vadd.f32 %v622_v48, %v2339_v54  ;;  %v2630_v62 = vmax.f32 %v3673_v20, %v2620_v61  ;;  %v666_v52 = vmul.f32 0.2, %v634_v4  ;;  %v3681_v61 = vld [vmem:[#allocation57_spill] sm:$0xff] }
 0x10e   :  { %3672 = vst [vmem:[#allocation72_spill] sm:$0xff] %v2622_v58  ;;  %v2636_v7 = vmax.f32 %v3675_v59, %v2622_v58  ;;  %vm658_vm9 = vcmp.gt.f32.partialorder %v642_v53, 0.0  ;;  %v674_v11 = vmul.f32 0.2, %v642_v53  ;;  %v665_v59 = vmul.f32 0.2, %v633_v28 }
 0x10f   :  { %3674 = vst [vmem:[#allocation73_spill] sm:$0xff] %v2630_v62  ;;  %vm657_vm10 = vcmp.gt.f32.partialorder %v641_v22, 0.0  ;;  %v673_v30 = vmul.f32 0.2, %v641_v22  ;;  %v628_v39 = vpop.xlane.xlu1 %627  ;;  %v636_v58 = vadd.f32 %v2543_v21, %v2325_v24  ;;  %v3685_v21 = vmax.f32 %v2547_v47, %v2532_v43 }
 0x110   :  { %3676 = vst [vmem:[#allocation74_spill] sm:$0xff] %v2636_v7  ;;  %v626_v48 = vpop.xlane.xlu0 %625  ;;  %v2638_v54 = vsel %vm658_vm9, %v642_v53, %v674_v11  ;;  %v644_v3 = vadd.f32 %v628_v39, %v2341_v31  ;;  %v3682_v53 = vld [vmem:[#allocation59_spill] sm:$0xff]  ;;  %v2669_v31 = vsel %vm650_vm11, %v634_v4, %v666_v52  ;;  %v3692_v52 = vld [vmem:[#allocation61_spill] sm:$0xff] }
 0x111   :  { %3677 = vst [vmem:[#allocation75_spill] sm:$0xff] %v2638_v54  ;;  %v2640_v20 = vsel %vm657_vm10, %v641_v22, %v673_v30  ;;  %v643_v17 = vadd.f32 %v626_v48, %v2343_v45  ;;  %v2650_v7 = vmax.f32 %v3679_v6, %v2638_v54  ;;  %v3683_v11 = vmax.f32 %v3681_v61, %v3682_v53 }
 0x112   :  { %3678 = vst [vmem:[#allocation76_spill] sm:$0xff] %v2640_v20  ;;  %vm660_vm13 = vcmp.gt.f32.partialorder %v644_v3, 0.0  ;;  %v676_v30 = vmul.f32 0.2, %v644_v3  ;;  %v854_v48 = vmax.f32 %v3685_v21, %v2597_v1  ;;  %v2663_v45 = vsel %vm648_vm7, %v632_v46, %v664_v9  ;;  %v3689_v9 = vld [vmem:[#allocation62_spill] sm:$0xff] }
 0x113   :  { %3680 = vst [vmem:[#allocation77_spill] sm:$0xff] %v2650_v7  ;;  %v2656_v22 = vmax.f32 %v3683_v11, %v2640_v20  ;;  %vm659_vm14 = vcmp.gt.f32.partialorder %v643_v17, 0.0  ;;  %v675_v39 = vmul.f32 0.2, %v643_v17  ;;  %v2666_v6 = vsel %vm647_vm8, %v631_v19, %v663_v60  ;;  %v744_v11 = vpop.xlane.xlu1 %743  ;;  %v3688_v19 = vld [vmem:[#allocation60_spill] sm:$0xff] }
 0x114   :  { %v742_v20 = vpop.xlane.xlu0 %741  ;;  %v2671_v53 = vsel %vm660_vm13, %v644_v3, %v676_v30  ;;  %v2678_v21 = vsel %vm649_vm12, %v633_v28, %v665_v59  ;;  %v668_v46 = vmul.f32 0.2, %v636_v58  ;;  %v3690_v60 = vmax.f32 %v3688_v19, %v3689_v9  ;;  %v3693_v3 = vld [vmem:[#allocation63_spill] sm:$0xff]  ;;  %v3697_v59 = vld [vmem:[#allocation40_spill] sm:$0xff]  ;;  %v3701_v9 = vld [vmem:[#allocation46_spill] sm:$0xff] }
 0x115   :  { %3684 = vst [vmem:[#allocation78_spill] sm:$0xff] %v2656_v22  ;;  %3686 = vst [vmem:[#allocation79_spill] sm:$0xff] %v2671_v53  ;;  %v2673_v61 = vsel %vm659_vm14, %v643_v17, %v675_v39  ;;  %v774_v22 = vadd.f32 %v744_v11, %v2305_v2  ;;  %v773_v54 = vadd.f32 %v742_v20, %v2293_v38  ;;  %v3698_v39 = vld [vmem:[#allocation45_spill] sm:$0xff]  ;;  %vm652_vm1 = vcmp.gt.f32.partialorder %v636_v58, 0.0 }
 0x116   :  { %3687 = vst [vmem:[#allocation80_spill] sm:$0xff] %v2673_v61  ;;  %v2684_v4 = vmax.f32 %v3690_v60, %v2671_v53  ;;  %v3694_v30 = vmax.f32 %v3692_v52, %v3693_v3  ;;  %v3696_v28 = vmax.f32 %v2549_v23, %v2534_v33  ;;  %v3699_v11 = vmax.f32 %v3697_v59, %v3698_v39  ;;  %v3700_v53 = vld [vmem:[#allocation41_spill] sm:$0xff] }
 0x117   :  { %vm790_vm15 = vcmp.gt.f32.partialorder %v774_v22, 0.0  ;;  %v806_v2 = vmul.f32 0.2, %v774_v22  ;;  %vm789_vm0 = vcmp.gt.f32.partialorder %v773_v54, 0.0  ;;  %v805_v38 = vmul.f32 0.2, %v773_v54 }
 0x118   :  { %3691 = vst [vmem:[#allocation81_spill] sm:$0xff] %v2684_v4  ;;  %v2690_v17 = vmax.f32 %v3694_v30, %v2673_v61  ;;  %v853_v20 = vmax.f32 %v3696_v28, %v2614_v51  ;;  %v856_v60 = vmax.f32 %v3699_v11, %v2663_v45  ;;  %v3702_v3 = vmax.f32 %v3700_v53, %v3701_v9  ;;  %v748_v61 = vpop.xlane.xlu1 %747  ;;  %v746_v52 = vpop.xlane.xlu0 %745  ;;  %v3703_v28 = vld [vmem:[#allocation42_spill] sm:$0xff]  ;;  %v3706_v11 = vld [vmem:[#allocation43_spill] sm:$0xff] }
 0x119   :  { %v821_v19 = vsel %vm789_vm0, %v773_v54, %v805_v38  ;;  %v776_v4 = vadd.f32 %v748_v61, %v2303_v57  ;;  %v775_v16 = vadd.f32 %v746_v52, %v2291_v35  ;;  %v3705_v7 = vmax.f32 %v3703_v28, %v3704_v37 }
 0x11a   :  { %3695 = vst [vmem:[#allocation82_spill] sm:$0xff] %v2690_v17  ;;  %v855_v30 = vmax.f32 %v3702_v3, %v2666_v6  ;;  %v822_v17 = vsel %vm790_vm15, %v774_v22, %v806_v2  ;;  %v3708_v62 = vmax.f32 %v3706_v11, %v3707_v44  ;;  %v869_v26 = vmax.f32 %v853_v20, %v821_v19 }
 0x11b   :  { %v2710_v18 = vmax.f32 %v3705_v7, %v2669_v31  ;;  %v870_v63 = vmax.f32 %v854_v48, %v822_v17  ;;  %v2718_v22 = vsel %vm652_vm1, %v636_v58, %v668_v46  ;;  %vm792_vm2 = vcmp.gt.f32.partialorder %v776_v4, 0.0 }
 0x11c   :  { %v2716_v3 = vmax.f32 %v3708_v62, %v2678_v21  ;;  %v808_v57 = vmul.f32 0.2, %v776_v4  ;;  %v807_v54 = vmul.f32 0.2, %v775_v16  ;;  %v885_v2 = vsub.f32 %v2549_v23, %v869_v26  ;;  %v752_v36 = vpop.xlane.xlu1 %751 }
 0x11d   :  { %v886_v35 = vsub.f32 %v2547_v47, %v870_v63  ;;  %v934_v61 = vsub.f32 %v2532_v43, %v870_v63  ;;  %v982_v7 = vsub.f32 %v2597_v1, %v870_v63  ;;  %v1030_v52 = vsub.f32 %v822_v17, %v870_v63  ;;  %v750_v17 = vpop.xlane.xlu0 %749 }
 0x11e   :  { %v933_v38 = vsub.f32 %v2534_v33, %v869_v26  ;;  %v981_v62 = vsub.f32 %v2614_v51, %v869_v26  ;;  %vm791_vm3 = vcmp.gt.f32.partialorder %v775_v16, 0.0  ;;  %v824_v20 = vsel %vm792_vm2, %v776_v4, %v808_v57 }
 0x11f   :  { %v903_v48 = vmul.f32 1.442695, %v886_v35  ;;  %v951_v58 = vmul.f32 1.442695, %v934_v61  ;;  %v999_v46 = vmul.f32 1.442695, %v982_v7  ;;  %v1029_v49 = vsub.f32 %v821_v19, %v869_v26 }
 0x120   :  { %v1047_v8 = vmul.f32 1.442695, %v1030_v52  ;;  %v901_v50 = vmul.f32 1.442695, %v885_v2  ;;  %v872_v47 = vmax.f32 %v856_v60, %v824_v20  ;;  %v949_v43 = vmul.f32 1.442695, %v933_v38 }
 0x121   :  { %1636 = vpow2.f32 %v903_v48  ;;  %v997_v1 = vmul.f32 1.442695, %v981_v62  ;;  %v823_v63 = vsel %vm791_vm3, %v775_v16, %v807_v54  ;;  %v778_v57 = vadd.f32 %v752_v36, %v2315_v32  ;;  %v756_v54 = vpop.xlane.xlu1 %755 }
 0x122   :  { %1638 = vpow2.f32 %v951_v58  ;;  %v888_v23 = vsub.f32 %v3697_v59, %v872_v47  ;;  %v936_v33 = vsub.f32 %v3698_v39, %v872_v47  ;;  %v984_v51 = vsub.f32 %v2663_v45, %v872_v47 }
 0x123   :  { %1640 = vpow2.f32 %v999_v46  ;;  %v1032_v35 = vsub.f32 %v824_v20, %v872_v47  ;;  %v871_v4 = vmax.f32 %v855_v30, %v823_v63  ;;  %v1045_v26 = vmul.f32 1.442695, %v1029_v49  ;;  %v754_v49 = vpop.xlane.xlu0 %753 }
 0x124   :  { %1642 = vpow2.f32 %v1047_v8  ;;  %v907_v19 = vmul.f32 1.442695, %v888_v23  ;;  %v955_v60 = vmul.f32 1.442695, %v936_v33  ;;  %v1003_v61 = vmul.f32 1.442695, %v984_v51 }
 0x125   :  { %1644 = vpow2.f32 %v901_v50  ;;  %v887_v16 = vsub.f32 %v3700_v53, %v871_v4  ;;  %v935_v59 = vsub.f32 %v3701_v9, %v871_v4  ;;  %v983_v39 = vsub.f32 %v2666_v6, %v871_v4 }
 0x126   :  { %1646 = vpow2.f32 %v949_v43  ;;  %v1031_v45 = vsub.f32 %v823_v63, %v871_v4  ;;  %vm794_vm4 = vcmp.gt.f32.partialorder %v778_v57, 0.0  ;;  %v1051_v30 = vmul.f32 1.442695, %v1032_v35  ;;  %v3710_v63 = vld [vmem:[#allocation49_spill] sm:$0xff] }
 0x127   :  { %1648 = vpow2.f32 %v997_v1  ;;  %v905_v7 = vmul.f32 1.442695, %v887_v16  ;;  %v810_v32 = vmul.f32 0.2, %v778_v57  ;;  %v953_v8 = vmul.f32 1.442695, %v935_v59 }
 0x128   :  { %1650 = vpow2.f32 %v1045_v26  ;;  %v1001_v36 = vmul.f32 1.442695, %v983_v39  ;;  %v777_v50 = vadd.f32 %v750_v17, %v2317_v34  ;;  %v1049_v53 = vmul.f32 1.442695, %v1031_v45 }
 0x129   :  { %1652 = vpow2.f32 %v907_v19  ;;  %v826_v52 = vsel %vm794_vm4, %v778_v57, %v810_v32  ;;  %v780_v9 = vadd.f32 %v756_v54, %v2325_v24  ;;  %v779_v48 = vadd.f32 %v754_v49, %v2327_v41  ;;  %v3709_v41 = vld [vmem:[#allocation44_spill] sm:$0xff] }
 0x12a   :  { %1654 = vpow2.f32 %v955_v60  ;;  %v874_v6 = vmax.f32 %v2710_v18, %v826_v52  ;;  %vm793_vm5 = vcmp.gt.f32.partialorder %v777_v50, 0.0  ;;  %v809_v2 = vmul.f32 0.2, %v777_v50 }
 0x12b   :  { %v2736_v38 = vpop.eup %1636  ;;  %1656 = vpow2.f32 %v1003_v61  ;;  %vm796_vm6 = vcmp.gt.f32.partialorder %v780_v9, 0.0  ;;  %v812_v62 = vmul.f32 0.2, %v780_v9  ;;  %v3711_v23 = vmax.f32 %v3709_v41, %v3710_v63 }
 0x12c   :  { %v2739_v58 = vpop.eup %1638  ;;  %1658 = vpow2.f32 %v1051_v30  ;;  %v890_v34 = vsub.f32 %v3703_v28, %v874_v6  ;;  %v938_v46 = vsub.f32 %v3704_v37, %v874_v6  ;;  %v986_v24 = vsub.f32 %v2669_v31, %v874_v6 }
 0x12d   :  { %v2744_v20 = vpop.eup %1640  ;;  %v1078_v18 = vadd.f32 %v2739_v58, %v2736_v38  ;;  %1660 = vpow2.f32 %v905_v7  ;;  %v1034_v47 = vsub.f32 %v826_v52, %v874_v6  ;;  %v825_v43 = vsel %vm793_vm5, %v777_v50, %v809_v2 }
 0x12e   :  { %v2749_v1 = vpop.eup %1642  ;;  %v860_v28 = vmax.f32 %v3711_v23, %v2718_v22  ;;  %1662 = vpow2.f32 %v953_v8  ;;  %v911_v37 = vmul.f32 1.442695, %v890_v34  ;;  %v959_v33 = vmul.f32 1.442695, %v938_v46 }
 0x12f   :  { %v2755_v31 = vpop.eup %1644  ;;  %v1094_v51 = vadd.f32 %v2744_v20, %v1078_v18  ;;  %1664 = vpow2.f32 %v1001_v36  ;;  %v1007_v17 = vmul.f32 1.442695, %v986_v24  ;;  %v873_v35 = vmax.f32 %v2716_v3, %v825_v43  ;;  %v760_v36 = vpop.xlane.xlu1 %759 }
 0x130   :  { %v2759_v4 = vpop.eup %1646  ;;  %1666 = vpow2.f32 %v1049_v53  ;;  %v1055_v57 = vmul.f32 1.442695, %v1034_v47  ;;  %v2762_v26 = vsel %vm796_vm6, %v780_v9, %v812_v62  ;;  %v811_v19 = vmul.f32 0.2, %v779_v48 }
 0x131   :  { %v2764_v60 = vpop.eup %1648  ;;  %v1110_v61 = vadd.f32 %v2749_v1, %v1094_v51  ;;  %v1077_v16 = vadd.f32 %v2759_v4, %v2755_v31  ;;  %1668 = vpow2.f32 %v911_v37  ;;  %v889_v59 = vsub.f32 %v3706_v11, %v873_v35 }
 0x132   :  { %v2770_v39 = vpop.eup %1650  ;;  %1670 = vpow2.f32 %v959_v33  ;;  %v937_v3 = vsub.f32 %v3707_v44, %v873_v35  ;;  %v985_v45 = vsub.f32 %v2678_v21, %v873_v35  ;;  %v1033_v54 = vsub.f32 %v825_v43, %v873_v35 }
 0x133   :  { %v2774_v30 = vpop.eup %1652  ;;  %1672 = vrcp.f32 %v1110_v61  ;;  %v1093_v7 = vadd.f32 %v2764_v60, %v1077_v16  ;;  %v909_v32 = vmul.f32 1.442695, %v889_v59  ;;  %v876_v8 = vmax.f32 %v860_v28, %v2762_v26  ;;  %v758_v61 = vpop.xlane.xlu0 %757 }
 0x134   :  { %v2778_v50 = vpop.eup %1654  ;;  %1674 = vpow2.f32 %v1007_v17  ;;  %v957_v11 = vmul.f32 1.442695, %v937_v3  ;;  %v1005_v49 = vmul.f32 1.442695, %v985_v45  ;;  %vm795_vm7 = vcmp.gt.f32.partialorder %v779_v48, 0.0 }
 0x135   :  { %v2780_v53 = vpop.eup %1656  ;;  %v1109_v44 = vadd.f32 %v2770_v39, %v1093_v7  ;;  %v1080_v21 = vadd.f32 %v2778_v50, %v2774_v30  ;;  %1676 = vpow2.f32 %v1055_v57  ;;  %v892_v52 = vsub.f32 %v3709_v41, %v876_v8 }
 0x136   :  { %v2786_v9 = vpop.eup %1658  ;;  %1678 = vpow2.f32 %v909_v32  ;;  %v1053_v6 = vmul.f32 1.442695, %v1033_v54  ;;  %v940_v2 = vsub.f32 %v3710_v63, %v876_v8  ;;  %v782_v62 = vadd.f32 %v760_v36, %v2329_v56 }
 0x137   :  { %v2790_v34 = vpop.eup %1660  ;;  %1680 = vrcp.f32 %v1109_v44  ;;  %v1096_v46 = vadd.f32 %v2780_v53, %v1080_v21  ;;  %v2795_v24 = vadd.f32 %v2583_v25, %v2569_v13  ;;  %v2797_v18 = vsel %vm795_vm7, %v779_v48, %v811_v19 }
 0x138   :  { %v2799_v47 = vpop.eup %1662  ;;  %1682 = vpow2.f32 %v957_v11  ;;  %v915_v43 = vmul.f32 1.442695, %v892_v52  ;;  %v963_v41 = vmul.f32 1.442695, %v940_v2  ;;  %v988_v63 = vsub.f32 %v2718_v22, %v876_v8 }
 0x139   :  { %v2802_v23 = vpop.eup %1664  ;;  %v1112_v56 = vadd.f32 %v2786_v9, %v1096_v46  ;;  %v1079_v28 = vadd.f32 %v2799_v47, %v2790_v34  ;;  %1684 = vpow2.f32 %v1005_v49  ;;  %v2809_v13 = vmax.f32 %v2580_v29, %v2797_v18  ;;  %v3713_v49 = vld [vmem:[#allocation2_spill] sm:$0xff] }
 0x13a   :  { %v2811_v25 = vpop.eup %1666  ;;  %1686 = vpow2.f32 %v1053_v6  ;;  %v1036_v48 = vsub.f32 %v2762_v26, %v876_v8  ;;  %vm798_vm8 = vcmp.gt.f32.partialorder %v782_v62, 0.0  ;;  %v814_v37 = vmul.f32 0.2, %v782_v62  ;;  %v3716_v6 = vld [vmem:[#allocation18_spill] sm:$0xff] }
 0x13b   :  { %v2814_v22 = vpop.eup %1668  ;;  %1688 = vrcp.f32 %v1112_v56  ;;  %v1095_v33 = vadd.f32 %v2802_v23, %v1079_v28  ;;  %v891_v51 = vsub.f32 %v2388_v15, %v2809_v13  ;;  %v939_v17 = vsub.f32 %v2409_v55, %v2809_v13 }
 0x13c   :  { %v2821_v29 = vpop.eup %1670  ;;  %v3712_v35 = vunpack.c.l.bf16 %v2541_v5  ;;  %1690 = vpow2.f32 %v915_v43  ;;  %v1011_v26 = vmul.f32 1.442695, %v988_v63  ;;  %v987_v19 = vsub.f32 %v2571_v14, %v2809_v13  ;;  %v3730_v14 = vld [vmem:[#allocation5_spill] sm:$0xff] }
 0x13d   :  { %v1673_v16 = vpop.eup %1672  ;;  %v1111_v59 = vadd.f32 %v2811_v25, %v1095_v33  ;;  %v1082_v15 = vadd.f32 %v2821_v29, %v2814_v22  ;;  %1692 = vpow2.f32 %v963_v41  ;;  %v2834_v55 = vsel %vm798_vm8, %v782_v62, %v814_v37 }
 0x13e   :  { %v2826_v57 = vmul.f32 %v3712_v35, %v2519_v40  ;;  %v2836_v3 = vpop.eup %1674  ;;  %v1158_v40 = vmul.f32 %v1673_v16, %v2736_v38  ;;  %v1206_v5 = vmul.f32 %v1673_v16, %v2739_v58  ;;  %v1254_v45 = vmul.f32 %v1673_v16, %v2744_v20 }
 0x13f   :  { %v1302_v54 = vmul.f32 %v1673_v16, %v2749_v1  ;;  %v2842_v7 = vpop.eup %1676  ;;  %1694 = vrcp.f32 %v1111_v59  ;;  %v1098_v32 = vadd.f32 %v2836_v3, %v1082_v15  ;;  %v1059_v8 = vmul.f32 1.442695, %v1036_v48  ;;  %v3719_v16 = vld [vmem:[#allocation3_spill] sm:$0xff] }
 0x140   :  { %v2846_v36 = vadd.f32 %v758_v61, %v2331_v10  ;;  %v2848_v11 = vpop.eup %1678  ;;  %v3714_v44 = vunpack.c.l.bf16 %v3713_v49  ;;  %v3715_v58 = vunpack.c.h.bf16 %v3713_v49  ;;  %v913_v20 = vmul.f32 1.442695, %v891_v51 }
 0x141   :  { %v1035_v1 = vsub.f32 %v2797_v18, %v2809_v13  ;;  %v1681_v52 = vpop.eup %1680  ;;  %v3717_v2 = vunpack.c.l.bf16 %v3716_v6  ;;  %v3718_v46 = vunpack.c.h.bf16 %v3716_v6  ;;  %v1114_v43 = vadd.f32 %v2842_v7, %v1098_v32 }
 0x142   :  { %v1174_v38 = vmul.f32 %v1158_v40, %v3714_v44  ;;  %v1222_v21 = vmul.f32 %v1206_v5, %v3715_v58  ;;  %v2863_v41 = vmax.f32 %v2605_v42, %v2834_v55  ;;  %v2865_v63 = vpop.eup %1682  ;;  %v1157_v28 = vmul.f32 %v1681_v52, %v2755_v31  ;;  %v3722_v40 = vld [vmem:[#allocation19_spill] sm:$0xff] }
 0x143   :  { %v1270_v62 = vmul.f32 %v1254_v45, %v3717_v2  ;;  %v1318_v10 = vmul.f32 %v1302_v54, %v3718_v46  ;;  %v1205_v18 = vmul.f32 %v1681_v52, %v2759_v4  ;;  %v1253_v48 = vmul.f32 %v1681_v52, %v2764_v60  ;;  %v2870_v37 = vpop.eup %1684 }
 0x144   :  { %v1238_v56 = vadd.f32 %v1222_v21, %v1174_v38  ;;  %v1301_v33 = vmul.f32 %v1681_v52, %v2770_v39  ;;  %1696 = vrcp.f32 %v1114_v43  ;;  %v1081_v51 = vadd.f32 %v2865_v63, %v2848_v11  ;;  %v2877_v35 = vpop.eup %1686  ;;  %v3725_v43 = vld [vmem:[#allocation4_spill] sm:$0xff] }
 0x145   :  { %v894_v42 = vsub.f32 %v2414_v27, %v2863_v41  ;;  %v3720_v31 = vunpack.c.l.bf16 %v3719_v16  ;;  %v3721_v4 = vunpack.c.h.bf16 %v3719_v16  ;;  %1698 = vpow2.f32 %v1011_v26  ;;  %v1689_v15 = vpop.eup %1688 }
 0x146   :  { %v1286_v61 = vadd.f32 %v1270_v62, %v1238_v56  ;;  %v3723_v39 = vunpack.c.l.bf16 %v3722_v40  ;;  %v3724_v45 = vunpack.c.h.bf16 %v3722_v40  ;;  %v1097_v32 = vadd.f32 %v2870_v37, %v1081_v51  ;;  %v2888_v44 = vpop.eup %1690 }
 0x147   :  { %v1173_v59 = vmul.f32 %v1157_v28, %v3720_v31  ;;  %v1221_v60 = vmul.f32 %v1205_v18, %v3721_v4  ;;  %v961_v49 = vmul.f32 1.442695, %v939_v17  ;;  %v1160_v21 = vmul.f32 %v1689_v15, %v2774_v30  ;;  %v2894_v26 = vpop.eup %1692  ;;  %v3728_v18 = vld [vmem:[#allocation20_spill] sm:$0xff] }
 0x148   :  { %v1269_v5 = vmul.f32 %v1253_v48, %v3723_v39  ;;  %v1317_v54 = vmul.f32 %v1301_v33, %v3724_v45  ;;  %v2890_v38 = vadd.f32 %v1318_v10, %v1286_v61  ;;  %v1208_v52 = vmul.f32 %v1689_v15, %v2778_v50 }
 0x149   :  { %v1237_v58 = vadd.f32 %v1221_v60, %v1173_v59  ;;  %v1256_v6 = vmul.f32 %v1689_v15, %v2780_v53  ;;  %v1304_v2 = vmul.f32 %v1689_v15, %v2786_v9  ;;  %v1113_v62 = vadd.f32 %v2877_v35, %v1097_v32  ;;  %v1695_v28 = vpop.eup %1694 }
 0x14a   :  { %1700 = vpow2.f32 %v1059_v8  ;;  %v1366_v17 = vmin.f32 %v2890_v38, 0.0  ;;  %v3726_v10 = vunpack.c.l.bf16 %v3725_v43  ;;  %v3727_v30 = vunpack.c.h.bf16 %v3725_v43  ;;  %v3737_v43 = vld [vmem:[#allocation6_spill] sm:$0xff] }
 0x14b   :  { %v1285_v46 = vadd.f32 %v1269_v5, %v1237_v58  ;;  %1702 = vpow2.f32 %v913_v20  ;;  %v3729_v48 = vunpack.c.l.bf16 %v3728_v18  ;;  %v1009_v53 = vmul.f32 1.442695, %v987_v19  ;;  %v3734_v5 = vld [vmem:[#allocation21_spill] sm:$0xff] }
 0x14c   :  { %v1176_v56 = vmul.f32 %v1160_v21, %v3726_v10  ;;  %v1224_v50 = vmul.f32 %v1208_v52, %v3727_v30  ;;  %1704 = vrcp.f32 %v1113_v62  ;;  %v1383_v9 = vmul.f32 1.442695, %v1366_v17 }
 0x14d   :  { %v1272_v33 = vmul.f32 %v1256_v6, %v3729_v48  ;;  %v2909_v8 = vadd.f32 %v1317_v54, %v1285_v46  ;;  %v1159_v51 = vmul.f32 %v1695_v28, %v2790_v34  ;;  %v1207_v61 = vmul.f32 %v1695_v28, %v2799_v47 }
 0x14e   :  { %v1240_v20 = vadd.f32 %v1224_v50, %v1176_v56  ;;  %v1255_v16 = vmul.f32 %v1695_v28, %v2802_v23  ;;  %v1303_v31 = vmul.f32 %v1695_v28, %v2811_v25  ;;  %v1084_v59 = vadd.f32 %v2894_v26, %v2888_v44  ;;  %v1697_v15 = vpop.eup %1696  ;;  %v3740_v50 = vld [vmem:[#allocation22_spill] sm:$0xff] }
 0x14f   :  { %1706 = vpow2.f32 %v1383_v9  ;;  %v1365_v4 = vmin.f32 %v2909_v8, 0.0  ;;  %v3731_v13 = vunpack.c.l.bf16 %v3730_v14  ;;  %v1057_v60 = vmul.f32 1.442695, %v1035_v1  ;;  %v2926_v54 = vpop.eup %1698 }
 0x150   :  { %v1288_v40 = vadd.f32 %v1272_v33, %v1240_v20  ;;  %v3732_v34 = vunpack.c.h.bf16 %v3728_v18  ;;  %v3733_v39 = vunpack.c.h.bf16 %v3730_v14  ;;  %v3735_v25 = vunpack.c.l.bf16 %v3734_v5 }
 0x151   :  { %v1175_v19 = vmul.f32 %v1159_v51, %v3731_v13  ;;  %v1381_v32 = vmul.f32 1.442695, %v1365_v4  ;;  %v1162_v58 = vmul.f32 %v1697_v15, %v2814_v22  ;;  %v1210_v21 = vmul.f32 %v1697_v15, %v2821_v29 }
 0x152   :  { %v1320_v47 = vmul.f32 %v1304_v2, %v3732_v34  ;;  %v1223_v23 = vmul.f32 %v1207_v61, %v3733_v39  ;;  %v1271_v45 = vmul.f32 %v1255_v16, %v3735_v25  ;;  %v1258_v1 = vmul.f32 %v1697_v15, %v2836_v3  ;;  %v3743_v34 = vld [vmem:[#allocation7_spill] sm:$0xff] }
 0x153   :  { %v1306_v2 = vmul.f32 %v1697_v15, %v2842_v7  ;;  %v1100_v62 = vadd.f32 %v2926_v54, %v1084_v59  ;;  %1708 = vpow2.f32 %v1381_v32  ;;  %v3736_v17 = vunpack.c.h.bf16 %v3734_v5  ;;  %v3746_v5 = vld [vmem:[#allocation23_spill] sm:$0xff] }
 0x154   :  { %v2931_v52 = vadd.f32 %v1320_v47, %v1288_v40  ;;  %v1239_v6 = vadd.f32 %v1223_v23, %v1175_v19  ;;  %v3738_v10 = vunpack.c.l.bf16 %v3737_v43  ;;  %v3739_v22 = vunpack.c.h.bf16 %v3737_v43  ;;  %v2941_v29 = vpop.eup %1700 }
 0x155   :  { %v1319_v46 = vmul.f32 %v1303_v31, %v3736_v17  ;;  %v3741_v18 = vunpack.c.l.bf16 %v3740_v50  ;;  %v3742_v48 = vunpack.c.h.bf16 %v3740_v50  ;;  %v2948_v9 = vpop.eup %1702  ;;  %v1116_v61 = vadd.f32 %v2941_v29, %v1100_v62 }
 0x156   :  { %v1178_v56 = vmul.f32 %v1162_v58, %v3738_v10  ;;  %v1226_v28 = vmul.f32 %v1210_v21, %v3739_v22  ;;  %v1368_v3 = vmin.f32 %v2931_v52, 0.0  ;;  %v1287_v30 = vadd.f32 %v1271_v45, %v1239_v6  ;;  %v1705_v16 = vpop.eup %1704  ;;  %v2982_v10 = vld [vmem:[%s3415_s4 + $0x18] sm:$0xff]  }
 0x157   :  { %v1274_v7 = vmul.f32 %v1258_v1, %v3741_v18  ;;  %v1322_v33 = vmul.f32 %v1306_v2, %v3742_v48  ;;  %1710 = vpow2.f32 %v961_v49  ;;  %v942_v20 = vsub.f32 %v2433_v0, %v2863_v41  ;;  %v3749_v2 = vld [vmem:[#allocation64_spill] sm:$0xff] }
 0x158   :  { %v1242_v51 = vadd.f32 %v1226_v28, %v1178_v56  ;;  %v1387_v31 = vmul.f32 1.442695, %v1368_v3  ;;  %v2953_v59 = vadd.f32 %v1319_v46, %v1287_v30  ;;  %1712 = vpow2.f32 %v1009_v53  ;;  %v3750_v30 = vld [vmem:[#allocation65_spill] sm:$0xff] }
 0x159   :  { %v990_v4 = vsub.f32 %v2590_v12, %v2863_v41  ;;  %v1161_v13 = vmul.f32 %v1705_v16, %v2848_v11  ;;  %v1209_v19 = vmul.f32 %v1705_v16, %v2865_v63  ;;  %v1257_v15 = vmul.f32 %v1705_v16, %v2870_v37  ;;  %v1707_v53 = vpop.eup %1706 }
 0x15a   :  { %v1290_v14 = vadd.f32 %v1274_v7, %v1242_v51  ;;  %1714 = vpow2.f32 %v1387_v31  ;;  %v1367_v49 = vmin.f32 %v2953_v59, 0.0  ;;  %v1305_v0 = vmul.f32 %v1705_v16, %v2877_v35 }
 0x15b   :  { %v919_v40 = vmul.f32 1.442695, %v894_v42  ;;  %vm1350_vm9 = vcmp.gt.f32.partialorder %v2890_v38, 0.0  ;;  %v3744_v11 = vunpack.c.l.bf16 %v3743_v34  ;;  %v3745_v63 = vunpack.c.h.bf16 %v3743_v34 }
 0x15c   :  { %v2966_v12 = vadd.f32 %v1322_v33, %v1290_v14  ;;  %v1503_v39 = vadd.f32 -1.0, %v1707_v53  ;;  %v1385_v23 = vmul.f32 1.442695, %v1367_v49  ;;  %v3747_v25 = vunpack.c.l.bf16 %v3746_v5  ;;  %v3753_v14 = vld [vmem:[#allocation53_spill] sm:$0xff] }
 0x15d   :  { %v1177_v47 = vmul.f32 %v1161_v13, %v3744_v11  ;;  %v1225_v37 = vmul.f32 %v1209_v19, %v3745_v63  ;;  %1716 = vrcp.f32 %v1116_v61  ;;  %v3748_v45 = vunpack.c.h.bf16 %v3746_v5  ;;  %v1709_v6 = vpop.eup %1708  ;;  %v3754_v19 = vld [vmem:[#allocation69_spill] sm:$0xff]  ;;  %v764_v11 = vpop.xlane.xlu1 %763  ;;  %v3755_v63 = vld [vmem:[#allocation66_spill] sm:$0xff] }
 0x15e   :  { %v1273_v35 = vmul.f32 %v1257_v15, %v3747_v25  ;;  %v1370_v27 = vmin.f32 %v2966_v12, 0.0  ;;  %1718 = vpow2.f32 %v1057_v60  ;;  %v1430_v58 = vsel %vm1350_vm9, %v2890_v38, %v1503_v39 }
 0x15f   :  { %v1241_v42 = vadd.f32 %v1225_v37, %v1177_v47  ;;  %v1321_v32 = vmul.f32 %v1305_v0, %v3748_v45  ;;  %1720 = vpow2.f32 %v1385_v23  ;;  %v967_v21 = vmul.f32 1.442695, %v942_v20 }
 0x160   :  { %v1015_v1 = vmul.f32 1.442695, %v990_v4  ;;  %v1446_v62 = vadd.f32 %v1430_v58, %v3749_v2  ;;  %v1391_v17 = vmul.f32 1.442695, %v1370_v27  ;;  %1722 = vpow2.f32 %v919_v40  ;;  %v3756_v27 = vld [vmem:[#allocation8_spill] sm:$0xff] }
 0x161   :  { %v1289_v46 = vadd.f32 %v1273_v35, %v1241_v42  ;;  %v1502_v43 = vadd.f32 -1.0, %v1709_v6  ;;  %1724 = vpow2.f32 %v967_v21  ;;  %v1038_v60 = vsub.f32 %v2834_v55, %v2863_v41  ;;  %v2987_v38 = vpop.eup %1710 }
 0x162   :  { %vm797_vm10 = vcmp.gt.f32.partialorder %v2846_v36, 0.0  ;;  %1462 = vst [vmem:[%s3417_s6 + $0x8] sm:$0xff] %v1446_v62  ;;  %vm1349_vm11 = vcmp.gt.f32.partialorder %v2909_v8, 0.0  ;;  %1726 = vpow2.f32 %v1391_v17  ;;  %v813_v22 = vmul.f32 0.2, %v2846_v36  ;;  %v2996_v28 = vpop.eup %1712 }
 0x163   :  { %v2993_v56 = vadd.f32 %v1321_v32, %v1289_v46  ;;  %v1429_v3 = vsel %vm1349_vm11, %v2909_v8, %v1502_v43  ;;  %v1083_v55 = vadd.f32 %v2987_v38, %v2948_v9  ;;  %1728 = vpow2.f32 %v1015_v1  ;;  %v3751_v8 = vld [vmem:[#allocation70_spill] sm:$0xff] }
 0x164   :  { %v1063_v41 = vmul.f32 1.442695, %v1038_v60  ;;  %v1445_v50 = vadd.f32 %v1429_v3, %v3750_v30  ;;  %v1533_v7 = vunpack.c.h.bf16 %v2982_v10  ;;  %v829_v48 = vsel %vm797_vm10, %v2846_v36, %v813_v22  ;;  %v1715_v33 = vpop.eup %1714  ;;  %v3752_v36 = vld [vmem:[#allocation50_spill] sm:$0xff]  ;;  %v3762_v60 = vld [vmem:[#allocation67_spill] sm:$0xff] }
 0x165   :  { %v1369_v18 = vmin.f32 %v2993_v56, 0.0  ;;  %vm1352_vm12 = vcmp.gt.f32.partialorder %v2931_v52, 0.0  ;;  %v1099_v51 = vadd.f32 %v2996_v28, %v1083_v55  ;;  %v877_v61 = vmax.f32 %v3751_v8, %v829_v48  ;;  %v3761_v1 = vld [vmem:[#allocation34_spill] sm:$0xff] }
 0x166   :  { %1730 = vpow2.f32 %v1063_v41  ;;  %1461 = vst [vmem:[%s3417_s6] sm:$0xff] %v1445_v50  ;;  %v1505_v20 = vadd.f32 -1.0, %v1715_v33  ;;  %vm1351_vm13 = vcmp.gt.f32.partialorder %v2953_v59, 0.0  ;;  %vm1354_vm14 = vcmp.gt.f32.partialorder %v2966_v12, 0.0  ;;  %v3050_v41 = vld [vmem:[%s3415_s4 + $0x58] sm:$0xff]  }
 0x167   :  { %v1389_v16 = vmul.f32 1.442695, %v1369_v18  ;;  %v1717_v31 = vpop.eup %1716  ;;  %v893_v4 = vsub.f32 %v3752_v36, %v877_v61  ;;  %v941_v13 = vsub.f32 %v3753_v14, %v877_v61  ;;  %v989_v15 = vsub.f32 %v3754_v19, %v877_v61  ;;  %v3764_v14 = vld [vmem:[#allocation68_spill] sm:$0xff] }
 0x168   :  { %v1037_v49 = vsub.f32 %v829_v48, %v877_v61  ;;  %v3016_v0 = vpop.eup %1718  ;;  %v1432_v40 = vsel %vm1352_vm12, %v2931_v52, %v1505_v20  ;;  %v1164_v53 = vmul.f32 %v1717_v31, %v2888_v44  ;;  %v1212_v34 = vmul.f32 %v1717_v31, %v2894_v26 }
 0x169   :  { %1732 = vpow2.f32 %v1389_v16  ;;  %v1721_v47 = vpop.eup %1720  ;;  %v1448_v37 = vadd.f32 %v1432_v40, %v3755_v63  ;;  %v1260_v39 = vmul.f32 %v1717_v31, %v2926_v54  ;;  %v1308_v23 = vmul.f32 %v1717_v31, %v2941_v29  ;;  %v3759_v54 = vld [vmem:[#allocation24_spill] sm:$0xff]  ;;  %v3079_v40 = vld [vmem:[%s3416_s5] ss:$0 sm:$0xff] }
 0x16a   :  { %v1115_v5 = vadd.f32 %v3016_v0, %v1099_v51  ;;  %v3025_v25 = vpop.eup %1722  ;;  %v1504_v35 = vadd.f32 -1.0, %v1721_v47  ;;  %v3757_v52 = vunpack.c.l.bf16 %v3756_v27  ;;  %v3758_v44 = vunpack.c.h.bf16 %v3756_v27  ;;  %v3767_v47 = vld [vmem:[#allocation54_spill] sm:$0xff] }
 0x16b   :  { %v917_v26 = vmul.f32 1.442695, %v893_v4  ;;  %v3031_v32 = vpop.eup %1724  ;;  %1464 = vst [vmem:[%s3417_s6 + $0x18] sm:$0xff] %v1448_v37  ;;  %v3760_v29 = vunpack.c.l.bf16 %v3759_v54  ;;  %v965_v21 = vmul.f32 1.442695, %v941_v13  ;;  %v784_v6 = vadd.f32 %v764_v11, %v3761_v1  ;;  %v3768_v37 = vld [vmem:[#allocation71_spill] sm:$0xff] }
 0x16c   :  { %v1180_v42 = vmul.f32 %v1164_v53, %v3757_v52  ;;  %v1228_v45 = vmul.f32 %v1212_v34, %v3758_v44  ;;  %1734 = vrcp.f32 %v1115_v5  ;;  %v1727_v2 = vpop.eup %1726  ;;  %v1431_v62 = vsel %vm1351_vm13, %v2953_v59, %v1504_v35  ;;  %v3091_v35 = vld [vmem:[%s3416_s5 + $0x1] ss:$0 sm:$0xff] }
 0x16d   :  { %v1276_v58 = vmul.f32 %v1260_v39, %v3760_v29  ;;  %v1086_v46 = vadd.f32 %v3031_v32, %v3025_v25  ;;  %1736 = vpow2.f32 %v917_v26  ;;  %v3044_v43 = vpop.eup %1728  ;;  %v1447_v22 = vadd.f32 %v1431_v62, %v3762_v60 }
 0x16e   :  { %v1244_v17 = vadd.f32 %v1228_v45, %v1180_v42  ;;  %v1507_v3 = vadd.f32 -1.0, %v1727_v2  ;;  %1738 = vpow2.f32 %v965_v21  ;;  %v1013_v55 = vmul.f32 1.442695, %v989_v15  ;;  %v762_v15 = vpop.xlane.xlu0 %761  ;;  %v3769_v42 = vld [vmem:[#allocation35_spill] sm:$0xff] }
 0x16f   :  { %v3763_v59 = vunpack.c.h.bf16 %v3759_v54  ;;  %v1102_v18 = vadd.f32 %v3044_v43, %v1086_v46  ;;  %v1061_v48 = vmul.f32 1.442695, %v1037_v49  ;;  %1463 = vst [vmem:[%s3417_s6 + $0x10] sm:$0xff] %v1447_v22  ;;  %vm800_vm15 = vcmp.gt.f32.partialorder %v784_v6, 0.0 }
 0x170   :  { %v1292_v30 = vadd.f32 %v1276_v58, %v1244_v17  ;;  %v3055_v33 = vpop.eup %1730  ;;  %v1434_v51 = vsel %vm1354_vm14, %v2966_v12, %v1507_v3  ;;  %1740 = vpow2.f32 %v1013_v55  ;;  %v816_v8 = vmul.f32 0.2, %v784_v6 }
 0x171   :  { %v1324_v50 = vmul.f32 %v1308_v23, %v3763_v59  ;;  %v1450_v61 = vadd.f32 %v1434_v51, %v2795_v24  ;;  %v1118_v16 = vadd.f32 %v3055_v33, %v1102_v18  ;;  %v1565_v31 = vunpack.c.h.bf16 %v3050_v41  ;;  %v3765_v24 = vld [vmem:[#allocation73_spill] sm:$0xff] }
 0x172   :  { %1742 = vpow2.f32 %v1061_v48  ;;  %v832_v36 = vsel %vm800_vm15, %v784_v6, %v816_v8  ;;  %v155_v12 = vadd.f32 %v2826_v57, %v3764_v14  ;;  %vm1353_vm0 = vcmp.gt.f32.partialorder %v2993_v56, 0.0  ;;  %v3766_v57 = vld [vmem:[#allocation51_spill] sm:$0xff]  ;;  %v3770_v6 = vld [vmem:[#allocation9_spill] sm:$0xff] }
 0x173   :  { %v3064_v20 = vadd.f32 %v1324_v50, %v1292_v30  ;;  %v1733_v4 = vpop.eup %1732  ;;  %1466 = vst [vmem:[%s3417_s6 + $0x28] sm:$0xff] %v1450_v61  ;;  %1744 = vrcp.f32 %v1118_v16  ;;  %v880_v19 = vmax.f32 %v3765_v24, %v832_v36  ;;  %v69_v53 = vmul.f32 %v3079_v40, %v1533_v7  ;;  %v768_v24 = vpop.xlane.xlu1 %767 }
 0x174   :  { %v1506_v49 = vadd.f32 -1.0, %v1733_v4  ;;  %v142_v27 = vmul.f32 %v3091_v35, %v1565_v31  ;;  %v783_v7 = vadd.f32 %v762_v15, %v3769_v42  ;;  %v3771_v2 = vunpack.c.l.bf16 %v3770_v6  ;;  %v3776_v15 = vld [vmem:[#allocation74_spill] sm:$0xff] }
 0x175   :  { %v1372_v13 = vmin.f32 %v3064_v20, 0.0  ;;  %v896_v11 = vsub.f32 %v3766_v57, %v880_v19  ;;  %v944_v63 = vsub.f32 %v3767_v47, %v880_v19  ;;  %v992_v39 = vsub.f32 %v3768_v37, %v880_v19 }
 0x176   :  { %v1735_v23 = vpop.eup %1734  ;;  %v1433_v5 = vsel %vm1353_vm0, %v2993_v56, %v1506_v49  ;;  %v1040_v52 = vsub.f32 %v832_v36, %v880_v19  ;;  %v3772_v17 = vunpack.c.h.bf16 %v3770_v6  ;;  %vm799_vm1 = vcmp.gt.f32.partialorder %v783_v7, 0.0 }
 0x177   :  { %v1395_v34 = vmul.f32 1.442695, %v1372_v13  ;;  %v3095_v44 = vpop.eup %1736  ;;  %v1449_v45 = vadd.f32 %v1433_v5, %v155_v12  ;;  %v1163_v26 = vmul.f32 %v1735_v23, %v2948_v9  ;;  %v1211_v54 = vmul.f32 %v1735_v23, %v2987_v38 }
 0x178   :  { %v3099_v29 = vpop.eup %1738  ;;  %v1259_v56 = vmul.f32 %v1735_v23, %v2996_v28  ;;  %v1307_v58 = vmul.f32 %v1735_v23, %v3016_v0  ;;  %v923_v21 = vmul.f32 1.442695, %v896_v11  ;;  %v971_v1 = vmul.f32 1.442695, %v944_v63  ;;  %v3773_v0 = vld [vmem:[#allocation25_spill] sm:$0xff]  ;;  %v3780_v11 = vld [vmem:[#allocation52_spill] sm:$0xff] }
 0x179   :  { %1746 = vpow2.f32 %v1395_v34  ;;  %1465 = vst [vmem:[%s3417_s6 + $0x20] sm:$0xff] %v1449_v45  ;;  %v1179_v62 = vmul.f32 %v1163_v26, %v3771_v2  ;;  %v1227_v9 = vmul.f32 %v1211_v54, %v3772_v17  ;;  %v1085_v38 = vadd.f32 %v3099_v29, %v3095_v44  ;;  %v3781_v63 = vld [vmem:[#allocation55_spill] sm:$0xff]  ;;  %v3785_v45 = vld [vmem:[#allocation72_spill] sm:$0xff] }
 0x17a   :  { %v1019_v46 = vmul.f32 1.442695, %v992_v39  ;;  %v3112_v60 = vpop.eup %1740  ;;  %v1532_v28 = vunpack.c.l.bf16 %v2982_v10  ;;  %v3774_v22 = vunpack.c.l.bf16 %v3773_v0  ;;  %1748 = vpow2.f32 %v923_v21  ;;  %v3782_v39 = vld [vmem:[#allocation36_spill] sm:$0xff] }
 0x17b   :  { %v1243_v55 = vadd.f32 %v1227_v9, %v1179_v62  ;;  %v1101_v30 = vadd.f32 %v3112_v60, %v1085_v38  ;;  %1750 = vpow2.f32 %v971_v1  ;;  %v815_v59 = vmul.f32 0.2, %v783_v7 }
 0x17c   :  { %v1275_v3 = vmul.f32 %v1259_v56, %v3774_v22  ;;  %v3118_v50 = vpop.eup %1742  ;;  %v158_v18 = vadd.f32 %v142_v27, %v69_v53  ;;  %v1564_v48 = vunpack.c.l.bf16 %v3050_v41  ;;  %v3775_v51 = vunpack.c.h.bf16 %v3773_v0  ;;  %v3777_v53 = vld [vmem:[#allocation10_spill] sm:$0xff] }
 0x17d   :  { %v1067_v61 = vmul.f32 1.442695, %v1040_v52  ;;  %v1745_v10 = vpop.eup %1744  ;;  %v1117_v31 = vadd.f32 %v3118_v50, %v1101_v30  ;;  %1752 = vpow2.f32 %v1019_v46  ;;  %v831_v36 = vsel %vm799_vm1, %v783_v7, %v815_v59  ;;  %v3783_v52 = vld [vmem:[#allocation26_spill] sm:$0xff]  ;;  %v766_v30 = vpop.xlane.xlu0 %765 }
 0x17e   :  { %v1323_v8 = vmul.f32 %v1307_v58, %v3775_v51  ;;  %v1291_v16 = vadd.f32 %v1275_v3, %v1243_v55  ;;  %v1166_v4 = vmul.f32 %v1745_v10, %v3025_v25  ;;  %v1214_v14 = vmul.f32 %v1745_v10, %v3031_v32 }
 0x17f   :  { %v1262_v12 = vmul.f32 %v1745_v10, %v3044_v43  ;;  %v1310_v13 = vmul.f32 %v1745_v10, %v3055_v33  ;;  %v68_v41 = vmul.f32 %v3079_v40, %v1532_v28  ;;  %1754 = vrcp.f32 %v1117_v31  ;;  %v3157_v28 = vld [vmem:[%s3415_s4 + $0x20] sm:$0xff]  }
 0x180   :  { %v3129_v19 = vadd.f32 %v1323_v8, %v1291_v16  ;;  %v879_v49 = vmax.f32 %v3776_v15, %v831_v36  ;;  %vm1356_vm2 = vcmp.gt.f32.partialorder %v3064_v20, 0.0  ;;  %v3778_v34 = vunpack.c.l.bf16 %v3777_v53 }
 0x181   :  { %v3779_v25 = vunpack.c.h.bf16 %v3777_v53  ;;  %1756 = vpow2.f32 %v1067_v61  ;;  %v786_v23 = vadd.f32 %v768_v24, %v3782_v39  ;;  %v3784_v42 = vunpack.c.l.bf16 %v3783_v52  ;;  %v3788_v53 = vld [vmem:[#allocation77_spill] sm:$0xff] }
 0x182   :  { %v1182_v57 = vmul.f32 %v1166_v4, %v3778_v34  ;;  %v1371_v33 = vmin.f32 %v3129_v19, 0.0  ;;  %v895_v47 = vsub.f32 %v3780_v11, %v879_v49  ;;  %v943_v37 = vsub.f32 %v3781_v63, %v879_v49  ;;  %v3792_v11 = vld [vmem:[#allocation27_spill] sm:$0xff]  ;;  %v3795_v63 = vld [vmem:[#allocation58_spill] sm:$0xff] }
 0x183   :  { %v1230_v32 = vmul.f32 %v1214_v14, %v3779_v25  ;;  %v1747_v43 = vpop.eup %1746  ;;  %v1278_v7 = vmul.f32 %v1262_v12, %v3784_v42  ;;  %v991_v26 = vsub.f32 %v3785_v45, %v879_v49  ;;  %v1039_v21 = vsub.f32 %v831_v36, %v879_v49  ;;  %v3787_v36 = vld [vmem:[#allocation37_spill] sm:$0xff]  ;;  %v3789_v25 = vld [vmem:[#allocation11_spill] sm:$0xff] }
 0x184   :  { %v1509_v5 = vadd.f32 -1.0, %v1747_v43  ;;  %v1393_v54 = vmul.f32 1.442695, %v1371_v33  ;;  %v921_v56 = vmul.f32 1.442695, %v895_v47  ;;  %v3144_v1 = vpop.eup %1748  ;;  %v141_v2 = vmul.f32 %v3091_v35, %v1564_v48 }
 0x185   :  { %v1246_v27 = vadd.f32 %v1230_v32, %v1182_v57  ;;  %v969_v58 = vmul.f32 1.442695, %v943_v37  ;;  %v3786_v17 = vunpack.c.h.bf16 %v3783_v52  ;;  %v3152_v38 = vpop.eup %1750  ;;  %v1017_v0 = vmul.f32 1.442695, %v991_v26 }
 0x186   :  { %v1436_v6 = vsel %vm1356_vm2, %v3064_v20, %v1509_v5  ;;  %1758 = vpow2.f32 %v1393_v54  ;;  %vm802_vm3 = vcmp.gt.f32.partialorder %v786_v23, 0.0  ;;  %v3162_v20 = vld [vmem:[%s3415_s4 + $0x60] sm:$0xff]   ;;  %v1088_v3 = vadd.f32 %v3152_v38, %v3144_v1 }
 0x187   :  { %v1294_v62 = vadd.f32 %v1278_v7, %v1246_v27  ;;  %v1326_v9 = vmul.f32 %v1310_v13, %v3786_v17  ;;  %v1452_v46 = vadd.f32 %v1436_v6, %v158_v18  ;;  %1760 = vpow2.f32 %v921_v56  ;;  %v3168_v59 = vpop.eup %1752 }
 0x188   :  { %v818_v55 = vmul.f32 0.2, %v786_v23  ;;  %1762 = vpow2.f32 %v969_v58  ;;  %v1065_v18 = vmul.f32 1.442695, %v1039_v21  ;;  %v157_v48 = vadd.f32 %v141_v2, %v68_v41 }
 0x189   :  { %v3164_v22 = vadd.f32 %v1326_v9, %v1294_v62  ;;  %1468 = vst [vmem:[%s3417_s6 + $0x38] sm:$0xff] %v1452_v46  ;;  %v1537_v51 = vunpack.c.h.bf16 %v3157_v28  ;;  %v1104_v61 = vadd.f32 %v3168_v59, %v1088_v3  ;;  %v1755_v10 = vpop.eup %1754  ;;  %v1569_v16 = vunpack.c.h.bf16 %v3162_v20 }
 0x18a   :  { %1764 = vpow2.f32 %v1017_v0  ;;  %v834_v31 = vsel %vm802_vm3, %v786_v23, %v818_v55  ;;  %v785_v4 = vadd.f32 %v766_v30, %v3787_v36  ;;  %v1165_v13 = vmul.f32 %v1755_v10, %v3095_v44  ;;  %v3796_v23 = vld [vmem:[#allocation75_spill] sm:$0xff] }
 0x18b   :  { %v1374_v8 = vmin.f32 %v3164_v22, 0.0  ;;  %v3179_v14 = vpop.eup %1756  ;;  %v1213_v24 = vmul.f32 %v1755_v10, %v3099_v29  ;;  %v1261_v41 = vmul.f32 %v1755_v10, %v3112_v60  ;;  %v1309_v15 = vmul.f32 %v1755_v10, %v3118_v50  ;;  %v3794_v60 = vld [vmem:[#allocation56_spill] sm:$0xff] }
 0x18c   :  { %v1120_v49 = vadd.f32 %v3179_v14, %v1104_v61  ;;  %1766 = vpow2.f32 %v1065_v18  ;;  %v882_v34 = vmax.f32 %v3788_v53, %v834_v31  ;;  %v71_v57 = vmul.f32 %v3079_v40, %v1537_v51 }
 0x18d   :  { %v1399_v12 = vmul.f32 1.442695, %v1374_v8  ;;  %v3790_v32 = vunpack.c.l.bf16 %v3789_v25  ;;  %v3791_v33 = vunpack.c.h.bf16 %v3789_v25  ;;  %v3793_v29 = vunpack.c.l.bf16 %v3792_v11  ;;  %v3798_v8 = vld [vmem:[#allocation78_spill] sm:$0xff] }
 0x18e   :  { %v898_v50 = vsub.f32 %v3794_v60, %v882_v34  ;;  %v946_v37 = vsub.f32 %v3795_v63, %v882_v34  ;;  %v994_v5 = vsub.f32 %v3796_v23, %v882_v34  ;;  %v1042_v27 = vsub.f32 %v834_v31, %v882_v34  ;;  %v772_v31 = vpop.xlane.xlu1 %771  ;;  %v3803_v63 = vld [vmem:[#allocation12_spill] sm:$0xff] }
 0x18f   :  { %1768 = vpow2.f32 %v1399_v12  ;;  %v1181_v43 = vmul.f32 %v1165_v13, %v3790_v32  ;;  %v1229_v44 = vmul.f32 %v1213_v24, %v3791_v33  ;;  %v1277_v47 = vmul.f32 %v1261_v41, %v3793_v29  ;;  %v3801_v12 = vld [vmem:[#allocation76_spill] sm:$0xff]  ;;  %v3802_v32 = vld [vmem:[#allocation38_spill] sm:$0xff] }
 0x190   :  { %1770 = vrcp.f32 %v1120_v49  ;;  %vm801_vm4 = vcmp.gt.f32.partialorder %v785_v4, 0.0  ;;  %v1759_v52 = vpop.eup %1758  ;;  %v144_v42 = vmul.f32 %v3091_v35, %v1569_v16  ;;  %v927_v7 = vmul.f32 1.442695, %v898_v50 }
 0x191   :  { %v1245_v39 = vadd.f32 %v1229_v44, %v1181_v43  ;;  %v975_v45 = vmul.f32 1.442695, %v946_v37  ;;  %v817_v26 = vmul.f32 0.2, %v785_v4  ;;  %v3198_v54 = vpop.eup %1760  ;;  %v1508_v56 = vadd.f32 -1.0, %v1759_v52 }
 0x192   :  { %v3797_v21 = vunpack.c.h.bf16 %v3792_v11  ;;  %v1023_v2 = vmul.f32 1.442695, %v994_v5  ;;  %v3202_v62 = vpop.eup %1762  ;;  %vm1355_vm5 = vcmp.gt.f32.partialorder %v3129_v19, 0.0  ;;  %1772 = vpow2.f32 %v927_v7  ;;  %v3253_v7 = vld [vmem:[%s3415_s4 + $0x28] sm:$0xff]  }
 0x193   :  { %v1293_v58 = vadd.f32 %v1277_v47, %v1245_v39  ;;  %v1071_v17 = vmul.f32 1.442695, %v1042_v27  ;;  %v833_v9 = vsel %vm801_vm4, %v785_v4, %v817_v26  ;;  %v1435_v46 = vsel %vm1355_vm5, %v3129_v19, %v1508_v56  ;;  %v3806_v27 = vld [vmem:[#allocation28_spill] sm:$0xff] }
 0x194   :  { %v1325_v6 = vmul.f32 %v1309_v15, %v3797_v21  ;;  %v1087_v3 = vadd.f32 %v3202_v62, %v3198_v54  ;;  %1774 = vpow2.f32 %v975_v45  ;;  %v3210_v55 = vpop.eup %1764  ;;  %v1451_v30 = vadd.f32 %v1435_v46, %v157_v48 }
 0x195   :  { %v1536_v18 = vunpack.c.l.bf16 %v3157_v28  ;;  %v1568_v51 = vunpack.c.l.bf16 %v3162_v20  ;;  %v881_v61 = vmax.f32 %v3798_v8, %v833_v9  ;;  %v160_v10 = vadd.f32 %v144_v42, %v71_v57  ;;  %v3799_v28 = vld [vmem:[#allocation57_spill] sm:$0xff]  ;;  %v3800_v20 = vld [vmem:[#allocation59_spill] sm:$0xff]  ;;  %v770_v42 = vpop.xlane.xlu0 %769 }
 0x196   :  { %v3206_v0 = vadd.f32 %v1325_v6, %v1293_v58  ;;  %v1103_v19 = vadd.f32 %v3210_v55, %v1087_v3  ;;  %1776 = vpow2.f32 %v1023_v2  ;;  %v3217_v36 = vpop.eup %1766  ;;  %1467 = vst [vmem:[%s3417_s6 + $0x30] sm:$0xff] %v1451_v30  ;;  %vm1358_vm6 = vcmp.gt.f32.partialorder %v3164_v22, 0.0  ;;  %v3258_v58 = vld [vmem:[%s3415_s4 + $0x68] sm:$0xff]  }
 0x197   :  { %v897_v48 = vsub.f32 %v3799_v28, %v881_v61  ;;  %v945_v4 = vsub.f32 %v3800_v20, %v881_v61  ;;  %v993_v13 = vsub.f32 %v3801_v12, %v881_v61  ;;  %1778 = vpow2.f32 %v1071_v17  ;;  %v3809_v3 = vld [vmem:[#allocation39_spill] sm:$0xff] }
 0x198   :  { %v1373_v16 = vmin.f32 %v3206_v0, 0.0  ;;  %v1119_v15 = vadd.f32 %v3217_v36, %v1103_v19  ;;  %v1041_v49 = vsub.f32 %v833_v9, %v881_v61  ;;  %v788_v43 = vadd.f32 %v772_v31, %v3802_v32  ;;  %v3810_v61 = vld [vmem:[#allocation81_spill] sm:$0xff] }
 0x199   :  { %v1769_v24 = vpop.eup %1768  ;;  %v925_v57 = vmul.f32 1.442695, %v897_v48  ;;  %v973_v25 = vmul.f32 1.442695, %v945_v4  ;;  %v70_v47 = vmul.f32 %v3079_v40, %v1536_v18  ;;  %v3804_v37 = vunpack.c.l.bf16 %v3803_v63  ;;  %v3811_v48 = vld [vmem:[#allocation60_spill] sm:$0xff]  ;;  %v3812_v4 = vld [vmem:[#allocation62_spill] sm:$0xff] }
 0x19a   :  { %v1397_v41 = vmul.f32 1.442695, %v1373_v16  ;;  %v1771_v53 = vpop.eup %1770  ;;  %v1511_v34 = vadd.f32 -1.0, %v1769_v24  ;;  %v3805_v23 = vunpack.c.h.bf16 %v3803_v63  ;;  %v1021_v5 = vmul.f32 1.442695, %v993_v13  ;;  %v3813_v13 = vld [vmem:[#allocation79_spill] sm:$0xff] }
 0x19b   :  { %v1168_v33 = vmul.f32 %v1771_v53, %v3144_v1  ;;  %v1216_v44 = vmul.f32 %v1771_v53, %v3152_v38  ;;  %v1264_v11 = vmul.f32 %v1771_v53, %v3168_v59  ;;  %v1312_v60 = vmul.f32 %v1771_v53, %v3179_v14 }
 0x19c   :  { %1780 = vpow2.f32 %v1397_v41  ;;  %v1438_v29 = vsel %vm1358_vm6, %v3164_v22, %v1511_v34  ;;  %v3240_v38 = vpop.eup %1772  ;;  %v143_v59 = vmul.f32 %v3091_v35, %v1568_v51  ;;  %v3807_v52 = vunpack.c.l.bf16 %v3806_v27 }
 0x19d   :  { %1782 = vrcp.f32 %v1119_v15  ;;  %v1454_v50 = vadd.f32 %v1438_v29, %v160_v10  ;;  %v1184_v39 = vmul.f32 %v1168_v33, %v3804_v37  ;;  %v1232_v1 = vmul.f32 %v1216_v44, %v3805_v23 }
 0x19e   :  { %v1280_v22 = vmul.f32 %v1264_v11, %v3807_v52  ;;  %1784 = vpow2.f32 %v925_v57  ;;  %vm804_vm7 = vcmp.gt.f32.partialorder %v788_v43, 0.0  ;;  %v3245_v14 = vpop.eup %1774  ;;  %v1069_v26 = vmul.f32 1.442695, %v1041_v49 }
 0x19f   :  { %1470 = vst [vmem:[%s3417_s6 + $0x48] sm:$0xff] %v1454_v50  ;;  %v1248_v45 = vadd.f32 %v1232_v1, %v1184_v39  ;;  %1786 = vpow2.f32 %v973_v25  ;;  %v820_v56 = vmul.f32 0.2, %v788_v43  ;;  %v3808_v21 = vunpack.c.h.bf16 %v3806_v27  ;;  %v3814_v39 = vld [vmem:[#allocation13_spill] sm:$0xff] }
 0x1a0   :  { %v1090_v2 = vadd.f32 %v3245_v14, %v3240_v38  ;;  %v3264_v17 = vpop.eup %1776  ;;  %1788 = vpow2.f32 %v1021_v5  ;;  %v787_v30 = vadd.f32 %v770_v42, %v3809_v3  ;;  %v159_v18 = vadd.f32 %v143_v59, %v70_v47 }
 0x1a1   :  { %v1328_v6 = vmul.f32 %v1312_v60, %v3808_v21  ;;  %v1296_v9 = vadd.f32 %v1280_v22, %v1248_v45  ;;  %v836_v46 = vsel %vm804_vm7, %v788_v43, %v820_v56  ;;  %v1541_v51 = vunpack.c.h.bf16 %v3253_v7  ;;  %v3270_v16 = vpop.eup %1778 }
 0x1a2   :  { %v1106_v8 = vadd.f32 %v3264_v17, %v1090_v2  ;;  %v884_v10 = vmax.f32 %v3810_v61, %v836_v46  ;;  %vm1357_vm8 = vcmp.gt.f32.partialorder %v3206_v0, 0.0  ;;  %v1573_v19 = vunpack.c.h.bf16 %v3258_v58  ;;  %v3822_v61 = vld [vmem:[#allocation63_spill] sm:$0xff] }
 0x1a3   :  { %v3274_v31 = vadd.f32 %v1328_v6, %v1296_v9  ;;  %1790 = vpow2.f32 %v1069_v26  ;;  %vm803_vm9 = vcmp.gt.f32.partialorder %v787_v30, 0.0  ;;  %v819_v53 = vmul.f32 0.2, %v787_v30  ;;  %v3819_v26 = vld [vmem:[#allocation82_spill] sm:$0xff] }
 0x1a4   :  { %v1122_v28 = vadd.f32 %v3270_v16, %v1106_v8  ;;  %v900_v20 = vsub.f32 %v3811_v48, %v884_v10  ;;  %v948_v12 = vsub.f32 %v3812_v4, %v884_v10  ;;  %v996_v24 = vsub.f32 %v3813_v13, %v884_v10 }
 0x1a5   :  { %v1376_v15 = vmin.f32 %v3274_v31, 0.0  ;;  %v1044_v49 = vsub.f32 %v836_v46, %v884_v10  ;;  %v835_v22 = vsel %vm803_vm9, %v787_v30, %v819_v53  ;;  %v73_v42 = vmul.f32 %v3079_v40, %v1541_v51  ;;  %v3823_v10 = vld [vmem:[#allocation80_spill] sm:$0xff] }
 0x1a6   :  { %v1781_v41 = vpop.eup %1780  ;;  %1792 = vrcp.f32 %v1122_v28  ;;  %v931_v25 = vmul.f32 1.442695, %v900_v20  ;;  %v979_v32 = vmul.f32 1.442695, %v948_v12  ;;  %v1027_v50 = vmul.f32 1.442695, %v996_v24 }
 0x1a7   :  { %v1783_v34 = vpop.eup %1782  ;;  %v1510_v57 = vadd.f32 -1.0, %v1781_v41  ;;  %v1403_v43 = vmul.f32 1.442695, %v1376_v15  ;;  %v1075_v52 = vmul.f32 1.442695, %v1044_v49  ;;  %v883_v56 = vmax.f32 %v3819_v26, %v835_v22 }
 0x1a8   :  { %v1167_v33 = vmul.f32 %v1783_v34, %v3198_v54  ;;  %v1215_v44 = vmul.f32 %v1783_v34, %v3202_v62  ;;  %v1263_v11 = vmul.f32 %v1783_v34, %v3210_v55  ;;  %v3284_v29 = vpop.eup %1784  ;;  %v1311_v60 = vmul.f32 %v1783_v34, %v3217_v36  ;;  %v3817_v36 = vld [vmem:[#allocation29_spill] sm:$0xff] }
 0x1a9   :  { %v1437_v47 = vsel %vm1357_vm8, %v3206_v0, %v1510_v57  ;;  %1794 = vpow2.f32 %v931_v25  ;;  %v3290_v63 = vpop.eup %1786  ;;  %v3815_v54 = vunpack.c.l.bf16 %v3814_v39  ;;  %v3816_v62 = vunpack.c.h.bf16 %v3814_v39 }
 0x1aa   :  { %v1453_v37 = vadd.f32 %v1437_v47, %v159_v18  ;;  %1796 = vpow2.f32 %v1403_v43  ;;  %v1089_v1 = vadd.f32 %v3290_v63, %v3284_v29  ;;  %v3298_v5 = vpop.eup %1788  ;;  %v3818_v59 = vunpack.c.l.bf16 %v3817_v36  ;;  %v3821_v18 = vld [vmem:[#allocation61_spill] sm:$0xff]  ;;  %v3824_v43 = vld [vmem:[#allocation14_spill] sm:$0xff] }
 0x1ab   :  { %v1183_v23 = vmul.f32 %v1167_v33, %v3815_v54  ;;  %v1231_v55 = vmul.f32 %v1215_v44, %v3816_v62  ;;  %1798 = vpow2.f32 %v979_v32  ;;  %v146_v6 = vmul.f32 %v3091_v35, %v1573_v19 }
 0x1ac   :  { %1469 = vst [vmem:[%s3417_s6 + $0x40] sm:$0xff] %v1453_v37  ;;  %v1279_v27 = vmul.f32 %v1263_v11, %v3818_v59  ;;  %v1105_v45 = vadd.f32 %v3298_v5, %v1089_v1  ;;  %1800 = vpow2.f32 %v1027_v50  ;;  %v3820_v9 = vunpack.c.h.bf16 %v3817_v36 }
 0x1ad   :  { %v1247_v0 = vadd.f32 %v1231_v55, %v1183_v23  ;;  %v1791_v21 = vpop.eup %1790  ;;  %1802 = vpow2.f32 %v1075_v52  ;;  %v899_v8 = vsub.f32 %v3821_v18, %v883_v56  ;;  %v947_v30 = vsub.f32 %v3822_v61, %v883_v56  ;;  %v3830_v18 = vld [vmem:[#allocation15_spill] sm:$0xff] }
 0x1ae   :  { %v1327_v46 = vmul.f32 %v1311_v60, %v3820_v9  ;;  %v1121_v3 = vadd.f32 %v1791_v21, %v1105_v45  ;;  %v995_v51 = vsub.f32 %v3823_v10, %v883_v56  ;;  %v1043_v48 = vsub.f32 %v835_v22, %v883_v56 }
 0x1af   :  { %v1295_v2 = vadd.f32 %v1279_v27, %v1247_v0  ;;  %v929_v4 = vmul.f32 1.442695, %v899_v8  ;;  %v977_v12 = vmul.f32 1.442695, %v947_v30  ;;  %v162_v13 = vadd.f32 %v146_v6, %v73_v42 }
 0x1b0   :  { %v1793_v20 = vpop.eup %1792  ;;  %1804 = vrcp.f32 %v1121_v3  ;;  %v1025_v19 = vmul.f32 1.442695, %v995_v51  ;;  %v1073_v57 = vmul.f32 1.442695, %v1043_v48  ;;  %v3825_v33 = vunpack.c.l.bf16 %v3824_v43 }
 0x1b1   :  { %v3315_v28 = vadd.f32 %v1327_v46, %v1295_v2  ;;  %v1170_v41 = vmul.f32 %v1793_v20, %v3240_v38  ;;  %v1218_v15 = vmul.f32 %v1793_v20, %v3245_v14  ;;  %v1266_v53 = vmul.f32 %v1793_v20, %v3264_v17  ;;  %v1619_v46 = vld [vmem:[%s3415_s4 + $0x30] sm:$0xff]  }
 0x1b2   :  { %v1314_v34 = vmul.f32 %v1793_v20, %v3270_v16  ;;  %1806 = vpow2.f32 %v929_v4  ;;  %v3826_v11 = vunpack.c.h.bf16 %v3824_v43  ;;  %vm1360_vm10 = vcmp.gt.f32.partialorder %v3274_v31, 0.0  ;;  %v3827_v16 = vld [vmem:[#allocation30_spill] sm:$0xff]  ;;  %v3833_v20 = vld [vmem:[#allocation31_spill] sm:$0xff] }
 0x1b3   :  { %v1375_v24 = vmin.f32 %v3315_v28, 0.0  ;;  %v3320_v49 = vpop.eup %1794  ;;  %v1186_v44 = vmul.f32 %v1170_v41, %v3825_v33  ;;  %1808 = vpow2.f32 %v977_v12  ;;  %v3828_v60 = vunpack.c.l.bf16 %v3827_v16 }
 0x1b4   :  { %v1797_v25 = vpop.eup %1796  ;;  %v1234_v47 = vmul.f32 %v1218_v15, %v3826_v11  ;;  %1810 = vpow2.f32 %v1025_v19  ;;  %v1540_v23 = vunpack.c.l.bf16 %v3253_v7  ;;  %v1572_v62 = vunpack.c.l.bf16 %v3258_v58 }
 0x1b5   :  { %v1401_v32 = vmul.f32 1.442695, %v1375_v24  ;;  %v3328_v38 = vpop.eup %1798  ;;  %v1513_v14 = vadd.f32 -1.0, %v1797_v25  ;;  %v1282_v50 = vmul.f32 %v1266_v53, %v3828_v60  ;;  %v3829_v55 = vunpack.c.h.bf16 %v3827_v16 }
 0x1b6   :  { %v1250_v17 = vadd.f32 %v1234_v47, %v1186_v44  ;;  %v1092_v37 = vadd.f32 %v3328_v38, %v3320_v49  ;;  %v1801_v39 = vpop.eup %1800  ;;  %v145_v7 = vmul.f32 %v3091_v35, %v1572_v62  ;;  %v3831_v8 = vunpack.c.l.bf16 %v3830_v18 }
 0x1b7   :  { %1812 = vpow2.f32 %v1401_v32  ;;  %v1440_v54 = vsel %vm1360_vm10, %v3274_v31, %v1513_v14  ;;  %v1330_v1 = vmul.f32 %v1314_v34, %v3829_v55  ;;  %v1803_v0 = vpop.eup %1802  ;;  %v72_v31 = vmul.f32 %v3079_v40, %v1540_v23  ;;  %v3836_v23 = vld [vmem:[#allocation16_spill] sm:$0xff] }
 0x1b8   :  { %v1456_v36 = vadd.f32 %v1440_v54, %v162_v13  ;;  %v1298_v59 = vadd.f32 %v1282_v50, %v1250_v17  ;;  %v1108_v27 = vadd.f32 %v1801_v39, %v1092_v37  ;;  %1814 = vpow2.f32 %v1073_v57 }
 0x1b9   :  { %v3832_v30 = vunpack.c.h.bf16 %v3830_v18  ;;  %v161_v51 = vadd.f32 %v145_v7, %v72_v31  ;;  %v3834_v4 = vunpack.c.l.bf16 %v3833_v20  ;;  %v1545_v13 = vunpack.c.h.bf16 %v1619_v46  ;;  %v3839_v31 = vld [vmem:[#allocation32_spill] sm:$0xff] }
 0x1ba   :  { %1472 = vst [vmem:[%s3417_s6 + $0x58] sm:$0xff] %v1456_v36  ;;  %v1346_v52 = vadd.f32 %v1330_v1, %v1298_v59  ;;  %v1124_v22 = vadd.f32 %v1803_v0, %v1108_v27  ;;  %v1805_v42 = vpop.eup %1804  ;;  %vm1359_vm11 = vcmp.gt.f32.partialorder %v3315_v28, 0.0  ;;  %v3835_v34 = vunpack.c.h.bf16 %v3833_v20 }
 0x1bb   :  { %v1169_v45 = vmul.f32 %v1805_v42, %v3284_v29  ;;  %v1217_v26 = vmul.f32 %v1805_v42, %v3290_v63  ;;  %v1265_v6 = vmul.f32 %v1805_v42, %v3298_v5  ;;  %v1313_v2 = vmul.f32 %v1805_v42, %v1791_v21  ;;  %v1627_v63 = vld [vmem:[%s3415_s4 + $0x70] sm:$0xff]  }
 0x1bc   :  { %v1378_v58 = vmin.f32 %v1346_v52, 0.0  ;;  %v1807_v56 = vpop.eup %1806  ;;  %1816 = vrcp.f32 %v1124_v22  ;;  %v1577_v15 = vunpack.c.h.bf16 %v1627_v63  ;;  %v75_v44 = vmul.f32 %v3079_v40, %v1545_v13 }
 0x1bd   :  { %v1809_v9 = vpop.eup %1808  ;;  %v1185_v61 = vmul.f32 %v1169_v45, %v3831_v8  ;;  %v1233_v10 = vmul.f32 %v1217_v26, %v3832_v30  ;;  %v1281_v12 = vmul.f32 %v1265_v6, %v3834_v4  ;;  %v1329_v57 = vmul.f32 %v1313_v2, %v3835_v34  ;;  %v3842_v30 = vld [vmem:[#allocation17_spill] sm:$0xff] }
 0x1be   :  { %v1407_v3 = vmul.f32 1.442695, %v1378_v58  ;;  %v1811_v29 = vpop.eup %1810  ;;  %v1091_v5 = vadd.f32 %v1809_v9, %v1807_v56  ;;  %v148_v11 = vmul.f32 %v3091_v35, %v1577_v15  ;;  %v3837_v62 = vunpack.c.l.bf16 %v3836_v23 }
 0x1bf   :  { %v1249_v48 = vadd.f32 %v1233_v10, %v1185_v61  ;;  %v3838_v1 = vunpack.c.h.bf16 %v3836_v23  ;;  %v1544_v27 = vunpack.c.l.bf16 %v1619_v46  ;;  %v1576_v22 = vunpack.c.l.bf16 %v1627_v63 }
 0x1c0   :  { %1818 = vpow2.f32 %v1407_v3  ;;  %v1107_v24 = vadd.f32 %v1811_v29, %v1091_v5  ;;  %v164_v54 = vadd.f32 %v148_v11, %v75_v44  ;;  %vm1362_vm12 = vcmp.gt.f32.partialorder %v1346_v52, 0.0 }
 0x1c1   :  { %v1813_v21 = vpop.eup %1812  ;;  %v1297_v53 = vadd.f32 %v1281_v12, %v1249_v48  ;;  %v3841_v58 = vunpack.c.h.bf16 %v3839_v31  ;;  %v74_v6 = vmul.f32 %v3079_v40, %v1544_v27  ;;  %v147_v2 = vmul.f32 %v3091_v35, %v1576_v22  ;;  %v3845_v12 = vld [vmem:[#allocation33_spill] sm:$0xff] }
 0x1c2   :  { %v1512_v19 = vadd.f32 -1.0, %v1813_v21  ;;  %v1815_v41 = vpop.eup %1814  ;;  %v3843_v10 = vunpack.c.l.bf16 %v3842_v30  ;;  %v3844_v5 = vunpack.c.h.bf16 %v3842_v30 }
 0x1c3   :  { %v1123_v32 = vadd.f32 %v1815_v41, %v1107_v24  ;;  %v1345_v33 = vadd.f32 %v1329_v57, %v1297_v53  ;;  %v163_v48 = vadd.f32 %v147_v2, %v74_v6 }
 0x1c4   :  { %v1439_v25 = vsel %vm1359_vm11, %v3315_v28, %v1512_v19  ;;  %v3846_v19 = vunpack.c.l.bf16 %v3845_v12 }
 0x1c5   :  { %v1455_v43 = vadd.f32 %v1439_v25, %v161_v51  ;;  %1820 = vrcp.f32 %v1123_v32  ;;  %v1377_v47 = vmin.f32 %v1345_v33, 0.0  ;;  %vm1361_vm13 = vcmp.gt.f32.partialorder %v1345_v33, 0.0 }
 0x1c6   :  { %v1817_v14 = vpop.eup %1816 }
 0x1c7   :  { %1471 = vst [vmem:[%s3417_s6 + $0x50] sm:$0xff] %v1455_v43  ;;  %v1405_v17 = vmul.f32 1.442695, %v1377_v47  ;;  %v1172_v16 = vmul.f32 %v1817_v14, %v3320_v49  ;;  %v1220_v60 = vmul.f32 %v1817_v14, %v3328_v38  ;;  %v1268_v28 = vmul.f32 %v1817_v14, %v1801_v39 }
 0x1c8   :  { %v1316_v50 = vmul.f32 %v1817_v14, %v1803_v0  ;;  %v3840_v49 = vunpack.c.l.bf16 %v3839_v31 }
 0x1c9   :  { %1822 = vpow2.f32 %v1405_v17  ;;  %v1188_v55 = vmul.f32 %v1172_v16, %v3837_v62  ;;  %v1236_v36 = vmul.f32 %v1220_v60, %v3838_v1 }
 0x1ca   :  { %v1819_v37 = vpop.eup %1818  ;;  %v1284_v7 = vmul.f32 %v1268_v28, %v3840_v49  ;;  %v1332_v45 = vmul.f32 %v1316_v50, %v3841_v58 }
 0x1cb   :  { %v1515_v59 = vadd.f32 -1.0, %v1819_v37  ;;  %v1252_v42 = vadd.f32 %v1236_v36, %v1188_v55 }
 0x1cd   :  { %v1442_v38 = vsel %vm1362_vm12, %v1346_v52, %v1515_v59  ;;  %v1300_v0 = vadd.f32 %v1284_v7, %v1252_v42 }
 0x1ce   :  { %v1458_v39 = vadd.f32 %v1442_v38, %v164_v54 }
 0x1cf   :  { %v1821_v26 = vpop.eup %1820  ;;  %v1348_v46 = vadd.f32 %v1332_v45, %v1300_v0 }
 0x1d0   :  { %1474 = vst [vmem:[%s3417_s6 + $0x68] sm:$0xff] %v1458_v39  ;;  %v1171_v3 = vmul.f32 %v1821_v26, %v1807_v56  ;;  %v1219_v18 = vmul.f32 %v1821_v26, %v1809_v9  ;;  %v1267_v8 = vmul.f32 %v1821_v26, %v1811_v29  ;;  %v1315_v61 = vmul.f32 %v1821_v26, %v1815_v41  ;;  %v1620_v56 = vld [vmem:[%s3415_s4 + $0x38] sm:$0xff]  }
 0x1d1   :  { %v1380_v52 = vmin.f32 %v1348_v46, 0.0  ;;  %v1628_v9 = vld [vmem:[%s3415_s4 + $0x78] sm:$0xff]   ;;  %v3847_v41 = vunpack.c.h.bf16 %v3845_v12  ;;  %v1549_v57 = vunpack.c.h.bf16 %v1620_v56  ;;  %v1548_v16 = vunpack.c.l.bf16 %v1620_v56 }
 0x1d2   :  { %v1187_v63 = vmul.f32 %v1171_v3, %v3843_v10  ;;  %v1235_v21 = vmul.f32 %v1219_v18, %v3844_v5  ;;  %v1283_v13 = vmul.f32 %v1267_v8, %v3846_v19  ;;  %v1581_v25 = vunpack.c.h.bf16 %v1628_v9 }
 0x1d3   :  { %v1823_v51 = vpop.eup %1822  ;;  %v1411_v20 = vmul.f32 1.442695, %v1380_v52  ;;  %v1331_v15 = vmul.f32 %v1315_v61, %v3847_v41  ;;  %v77_v44 = vmul.f32 %v3079_v40, %v1549_v57  ;;  %v1580_v60 = vunpack.c.l.bf16 %v1628_v9 }
 0x1d4   :  { %v1251_v4 = vadd.f32 %v1235_v21, %v1187_v63  ;;  %v1514_v24 = vadd.f32 -1.0, %v1823_v51  ;;  %v150_v11 = vmul.f32 %v3091_v35, %v1581_v25  ;;  %vm1364_vm14 = vcmp.gt.f32.partialorder %v1348_v46, 0.0 }
 0x1d5   :  { %1824 = vpow2.f32 %v1411_v20  ;;  %v76_v37 = vmul.f32 %v3079_v40, %v1548_v16  ;;  %v149_v54 = vmul.f32 %v3091_v35, %v1580_v60 }
 0x1d6   :  { %v1299_v29 = vadd.f32 %v1283_v13, %v1251_v4  ;;  %v1441_v53 = vsel %vm1361_vm13, %v1345_v33, %v1514_v24  ;;  %v166_v17 = vadd.f32 %v150_v11, %v77_v44 }
 0x1d7   :  { %v1457_v34 = vadd.f32 %v1441_v53, %v163_v48  ;;  %v165_v62 = vadd.f32 %v149_v54, %v76_v37 }
 0x1d8   :  { %v1347_v32 = vadd.f32 %v1331_v15, %v1299_v29 }
 0x1d9   :  { %1473 = vst [vmem:[%s3417_s6 + $0x60] sm:$0xff] %v1457_v34 }
 0x1da   :  { %v1379_v43 = vmin.f32 %v1347_v32, 0.0  ;;  %vm1363_vm15 = vcmp.gt.f32.partialorder %v1347_v32, 0.0 }
 0x1dc   :  { %v1409_v47 = vmul.f32 1.442695, %v1379_v43 }
 0x1de   :  { %1826 = vpow2.f32 %v1409_v47 }
 0x1df   :  { %v1825_v14 = vpop.eup %1824 }
 0x1e0   :  { %v1517_v33 = vadd.f32 -1.0, %v1825_v14 }
 0x1e2   :  { %v1444_v28 = vsel %vm1364_vm14, %v1348_v46, %v1517_v33 }
 0x1e3   :  { %v1460_v50 = vadd.f32 %v1444_v28, %v166_v17 }
 0x1e5   :  { %1476 = vst [vmem:[%s3417_s6 + $0x78] sm:$0xff] %v1460_v50 }
 0x1e8   :  { %v1827_v23 = vpop.eup %1826 }
 0x1e9   :  { %v1516_v55 = vadd.f32 -1.0, %v1827_v23 }
 0x1eb   :  { %v1443_v1 = vsel %vm1363_vm15, %v1347_v32, %v1516_v55 }
 0x1ec   :  { %v1459_v36 = vadd.f32 %v1443_v1, %v165_v62 }
 0x1ee   :  { %1475 = vst [vmem:[%s3417_s6 + $0x70] sm:$0xff] %v1459_v36 }

</bundles_post_ra>
